<compile_context>
chip_gen: v7x
topology: tpu7x:2x2x1
jax: 0.10.0
libtpu: 0.0.40
codegen_flags: <defaults>
</compile_context>

<pallas_src>
import functools

import jax
import jax.numpy as jnp
from jax.experimental import pallas as pl
from jax.experimental.pallas import tpu as pltpu


def _round_up(v, m):
    return (v + m - 1) // m * m


def _spatia_attn_kernel(x_ref, w_ref, m_ref, o_ref, pad_ref, col_ref,
                        *, W, S, K, P, G, Dpad):
    # x_ref  : (C, S)          one batch element, spatially flattened (S = H*W)
    # w_ref  : (Apad, K*G)     conv weights, taps grouped by kw: t = kw*G + c*K + kh
    # m_ref  : (K, S)          per-kw column-validity masks (0/1, f32)
    # o_ref  : (Apad, S)       sigmoid(conv) output, lane-dense
    # pad_ref: (2, S + 2*Dpad) zero-haloed flat [avg, max] planes (VMEM scratch)
    # col_ref: (K*G, S)        im2col matrix fed to the MXU        (VMEM scratch)
    T_grp = 2 * K              # real taps per kw group (G - T_grp rows are zero pads)

    # ---- channel mean / max (f32 accumulation regardless of input dtype) ----
    x = x_ref[...].astype(jnp.float32)                      # (C, S)
    avg = jnp.mean(x, axis=0, keepdims=True)                # (1, S)
    mx = jnp.max(x, axis=0, keepdims=True)                  # (1, S)

    # ---- refresh only the halo (cheap, megacore-safe), write the interior ---
    zeros_halo = jnp.zeros((2, Dpad), jnp.float32)
    pad_ref[:, 0:Dpad] = zeros_halo
    pad_ref[:, Dpad + S:Dpad + S + Dpad] = zeros_halo
    pad_ref[0:1, Dpad:Dpad + S] = avg                       # aligned (Dpad % 128 == 0)
    pad_ref[1:2, Dpad:Dpad + S] = mx

    # ---- build im2col: each tap row is a static lane-offset slice of a plane.
    # Taps are grouped by kw (G = 16 sublane-aligned rows per group) so each
    # column-validity mask is applied once per group as one aligned block op.
    for kw in range(K):
        base = kw * G
        for c in range(2):
            for kh in range(K):
                t = base + c * K + kh
                d = (kh - P) * W + (kw - P)                 # flat shift of this tap
                col_ref[t:t + 1, :] = pad_ref[c:c + 1, Dpad + d:Dpad + d + S]
        if G > T_grp:  # padded rows carry zero weights but must stay finite
            col_ref[base + T_grp:base + G, :] = jnp.zeros((G - T_grp, S), jnp.float32)
        if kw != P:                                         # kw == P mask is all ones
            col_ref[base:base + G, :] = (col_ref[base:base + G, :]
                                         * m_ref[kw:kw + 1, :])

    # ---- single MXU contraction over all taps, then sigmoid -----------------
    acc = jnp.dot(w_ref[...], col_ref[...],
                  preferred_element_type=jnp.float32,
                  precision=jax.lax.Precision.HIGHEST)      # (Apad, S)
    o_ref[...] = jax.nn.sigmoid(acc).astype(o_ref.dtype)


def spatia_attention(x, weight):
    """x: (N, C, H, W), weight: (A, 2, K, K) -> (N, A, H, W). Matches the PyTorch module."""
    N, C, H, W = x.shape
    A, two, K, K2 = weight.shape
    assert two == 2 and K == K2 and K % 2 == 1
    P = K // 2
    S = H * W
    G = _round_up(2 * K, 8)                      # taps per kw group, whole sublane tiles
    Tpad = K * G                                 # MXU contraction dim (multiple of 8)
    Apad = _round_up(A, 8)                       # full-sublane output rows
    Dpad = _round_up(max(P * W + P, 1), 128)     # halo >= max |flat tap shift|, aligned
    L = S + 2 * Dpad

    # lane-dense layout: flatten spatial dims in the wrapper (contiguous, free)
    x_flat = x.reshape(N, C, S)

    # weights: (A, 2, K, K) -> (Apad, K*G) f32, taps grouped by kw, zero-padded
    w_taps = weight.astype(jnp.float32).transpose(0, 3, 1, 2).reshape(A, K, 2 * K)
    w2 = jnp.zeros((A, K, G), jnp.float32).at[:, :, :2 * K].set(w_taps)
    w2 = jnp.pad(w2.reshape(A, Tpad), ((0, Apad - A), (0, 0)))

    # per-kw column-validity masks: the flattened W-shift must not wrap across rows
    col = jnp.arange(S, dtype=jnp.int32) % W
    masks = jnp.stack(
        [((col + (kw - P) >= 0) & (col + (kw - P) < W)).astype(jnp.float32)
         for kw in range(K)], axis=0)                       # (K, S)

    kernel = functools.partial(
        _spatia_attn_kernel, W=W, S=S, K=K, P=P, G=G, Dpad=Dpad)

    out_flat = pl.pallas_call(
        kernel,
        out_shape=jax.ShapeDtypeStruct((N, Apad, S), x.dtype),
        grid=(N,),
        in_specs=[
            pl.BlockSpec((None, C, S), lambda n: (n, 0, 0)),   # batch dim squeezed
            pl.BlockSpec((Apad, Tpad), lambda n: (0, 0)),      # weights (resident)
            pl.BlockSpec((K, S), lambda n: (0, 0)),            # column masks (resident)
        ],
        out_specs=pl.BlockSpec((None, Apad, S), lambda n: (n, 0, 0)),
        scratch_shapes=[
            pltpu.VMEM((2, L), jnp.float32),       # zero-haloed flat [avg, max]
            pltpu.VMEM((Tpad, S), jnp.float32),    # im2col tile
        ],
        compiler_params=pltpu.CompilerParams(
            dimension_semantics=("parallel",),
            vmem_limit_bytes=32 * 1024 * 1024,
        ),
    )(x_flat, w2, masks)

    # drop the padded output channels, un-flatten spatial dims (free XLA ops)
    return out_flat[:, :A, :].reshape(N, A, H, W)


def _reference(x, weight):
    """Pure-JAX reference matching the PyTorch forward."""
    avg = jnp.mean(x, axis=1, keepdims=True)
    mx = jnp.max(x, axis=1, keepdims=True)
    feat = jnp.concatenate([avg, mx], axis=1)               # (N, 2, H, W)
    P = weight.shape[-1] // 2
    conv = jax.lax.conv_general_dilated(
        feat, weight,
        window_strides=(1, 1),
        padding=((P, P), (P, P)),
        dimension_numbers=("NCHW", "OIHW", "NCHW"),
        precision=jax.lax.Precision.HIGHEST,
    )
    return jax.nn.sigmoid(conv)


if __name__ == "__main__":
    key = jax.random.PRNGKey(0)
    kx, kw = jax.random.split(key)

    N, C, H, W = 2, 4, 16, 16
    attri_num, kernel_size = 4, 7

    x = jax.random.normal(kx, (N, C, H, W), dtype=jnp.float32)
    # deterministic synthetic conv weights (Conv2d(2, attri_num, 7, bias=False))
    weight = 0.1 * jax.random.normal(
        kw, (attri_num, 2, kernel_size, kernel_size), dtype=jnp.float32)

    out = spatia_attention(x, weight)
    out = jax.block_until_ready(out)

    ref = _reference(x, weight)
    assert out.shape == (N, attri_num, H, W)
    err = jnp.max(jnp.abs(out - ref))
    assert jnp.allclose(out, ref, atol=1e-5, rtol=1e-5), f"max abs err {err}"

    print("KERNEL_OK")
</pallas_src>

<mosaic_0001>
module attributes {stable_mosaic.version = 11 : i64} {
  func.func @_spatia_attn_kernel(%arg0: i32, %arg1: memref<1x4x256xf32, #tpu.memory_space<vmem>>, %arg2: memref<8x112xf32, #tpu.memory_space<vmem>>, %arg3: memref<7x256xf32, #tpu.memory_space<vmem>>, %arg4: memref<1x8x256xf32, #tpu.memory_space<vmem>>, %arg5: memref<2x512xf32, #tpu.memory_space<vmem>>, %arg6: memref<112x256xf32, #tpu.memory_space<vmem>>) attributes {dimension_semantics = [#tpu.dimension_semantics<parallel>], iteration_bounds = array<i64: 2>, scalar_prefetch = 0 : i64, scratch_operands = 2 : i64, tpu.core_type = #tpu.core_type<tc>, window_params = [{transform_indices = @transform_0, window_bounds = array<i64: 1, 4, 256>}, {pipeline_mode = #tpu.pipeline_mode<synchronous>, transform_indices = @transform_1, window_bounds = array<i64: 8, 112>}, {pipeline_mode = #tpu.pipeline_mode<synchronous>, transform_indices = @transform_2, window_bounds = array<i64: 7, 256>}, {transform_indices = @transform_3, window_bounds = array<i64: 1, 8, 256>}]} {
    %c0 = arith.constant 0 : index
    %c0_0 = arith.constant 0 : index
    %c0_1 = arith.constant 0 : index
    %0 = vector.load %arg1[%c0, %c0_0, %c0_1] : memref<1x4x256xf32, #tpu.memory_space<vmem>>, vector<1x4x256xf32>
    %1 = vector.shape_cast %0 : vector<1x4x256xf32> to vector<4x256xf32>
    %cst = arith.constant dense<0.000000e+00> : vector<256xf32>
    %2 = vector.multi_reduction <add>, %1, %cst [0] : vector<4x256xf32> to vector<256xf32>
    %3 = vector.shape_cast %2 : vector<256xf32> to vector<1x256xf32>
    %cst_2 = arith.constant 4.000000e+00 : f32
    %4 = vector.broadcast %cst_2 : f32 to vector<1x256xf32>
    %5 = arith.divf %3, %4 : vector<1x256xf32>
    %cst_3 = arith.constant dense<0xFF800000> : vector<256xf32>
    %6 = vector.multi_reduction <maximumf>, %1, %cst_3 [0] : vector<4x256xf32> to vector<256xf32>
    %7 = vector.shape_cast %6 : vector<256xf32> to vector<1x256xf32>
    %cst_4 = arith.constant 0.000000e+00 : f32
    %8 = vector.broadcast %cst_4 : f32 to vector<2x128xf32>
    %c0_5 = arith.constant 0 : index
    %c0_6 = arith.constant 0 : index
    %9 = vector.load %arg5[%c0_5, %c0_6] : memref<2x512xf32, #tpu.memory_space<vmem>>, vector<2x128xf32>
    tpu.vector_store %arg5[%c0_5, %c0_6], %8 {strides = array<i32>} : memref<2x512xf32, #tpu.memory_space<vmem>>, vector<2x128xf32>,
    %c0_7 = arith.constant 0 : index
    %c384 = arith.constant 384 : index
    %10 = vector.load %arg5[%c0_7, %c384] : memref<2x512xf32, #tpu.memory_space<vmem>>, vector<2x128xf32>
    tpu.vector_store %arg5[%c0_7, %c384], %8 {strides = array<i32>} : memref<2x512xf32, #tpu.memory_space<vmem>>, vector<2x128xf32>,
    %c0_8 = arith.constant 0 : index
    %c128 = arith.constant 128 : index
    %11 = vector.load %arg5[%c0_8, %c128] : memref<2x512xf32, #tpu.memory_space<vmem>>, vector<1x256xf32>
    tpu.vector_store %arg5[%c0_8, %c128], %5 {strides = array<i32>} : memref<2x512xf32, #tpu.memory_space<vmem>>, vector<1x256xf32>,
    %c1 = arith.constant 1 : index
    %c128_9 = arith.constant 128 : index
    %12 = vector.load %arg5[%c1, %c128_9] : memref<2x512xf32, #tpu.memory_space<vmem>>, vector<1x256xf32>
    tpu.vector_store %arg5[%c1, %c128_9], %7 {strides = array<i32>} : memref<2x512xf32, #tpu.memory_space<vmem>>, vector<1x256xf32>,
    %c0_10 = arith.constant 0 : index
    %c77 = arith.constant 77 : index
    %13 = vector.load %arg5[%c0_10, %c77] : memref<2x512xf32, #tpu.memory_space<vmem>>, vector<1x256xf32>
    %c0_11 = arith.constant 0 : index
    %c0_12 = arith.constant 0 : index
    %14 = vector.load %arg6[%c0_11, %c0_12] : memref<112x256xf32, #tpu.memory_space<vmem>>, vector<1x256xf32>
    tpu.vector_store %arg6[%c0_11, %c0_12], %13 {strides = array<i32>} : memref<112x256xf32, #tpu.memory_space<vmem>>, vector<1x256xf32>,
    %c0_13 = arith.constant 0 : index
    %c93 = arith.constant 93 : index
    %15 = vector.load %arg5[%c0_13, %c93] : memref<2x512xf32, #tpu.memory_space<vmem>>, vector<1x256xf32>
    %c1_14 = arith.constant 1 : index
    %c0_15 = arith.constant 0 : index
    %16 = vector.load %arg6[%c1_14, %c0_15] : memref<112x256xf32, #tpu.memory_space<vmem>>, vector<1x256xf32>
    tpu.vector_store %arg6[%c1_14, %c0_15], %15 {strides = array<i32>} : memref<112x256xf32, #tpu.memory_space<vmem>>, vector<1x256xf32>,
    %c0_16 = arith.constant 0 : index
    %c109 = arith.constant 109 : index
    %17 = vector.load %arg5[%c0_16, %c109] : memref<2x512xf32, #tpu.memory_space<vmem>>, vector<1x256xf32>
    %c2 = arith.constant 2 : index
    %c0_17 = arith.constant 0 : index
    %18 = vector.load %arg6[%c2, %c0_17] : memref<112x256xf32, #tpu.memory_space<vmem>>, vector<1x256xf32>
    tpu.vector_store %arg6[%c2, %c0_17], %17 {strides = array<i32>} : memref<112x256xf32, #tpu.memory_space<vmem>>, vector<1x256xf32>,
    %c0_18 = arith.constant 0 : index
    %c125 = arith.constant 125 : index
    %19 = vector.load %arg5[%c0_18, %c125] : memref<2x512xf32, #tpu.memory_space<vmem>>, vector<1x256xf32>
    %c3 = arith.constant 3 : index
    %c0_19 = arith.constant 0 : index
    %20 = vector.load %arg6[%c3, %c0_19] : memref<112x256xf32, #tpu.memory_space<vmem>>, vector<1x256xf32>
    tpu.vector_store %arg6[%c3, %c0_19], %19 {strides = array<i32>} : memref<112x256xf32, #tpu.memory_space<vmem>>, vector<1x256xf32>,
    %c0_20 = arith.constant 0 : index
    %c141 = arith.constant 141 : index
    %21 = vector.load %arg5[%c0_20, %c141] : memref<2x512xf32, #tpu.memory_space<vmem>>, vector<1x256xf32>
    %c4 = arith.constant 4 : index
    %c0_21 = arith.constant 0 : index
    %22 = vector.load %arg6[%c4, %c0_21] : memref<112x256xf32, #tpu.memory_space<vmem>>, vector<1x256xf32>
    tpu.vector_store %arg6[%c4, %c0_21], %21 {strides = array<i32>} : memref<112x256xf32, #tpu.memory_space<vmem>>, vector<1x256xf32>,
    %c0_22 = arith.constant 0 : index
    %c157 = arith.constant 157 : index
    %23 = vector.load %arg5[%c0_22, %c157] : memref<2x512xf32, #tpu.memory_space<vmem>>, vector<1x256xf32>
    %c5 = arith.constant 5 : index
    %c0_23 = arith.constant 0 : index
    %24 = vector.load %arg6[%c5, %c0_23] : memref<112x256xf32, #tpu.memory_space<vmem>>, vector<1x256xf32>
    tpu.vector_store %arg6[%c5, %c0_23], %23 {strides = array<i32>} : memref<112x256xf32, #tpu.memory_space<vmem>>, vector<1x256xf32>,
    %c0_24 = arith.constant 0 : index
    %c173 = arith.constant 173 : index
    %25 = vector.load %arg5[%c0_24, %c173] : memref<2x512xf32, #tpu.memory_space<vmem>>, vector<1x256xf32>
    %c6 = arith.constant 6 : index
    %c0_25 = arith.constant 0 : index
    %26 = vector.load %arg6[%c6, %c0_25] : memref<112x256xf32, #tpu.memory_space<vmem>>, vector<1x256xf32>
    tpu.vector_store %arg6[%c6, %c0_25], %25 {strides = array<i32>} : memref<112x256xf32, #tpu.memory_space<vmem>>, vector<1x256xf32>,
    %c1_26 = arith.constant 1 : index
    %c77_27 = arith.constant 77 : index
    %27 = vector.load %arg5[%c1_26, %c77_27] : memref<2x512xf32, #tpu.memory_space<vmem>>, vector<1x256xf32>
    %c7 = arith.constant 7 : index
    %c0_28 = arith.constant 0 : index
    %28 = vector.load %arg6[%c7, %c0_28] : memref<112x256xf32, #tpu.memory_space<vmem>>, vector<1x256xf32>
    tpu.vector_store %arg6[%c7, %c0_28], %27 {strides = array<i32>} : memref<112x256xf32, #tpu.memory_space<vmem>>, vector<1x256xf32>,
    %c1_29 = arith.constant 1 : index
    %c93_30 = arith.constant 93 : index
    %29 = vector.load %arg5[%c1_29, %c93_30] : memref<2x512xf32, #tpu.memory_space<vmem>>, vector<1x256xf32>
    %c8 = arith.constant 8 : index
    %c0_31 = arith.constant 0 : index
    %30 = vector.load %arg6[%c8, %c0_31] : memref<112x256xf32, #tpu.memory_space<vmem>>, vector<1x256xf32>
    tpu.vector_store %arg6[%c8, %c0_31], %29 {strides = array<i32>} : memref<112x256xf32, #tpu.memory_space<vmem>>, vector<1x256xf32>,
    %c1_32 = arith.constant 1 : index
    %c109_33 = arith.constant 109 : index
    %31 = vector.load %arg5[%c1_32, %c109_33] : memref<2x512xf32, #tpu.memory_space<vmem>>, vector<1x256xf32>
    %c9 = arith.constant 9 : index
    %c0_34 = arith.constant 0 : index
    %32 = vector.load %arg6[%c9, %c0_34] : memref<112x256xf32, #tpu.memory_space<vmem>>, vector<1x256xf32>
    tpu.vector_store %arg6[%c9, %c0_34], %31 {strides = array<i32>} : memref<112x256xf32, #tpu.memory_space<vmem>>, vector<1x256xf32>,
    %c1_35 = arith.constant 1 : index
    %c125_36 = arith.constant 125 : index
    %33 = vector.load %arg5[%c1_35, %c125_36] : memref<2x512xf32, #tpu.memory_space<vmem>>, vector<1x256xf32>
    %c10 = arith.constant 10 : index
    %c0_37 = arith.constant 0 : index
    %34 = vector.load %arg6[%c10, %c0_37] : memref<112x256xf32, #tpu.memory_space<vmem>>, vector<1x256xf32>
    tpu.vector_store %arg6[%c10, %c0_37], %33 {strides = array<i32>} : memref<112x256xf32, #tpu.memory_space<vmem>>, vector<1x256xf32>,
    %c1_38 = arith.constant 1 : index
    %c141_39 = arith.constant 141 : index
    %35 = vector.load %arg5[%c1_38, %c141_39] : memref<2x512xf32, #tpu.memory_space<vmem>>, vector<1x256xf32>
    %c11 = arith.constant 11 : index
    %c0_40 = arith.constant 0 : index
    %36 = vector.load %arg6[%c11, %c0_40] : memref<112x256xf32, #tpu.memory_space<vmem>>, vector<1x256xf32>
    tpu.vector_store %arg6[%c11, %c0_40], %35 {strides = array<i32>} : memref<112x256xf32, #tpu.memory_space<vmem>>, vector<1x256xf32>,
    %c1_41 = arith.constant 1 : index
    %c157_42 = arith.constant 157 : index
    %37 = vector.load %arg5[%c1_41, %c157_42] : memref<2x512xf32, #tpu.memory_space<vmem>>, vector<1x256xf32>
    %c12 = arith.constant 12 : index
    %c0_43 = arith.constant 0 : index
    %38 = vector.load %arg6[%c12, %c0_43] : memref<112x256xf32, #tpu.memory_space<vmem>>, vector<1x256xf32>
    tpu.vector_store %arg6[%c12, %c0_43], %37 {strides = array<i32>} : memref<112x256xf32, #tpu.memory_space<vmem>>, vector<1x256xf32>,
    %c1_44 = arith.constant 1 : index
    %c173_45 = arith.constant 173 : index
    %39 = vector.load %arg5[%c1_44, %c173_45] : memref<2x512xf32, #tpu.memory_space<vmem>>, vector<1x256xf32>
    %c13 = arith.constant 13 : index
    %c0_46 = arith.constant 0 : index
    %40 = vector.load %arg6[%c13, %c0_46] : memref<112x256xf32, #tpu.memory_space<vmem>>, vector<1x256xf32>
    tpu.vector_store %arg6[%c13, %c0_46], %39 {strides = array<i32>} : memref<112x256xf32, #tpu.memory_space<vmem>>, vector<1x256xf32>,
    %cst_47 = arith.constant 0.000000e+00 : f32
    %41 = vector.broadcast %cst_47 : f32 to vector<2x256xf32>
    %c14 = arith.constant 14 : index
    %c0_48 = arith.constant 0 : index
    %42 = vector.load %arg6[%c14, %c0_48] : memref<112x256xf32, #tpu.memory_space<vmem>>, vector<2x256xf32>
    tpu.vector_store %arg6[%c14, %c0_48], %41 {strides = array<i32>} : memref<112x256xf32, #tpu.memory_space<vmem>>, vector<2x256xf32>,
    %c0_49 = arith.constant 0 : index
    %c0_50 = arith.constant 0 : index
    %43 = vector.load %arg6[%c0_49, %c0_50] : memref<112x256xf32, #tpu.memory_space<vmem>>, vector<16x256xf32>
    %c0_51 = arith.constant 0 : index
    %c0_52 = arith.constant 0 : index
    %44 = vector.load %arg3[%c0_51, %c0_52] : memref<7x256xf32, #tpu.memory_space<vmem>>, vector<1x256xf32>
    %45 = vector.broadcast %44 : vector<1x256xf32> to vector<16x256xf32>
    %46 = arith.mulf %43, %45 : vector<16x256xf32>
    %c0_53 = arith.constant 0 : index
    %c0_54 = arith.constant 0 : index
    %47 = vector.load %arg6[%c0_53, %c0_54] : memref<112x256xf32, #tpu.memory_space<vmem>>, vector<16x256xf32>
    tpu.vector_store %arg6[%c0_53, %c0_54], %46 {strides = array<i32>} : memref<112x256xf32, #tpu.memory_space<vmem>>, vector<16x256xf32>,
    %c0_55 = arith.constant 0 : index
    %c78 = arith.constant 78 : index
    %48 = vector.load %arg5[%c0_55, %c78] : memref<2x512xf32, #tpu.memory_space<vmem>>, vector<1x256xf32>
    %c16 = arith.constant 16 : index
    %c0_56 = arith.constant 0 : index
    %49 = vector.load %arg6[%c16, %c0_56] : memref<112x256xf32, #tpu.memory_space<vmem>>, vector<1x256xf32>
    tpu.vector_store %arg6[%c16, %c0_56], %48 {strides = array<i32>} : memref<112x256xf32, #tpu.memory_space<vmem>>, vector<1x256xf32>,
    %c0_57 = arith.constant 0 : index
    %c94 = arith.constant 94 : index
    %50 = vector.load %arg5[%c0_57, %c94] : memref<2x512xf32, #tpu.memory_space<vmem>>, vector<1x256xf32>
    %c17 = arith.constant 17 : index
    %c0_58 = arith.constant 0 : index
    %51 = vector.load %arg6[%c17, %c0_58] : memref<112x256xf32, #tpu.memory_space<vmem>>, vector<1x256xf32>
    tpu.vector_store %arg6[%c17, %c0_58], %50 {strides = array<i32>} : memref<112x256xf32, #tpu.memory_space<vmem>>, vector<1x256xf32>,
    %c0_59 = arith.constant 0 : index
    %c110 = arith.constant 110 : index
    %52 = vector.load %arg5[%c0_59, %c110] : memref<2x512xf32, #tpu.memory_space<vmem>>, vector<1x256xf32>
    %c18 = arith.constant 18 : index
    %c0_60 = arith.constant 0 : index
    %53 = vector.load %arg6[%c18, %c0_60] : memref<112x256xf32, #tpu.memory_space<vmem>>, vector<1x256xf32>
    tpu.vector_store %arg6[%c18, %c0_60], %52 {strides = array<i32>} : memref<112x256xf32, #tpu.memory_space<vmem>>, vector<1x256xf32>,
    %c0_61 = arith.constant 0 : index
    %c126 = arith.constant 126 : index
    %54 = vector.load %arg5[%c0_61, %c126] : memref<2x512xf32, #tpu.memory_space<vmem>>, vector<1x256xf32>
    %c19 = arith.constant 19 : index
    %c0_62 = arith.constant 0 : index
    %55 = vector.load %arg6[%c19, %c0_62] : memref<112x256xf32, #tpu.memory_space<vmem>>, vector<1x256xf32>
    tpu.vector_store %arg6[%c19, %c0_62], %54 {strides = array<i32>} : memref<112x256xf32, #tpu.memory_space<vmem>>, vector<1x256xf32>,
    %c0_63 = arith.constant 0 : index
    %c142 = arith.constant 142 : index
    %56 = vector.load %arg5[%c0_63, %c142] : memref<2x512xf32, #tpu.memory_space<vmem>>, vector<1x256xf32>
    %c20 = arith.constant 20 : index
    %c0_64 = arith.constant 0 : index
    %57 = vector.load %arg6[%c20, %c0_64] : memref<112x256xf32, #tpu.memory_space<vmem>>, vector<1x256xf32>
    tpu.vector_store %arg6[%c20, %c0_64], %56 {strides = array<i32>} : memref<112x256xf32, #tpu.memory_space<vmem>>, vector<1x256xf32>,
    %c0_65 = arith.constant 0 : index
    %c158 = arith.constant 158 : index
    %58 = vector.load %arg5[%c0_65, %c158] : memref<2x512xf32, #tpu.memory_space<vmem>>, vector<1x256xf32>
    %c21 = arith.constant 21 : index
    %c0_66 = arith.constant 0 : index
    %59 = vector.load %arg6[%c21, %c0_66] : memref<112x256xf32, #tpu.memory_space<vmem>>, vector<1x256xf32>
    tpu.vector_store %arg6[%c21, %c0_66], %58 {strides = array<i32>} : memref<112x256xf32, #tpu.memory_space<vmem>>, vector<1x256xf32>,
    %c0_67 = arith.constant 0 : index
    %c174 = arith.constant 174 : index
    %60 = vector.load %arg5[%c0_67, %c174] : memref<2x512xf32, #tpu.memory_space<vmem>>, vector<1x256xf32>
    %c22 = arith.constant 22 : index
    %c0_68 = arith.constant 0 : index
    %61 = vector.load %arg6[%c22, %c0_68] : memref<112x256xf32, #tpu.memory_space<vmem>>, vector<1x256xf32>
    tpu.vector_store %arg6[%c22, %c0_68], %60 {strides = array<i32>} : memref<112x256xf32, #tpu.memory_space<vmem>>, vector<1x256xf32>,
    %c1_69 = arith.constant 1 : index
    %c78_70 = arith.constant 78 : index
    %62 = vector.load %arg5[%c1_69, %c78_70] : memref<2x512xf32, #tpu.memory_space<vmem>>, vector<1x256xf32>
    %c23 = arith.constant 23 : index
    %c0_71 = arith.constant 0 : index
    %63 = vector.load %arg6[%c23, %c0_71] : memref<112x256xf32, #tpu.memory_space<vmem>>, vector<1x256xf32>
    tpu.vector_store %arg6[%c23, %c0_71], %62 {strides = array<i32>} : memref<112x256xf32, #tpu.memory_space<vmem>>, vector<1x256xf32>,
    %c1_72 = arith.constant 1 : index
    %c94_73 = arith.constant 94 : index
    %64 = vector.load %arg5[%c1_72, %c94_73] : memref<2x512xf32, #tpu.memory_space<vmem>>, vector<1x256xf32>
    %c24 = arith.constant 24 : index
    %c0_74 = arith.constant 0 : index
    %65 = vector.load %arg6[%c24, %c0_74] : memref<112x256xf32, #tpu.memory_space<vmem>>, vector<1x256xf32>
    tpu.vector_store %arg6[%c24, %c0_74], %64 {strides = array<i32>} : memref<112x256xf32, #tpu.memory_space<vmem>>, vector<1x256xf32>,
    %c1_75 = arith.constant 1 : index
    %c110_76 = arith.constant 110 : index
    %66 = vector.load %arg5[%c1_75, %c110_76] : memref<2x512xf32, #tpu.memory_space<vmem>>, vector<1x256xf32>
    %c25 = arith.constant 25 : index
    %c0_77 = arith.constant 0 : index
    %67 = vector.load %arg6[%c25, %c0_77] : memref<112x256xf32, #tpu.memory_space<vmem>>, vector<1x256xf32>
    tpu.vector_store %arg6[%c25, %c0_77], %66 {strides = array<i32>} : memref<112x256xf32, #tpu.memory_space<vmem>>, vector<1x256xf32>,
    %c1_78 = arith.constant 1 : index
    %c126_79 = arith.constant 126 : index
    %68 = vector.load %arg5[%c1_78, %c126_79] : memref<2x512xf32, #tpu.memory_space<vmem>>, vector<1x256xf32>
    %c26 = arith.constant 26 : index
    %c0_80 = arith.constant 0 : index
    %69 = vector.load %arg6[%c26, %c0_80] : memref<112x256xf32, #tpu.memory_space<vmem>>, vector<1x256xf32>
    tpu.vector_store %arg6[%c26, %c0_80], %68 {strides = array<i32>} : memref<112x256xf32, #tpu.memory_space<vmem>>, vector<1x256xf32>,
    %c1_81 = arith.constant 1 : index
    %c142_82 = arith.constant 142 : index
    %70 = vector.load %arg5[%c1_81, %c142_82] : memref<2x512xf32, #tpu.memory_space<vmem>>, vector<1x256xf32>
    %c27 = arith.constant 27 : index
    %c0_83 = arith.constant 0 : index
    %71 = vector.load %arg6[%c27, %c0_83] : memref<112x256xf32, #tpu.memory_space<vmem>>, vector<1x256xf32>
    tpu.vector_store %arg6[%c27, %c0_83], %70 {strides = array<i32>} : memref<112x256xf32, #tpu.memory_space<vmem>>, vector<1x256xf32>,
    %c1_84 = arith.constant 1 : index
    %c158_85 = arith.constant 158 : index
    %72 = vector.load %arg5[%c1_84, %c158_85] : memref<2x512xf32, #tpu.memory_space<vmem>>, vector<1x256xf32>
    %c28 = arith.constant 28 : index
    %c0_86 = arith.constant 0 : index
    %73 = vector.load %arg6[%c28, %c0_86] : memref<112x256xf32, #tpu.memory_space<vmem>>, vector<1x256xf32>
    tpu.vector_store %arg6[%c28, %c0_86], %72 {strides = array<i32>} : memref<112x256xf32, #tpu.memory_space<vmem>>, vector<1x256xf32>,
    %c1_87 = arith.constant 1 : index
    %c174_88 = arith.constant 174 : index
    %74 = vector.load %arg5[%c1_87, %c174_88] : memref<2x512xf32, #tpu.memory_space<vmem>>, vector<1x256xf32>
    %c29 = arith.constant 29 : index
    %c0_89 = arith.constant 0 : index
    %75 = vector.load %arg6[%c29, %c0_89] : memref<112x256xf32, #tpu.memory_space<vmem>>, vector<1x256xf32>
    tpu.vector_store %arg6[%c29, %c0_89], %74 {strides = array<i32>} : memref<112x256xf32, #tpu.memory_space<vmem>>, vector<1x256xf32>,
    %cst_90 = arith.constant 0.000000e+00 : f32
    %76 = vector.broadcast %cst_90 : f32 to vector<2x256xf32>
    %c30 = arith.constant 30 : index
    %c0_91 = arith.constant 0 : index
    %77 = vector.load %arg6[%c30, %c0_91] : memref<112x256xf32, #tpu.memory_space<vmem>>, vector<2x256xf32>
    tpu.vector_store %arg6[%c30, %c0_91], %76 {strides = array<i32>} : memref<112x256xf32, #tpu.memory_space<vmem>>, vector<2x256xf32>,
    %c16_92 = arith.constant 16 : index
    %c0_93 = arith.constant 0 : index
    %78 = vector.load %arg6[%c16_92, %c0_93] : memref<112x256xf32, #tpu.memory_space<vmem>>, vector<16x256xf32>
    %c1_94 = arith.constant 1 : index
    %c0_95 = arith.constant 0 : index
    %79 = vector.load %arg3[%c1_94, %c0_95] : memref<7x256xf32, #tpu.memory_space<vmem>>, vector<1x256xf32>
    %80 = vector.broadcast %79 : vector<1x256xf32> to vector<16x256xf32>
    %81 = arith.mulf %78, %80 : vector<16x256xf32>
    %c16_96 = arith.constant 16 : index
    %c0_97 = arith.constant 0 : index
    %82 = vector.load %arg6[%c16_96, %c0_97] : memref<112x256xf32, #tpu.memory_space<vmem>>, vector<16x256xf32>
    tpu.vector_store %arg6[%c16_96, %c0_97], %81 {strides = array<i32>} : memref<112x256xf32, #tpu.memory_space<vmem>>, vector<16x256xf32>,
    %c0_98 = arith.constant 0 : index
    %c79 = arith.constant 79 : index
    %83 = vector.load %arg5[%c0_98, %c79] : memref<2x512xf32, #tpu.memory_space<vmem>>, vector<1x256xf32>
    %c32 = arith.constant 32 : index
    %c0_99 = arith.constant 0 : index
    %84 = vector.load %arg6[%c32, %c0_99] : memref<112x256xf32, #tpu.memory_space<vmem>>, vector<1x256xf32>
    tpu.vector_store %arg6[%c32, %c0_99], %83 {strides = array<i32>} : memref<112x256xf32, #tpu.memory_space<vmem>>, vector<1x256xf32>,
    %c0_100 = arith.constant 0 : index
    %c95 = arith.constant 95 : index
    %85 = vector.load %arg5[%c0_100, %c95] : memref<2x512xf32, #tpu.memory_space<vmem>>, vector<1x256xf32>
    %c33 = arith.constant 33 : index
    %c0_101 = arith.constant 0 : index
    %86 = vector.load %arg6[%c33, %c0_101] : memref<112x256xf32, #tpu.memory_space<vmem>>, vector<1x256xf32>
    tpu.vector_store %arg6[%c33, %c0_101], %85 {strides = array<i32>} : memref<112x256xf32, #tpu.memory_space<vmem>>, vector<1x256xf32>,
    %c0_102 = arith.constant 0 : index
    %c111 = arith.constant 111 : index
    %87 = vector.load %arg5[%c0_102, %c111] : memref<2x512xf32, #tpu.memory_space<vmem>>, vector<1x256xf32>
    %c34 = arith.constant 34 : index
    %c0_103 = arith.constant 0 : index
    %88 = vector.load %arg6[%c34, %c0_103] : memref<112x256xf32, #tpu.memory_space<vmem>>, vector<1x256xf32>
    tpu.vector_store %arg6[%c34, %c0_103], %87 {strides = array<i32>} : memref<112x256xf32, #tpu.memory_space<vmem>>, vector<1x256xf32>,
    %c0_104 = arith.constant 0 : index
    %c127 = arith.constant 127 : index
    %89 = vector.load %arg5[%c0_104, %c127] : memref<2x512xf32, #tpu.memory_space<vmem>>, vector<1x256xf32>
    %c35 = arith.constant 35 : index
    %c0_105 = arith.constant 0 : index
    %90 = vector.load %arg6[%c35, %c0_105] : memref<112x256xf32, #tpu.memory_space<vmem>>, vector<1x256xf32>
    tpu.vector_store %arg6[%c35, %c0_105], %89 {strides = array<i32>} : memref<112x256xf32, #tpu.memory_space<vmem>>, vector<1x256xf32>,
    %c0_106 = arith.constant 0 : index
    %c143 = arith.constant 143 : index
    %91 = vector.load %arg5[%c0_106, %c143] : memref<2x512xf32, #tpu.memory_space<vmem>>, vector<1x256xf32>
    %c36 = arith.constant 36 : index
    %c0_107 = arith.constant 0 : index
    %92 = vector.load %arg6[%c36, %c0_107] : memref<112x256xf32, #tpu.memory_space<vmem>>, vector<1x256xf32>
    tpu.vector_store %arg6[%c36, %c0_107], %91 {strides = array<i32>} : memref<112x256xf32, #tpu.memory_space<vmem>>, vector<1x256xf32>,
    %c0_108 = arith.constant 0 : index
    %c159 = arith.constant 159 : index
    %93 = vector.load %arg5[%c0_108, %c159] : memref<2x512xf32, #tpu.memory_space<vmem>>, vector<1x256xf32>
    %c37 = arith.constant 37 : index
    %c0_109 = arith.constant 0 : index
    %94 = vector.load %arg6[%c37, %c0_109] : memref<112x256xf32, #tpu.memory_space<vmem>>, vector<1x256xf32>
    tpu.vector_store %arg6[%c37, %c0_109], %93 {strides = array<i32>} : memref<112x256xf32, #tpu.memory_space<vmem>>, vector<1x256xf32>,
    %c0_110 = arith.constant 0 : index
    %c175 = arith.constant 175 : index
    %95 = vector.load %arg5[%c0_110, %c175] : memref<2x512xf32, #tpu.memory_space<vmem>>, vector<1x256xf32>
    %c38 = arith.constant 38 : index
    %c0_111 = arith.constant 0 : index
    %96 = vector.load %arg6[%c38, %c0_111] : memref<112x256xf32, #tpu.memory_space<vmem>>, vector<1x256xf32>
    tpu.vector_store %arg6[%c38, %c0_111], %95 {strides = array<i32>} : memref<112x256xf32, #tpu.memory_space<vmem>>, vector<1x256xf32>,
    %c1_112 = arith.constant 1 : index
    %c79_113 = arith.constant 79 : index
    %97 = vector.load %arg5[%c1_112, %c79_113] : memref<2x512xf32, #tpu.memory_space<vmem>>, vector<1x256xf32>
    %c39 = arith.constant 39 : index
    %c0_114 = arith.constant 0 : index
    %98 = vector.load %arg6[%c39, %c0_114] : memref<112x256xf32, #tpu.memory_space<vmem>>, vector<1x256xf32>
    tpu.vector_store %arg6[%c39, %c0_114], %97 {strides = array<i32>} : memref<112x256xf32, #tpu.memory_space<vmem>>, vector<1x256xf32>,
    %c1_115 = arith.constant 1 : index
    %c95_116 = arith.constant 95 : index
    %99 = vector.load %arg5[%c1_115, %c95_116] : memref<2x512xf32, #tpu.memory_space<vmem>>, vector<1x256xf32>
    %c40 = arith.constant 40 : index
    %c0_117 = arith.constant 0 : index
    %100 = vector.load %arg6[%c40, %c0_117] : memref<112x256xf32, #tpu.memory_space<vmem>>, vector<1x256xf32>
    tpu.vector_store %arg6[%c40, %c0_117], %99 {strides = array<i32>} : memref<112x256xf32, #tpu.memory_space<vmem>>, vector<1x256xf32>,
    %c1_118 = arith.constant 1 : index
    %c111_119 = arith.constant 111 : index
    %101 = vector.load %arg5[%c1_118, %c111_119] : memref<2x512xf32, #tpu.memory_space<vmem>>, vector<1x256xf32>
    %c41 = arith.constant 41 : index
    %c0_120 = arith.constant 0 : index
    %102 = vector.load %arg6[%c41, %c0_120] : memref<112x256xf32, #tpu.memory_space<vmem>>, vector<1x256xf32>
    tpu.vector_store %arg6[%c41, %c0_120], %101 {strides = array<i32>} : memref<112x256xf32, #tpu.memory_space<vmem>>, vector<1x256xf32>,
    %c1_121 = arith.constant 1 : index
    %c127_122 = arith.constant 127 : index
    %103 = vector.load %arg5[%c1_121, %c127_122] : memref<2x512xf32, #tpu.memory_space<vmem>>, vector<1x256xf32>
    %c42 = arith.constant 42 : index
    %c0_123 = arith.constant 0 : index
    %104 = vector.load %arg6[%c42, %c0_123] : memref<112x256xf32, #tpu.memory_space<vmem>>, vector<1x256xf32>
    tpu.vector_store %arg6[%c42, %c0_123], %103 {strides = array<i32>} : memref<112x256xf32, #tpu.memory_space<vmem>>, vector<1x256xf32>,
    %c1_124 = arith.constant 1 : index
    %c143_125 = arith.constant 143 : index
    %105 = vector.load %arg5[%c1_124, %c143_125] : memref<2x512xf32, #tpu.memory_space<vmem>>, vector<1x256xf32>
    %c43 = arith.constant 43 : index
    %c0_126 = arith.constant 0 : index
    %106 = vector.load %arg6[%c43, %c0_126] : memref<112x256xf32, #tpu.memory_space<vmem>>, vector<1x256xf32>
    tpu.vector_store %arg6[%c43, %c0_126], %105 {strides = array<i32>} : memref<112x256xf32, #tpu.memory_space<vmem>>, vector<1x256xf32>,
    %c1_127 = arith.constant 1 : index
    %c159_128 = arith.constant 159 : index
    %107 = vector.load %arg5[%c1_127, %c159_128] : memref<2x512xf32, #tpu.memory_space<vmem>>, vector<1x256xf32>
    %c44 = arith.constant 44 : index
    %c0_129 = arith.constant 0 : index
    %108 = vector.load %arg6[%c44, %c0_129] : memref<112x256xf32, #tpu.memory_space<vmem>>, vector<1x256xf32>
    tpu.vector_store %arg6[%c44, %c0_129], %107 {strides = array<i32>} : memref<112x256xf32, #tpu.memory_space<vmem>>, vector<1x256xf32>,
    %c1_130 = arith.constant 1 : index
    %c175_131 = arith.constant 175 : index
    %109 = vector.load %arg5[%c1_130, %c175_131] : memref<2x512xf32, #tpu.memory_space<vmem>>, vector<1x256xf32>
    %c45 = arith.constant 45 : index
    %c0_132 = arith.constant 0 : index
    %110 = vector.load %arg6[%c45, %c0_132] : memref<112x256xf32, #tpu.memory_space<vmem>>, vector<1x256xf32>
    tpu.vector_store %arg6[%c45, %c0_132], %109 {strides = array<i32>} : memref<112x256xf32, #tpu.memory_space<vmem>>, vector<1x256xf32>,
    %cst_133 = arith.constant 0.000000e+00 : f32
    %111 = vector.broadcast %cst_133 : f32 to vector<2x256xf32>
    %c46 = arith.constant 46 : index
    %c0_134 = arith.constant 0 : index
    %112 = vector.load %arg6[%c46, %c0_134] : memref<112x256xf32, #tpu.memory_space<vmem>>, vector<2x256xf32>
    tpu.vector_store %arg6[%c46, %c0_134], %111 {strides = array<i32>} : memref<112x256xf32, #tpu.memory_space<vmem>>, vector<2x256xf32>,
    %c32_135 = arith.constant 32 : index
    %c0_136 = arith.constant 0 : index
    %113 = vector.load %arg6[%c32_135, %c0_136] : memref<112x256xf32, #tpu.memory_space<vmem>>, vector<16x256xf32>
    %c2_137 = arith.constant 2 : index
    %c0_138 = arith.constant 0 : index
    %114 = vector.load %arg3[%c2_137, %c0_138] : memref<7x256xf32, #tpu.memory_space<vmem>>, vector<1x256xf32>
    %115 = vector.broadcast %114 : vector<1x256xf32> to vector<16x256xf32>
    %116 = arith.mulf %113, %115 : vector<16x256xf32>
    %c32_139 = arith.constant 32 : index
    %c0_140 = arith.constant 0 : index
    %117 = vector.load %arg6[%c32_139, %c0_140] : memref<112x256xf32, #tpu.memory_space<vmem>>, vector<16x256xf32>
    tpu.vector_store %arg6[%c32_139, %c0_140], %116 {strides = array<i32>} : memref<112x256xf32, #tpu.memory_space<vmem>>, vector<16x256xf32>,
    %c0_141 = arith.constant 0 : index
    %c80 = arith.constant 80 : index
    %118 = vector.load %arg5[%c0_141, %c80] : memref<2x512xf32, #tpu.memory_space<vmem>>, vector<1x256xf32>
    %c48 = arith.constant 48 : index
    %c0_142 = arith.constant 0 : index
    %119 = vector.load %arg6[%c48, %c0_142] : memref<112x256xf32, #tpu.memory_space<vmem>>, vector<1x256xf32>
    tpu.vector_store %arg6[%c48, %c0_142], %118 {strides = array<i32>} : memref<112x256xf32, #tpu.memory_space<vmem>>, vector<1x256xf32>,
    %c0_143 = arith.constant 0 : index
    %c96 = arith.constant 96 : index
    %120 = vector.load %arg5[%c0_143, %c96] : memref<2x512xf32, #tpu.memory_space<vmem>>, vector<1x256xf32>
    %c49 = arith.constant 49 : index
    %c0_144 = arith.constant 0 : index
    %121 = vector.load %arg6[%c49, %c0_144] : memref<112x256xf32, #tpu.memory_space<vmem>>, vector<1x256xf32>
    tpu.vector_store %arg6[%c49, %c0_144], %120 {strides = array<i32>} : memref<112x256xf32, #tpu.memory_space<vmem>>, vector<1x256xf32>,
    %c0_145 = arith.constant 0 : index
    %c112 = arith.constant 112 : index
    %122 = vector.load %arg5[%c0_145, %c112] : memref<2x512xf32, #tpu.memory_space<vmem>>, vector<1x256xf32>
    %c50 = arith.constant 50 : index
    %c0_146 = arith.constant 0 : index
    %123 = vector.load %arg6[%c50, %c0_146] : memref<112x256xf32, #tpu.memory_space<vmem>>, vector<1x256xf32>
    tpu.vector_store %arg6[%c50, %c0_146], %122 {strides = array<i32>} : memref<112x256xf32, #tpu.memory_space<vmem>>, vector<1x256xf32>,
    %c0_147 = arith.constant 0 : index
    %c128_148 = arith.constant 128 : index
    %124 = vector.load %arg5[%c0_147, %c128_148] : memref<2x512xf32, #tpu.memory_space<vmem>>, vector<1x256xf32>
    %c51 = arith.constant 51 : index
    %c0_149 = arith.constant 0 : index
    %125 = vector.load %arg6[%c51, %c0_149] : memref<112x256xf32, #tpu.memory_space<vmem>>, vector<1x256xf32>
    tpu.vector_store %arg6[%c51, %c0_149], %124 {strides = array<i32>} : memref<112x256xf32, #tpu.memory_space<vmem>>, vector<1x256xf32>,
    %c0_150 = arith.constant 0 : index
    %c144 = arith.constant 144 : index
    %126 = vector.load %arg5[%c0_150, %c144] : memref<2x512xf32, #tpu.memory_space<vmem>>, vector<1x256xf32>
    %c52 = arith.constant 52 : index
    %c0_151 = arith.constant 0 : index
    %127 = vector.load %arg6[%c52, %c0_151] : memref<112x256xf32, #tpu.memory_space<vmem>>, vector<1x256xf32>
    tpu.vector_store %arg6[%c52, %c0_151], %126 {strides = array<i32>} : memref<112x256xf32, #tpu.memory_space<vmem>>, vector<1x256xf32>,
    %c0_152 = arith.constant 0 : index
    %c160 = arith.constant 160 : index
    %128 = vector.load %arg5[%c0_152, %c160] : memref<2x512xf32, #tpu.memory_space<vmem>>, vector<1x256xf32>
    %c53 = arith.constant 53 : index
    %c0_153 = arith.constant 0 : index
    %129 = vector.load %arg6[%c53, %c0_153] : memref<112x256xf32, #tpu.memory_space<vmem>>, vector<1x256xf32>
    tpu.vector_store %arg6[%c53, %c0_153], %128 {strides = array<i32>} : memref<112x256xf32, #tpu.memory_space<vmem>>, vector<1x256xf32>,
    %c0_154 = arith.constant 0 : index
    %c176 = arith.constant 176 : index
    %130 = vector.load %arg5[%c0_154, %c176] : memref<2x512xf32, #tpu.memory_space<vmem>>, vector<1x256xf32>
    %c54 = arith.constant 54 : index
    %c0_155 = arith.constant 0 : index
    %131 = vector.load %arg6[%c54, %c0_155] : memref<112x256xf32, #tpu.memory_space<vmem>>, vector<1x256xf32>
    tpu.vector_store %arg6[%c54, %c0_155], %130 {strides = array<i32>} : memref<112x256xf32, #tpu.memory_space<vmem>>, vector<1x256xf32>,
    %c1_156 = arith.constant 1 : index
    %c80_157 = arith.constant 80 : index
    %132 = vector.load %arg5[%c1_156, %c80_157] : memref<2x512xf32, #tpu.memory_space<vmem>>, vector<1x256xf32>
    %c55 = arith.constant 55 : index
    %c0_158 = arith.constant 0 : index
    %133 = vector.load %arg6[%c55, %c0_158] : memref<112x256xf32, #tpu.memory_space<vmem>>, vector<1x256xf32>
    tpu.vector_store %arg6[%c55, %c0_158], %132 {strides = array<i32>} : memref<112x256xf32, #tpu.memory_space<vmem>>, vector<1x256xf32>,
    %c1_159 = arith.constant 1 : index
    %c96_160 = arith.constant 96 : index
    %134 = vector.load %arg5[%c1_159, %c96_160] : memref<2x512xf32, #tpu.memory_space<vmem>>, vector<1x256xf32>
    %c56 = arith.constant 56 : index
    %c0_161 = arith.constant 0 : index
    %135 = vector.load %arg6[%c56, %c0_161] : memref<112x256xf32, #tpu.memory_space<vmem>>, vector<1x256xf32>
    tpu.vector_store %arg6[%c56, %c0_161], %134 {strides = array<i32>} : memref<112x256xf32, #tpu.memory_space<vmem>>, vector<1x256xf32>,
    %c1_162 = arith.constant 1 : index
    %c112_163 = arith.constant 112 : index
    %136 = vector.load %arg5[%c1_162, %c112_163] : memref<2x512xf32, #tpu.memory_space<vmem>>, vector<1x256xf32>
    %c57 = arith.constant 57 : index
    %c0_164 = arith.constant 0 : index
    %137 = vector.load %arg6[%c57, %c0_164] : memref<112x256xf32, #tpu.memory_space<vmem>>, vector<1x256xf32>
    tpu.vector_store %arg6[%c57, %c0_164], %136 {strides = array<i32>} : memref<112x256xf32, #tpu.memory_space<vmem>>, vector<1x256xf32>,
    %c1_165 = arith.constant 1 : index
    %c128_166 = arith.constant 128 : index
    %138 = vector.load %arg5[%c1_165, %c128_166] : memref<2x512xf32, #tpu.memory_space<vmem>>, vector<1x256xf32>
    %c58 = arith.constant 58 : index
    %c0_167 = arith.constant 0 : index
    %139 = vector.load %arg6[%c58, %c0_167] : memref<112x256xf32, #tpu.memory_space<vmem>>, vector<1x256xf32>
    tpu.vector_store %arg6[%c58, %c0_167], %138 {strides = array<i32>} : memref<112x256xf32, #tpu.memory_space<vmem>>, vector<1x256xf32>,
    %c1_168 = arith.constant 1 : index
    %c144_169 = arith.constant 144 : index
    %140 = vector.load %arg5[%c1_168, %c144_169] : memref<2x512xf32, #tpu.memory_space<vmem>>, vector<1x256xf32>
    %c59 = arith.constant 59 : index
    %c0_170 = arith.constant 0 : index
    %141 = vector.load %arg6[%c59, %c0_170] : memref<112x256xf32, #tpu.memory_space<vmem>>, vector<1x256xf32>
    tpu.vector_store %arg6[%c59, %c0_170], %140 {strides = array<i32>} : memref<112x256xf32, #tpu.memory_space<vmem>>, vector<1x256xf32>,
    %c1_171 = arith.constant 1 : index
    %c160_172 = arith.constant 160 : index
    %142 = vector.load %arg5[%c1_171, %c160_172] : memref<2x512xf32, #tpu.memory_space<vmem>>, vector<1x256xf32>
    %c60 = arith.constant 60 : index
    %c0_173 = arith.constant 0 : index
    %143 = vector.load %arg6[%c60, %c0_173] : memref<112x256xf32, #tpu.memory_space<vmem>>, vector<1x256xf32>
    tpu.vector_store %arg6[%c60, %c0_173], %142 {strides = array<i32>} : memref<112x256xf32, #tpu.memory_space<vmem>>, vector<1x256xf32>,
    %c1_174 = arith.constant 1 : index
    %c176_175 = arith.constant 176 : index
    %144 = vector.load %arg5[%c1_174, %c176_175] : memref<2x512xf32, #tpu.memory_space<vmem>>, vector<1x256xf32>
    %c61 = arith.constant 61 : index
    %c0_176 = arith.constant 0 : index
    %145 = vector.load %arg6[%c61, %c0_176] : memref<112x256xf32, #tpu.memory_space<vmem>>, vector<1x256xf32>
    tpu.vector_store %arg6[%c61, %c0_176], %144 {strides = array<i32>} : memref<112x256xf32, #tpu.memory_space<vmem>>, vector<1x256xf32>,
    %cst_177 = arith.constant 0.000000e+00 : f32
    %146 = vector.broadcast %cst_177 : f32 to vector<2x256xf32>
    %c62 = arith.constant 62 : index
    %c0_178 = arith.constant 0 : index
    %147 = vector.load %arg6[%c62, %c0_178] : memref<112x256xf32, #tpu.memory_space<vmem>>, vector<2x256xf32>
    tpu.vector_store %arg6[%c62, %c0_178], %146 {strides = array<i32>} : memref<112x256xf32, #tpu.memory_space<vmem>>, vector<2x256xf32>,
    %c0_179 = arith.constant 0 : index
    %c81 = arith.constant 81 : index
    %148 = vector.load %arg5[%c0_179, %c81] : memref<2x512xf32, #tpu.memory_space<vmem>>, vector<1x256xf32>
    %c64 = arith.constant 64 : index
    %c0_180 = arith.constant 0 : index
    %149 = vector.load %arg6[%c64, %c0_180] : memref<112x256xf32, #tpu.memory_space<vmem>>, vector<1x256xf32>
    tpu.vector_store %arg6[%c64, %c0_180], %148 {strides = array<i32>} : memref<112x256xf32, #tpu.memory_space<vmem>>, vector<1x256xf32>,
    %c0_181 = arith.constant 0 : index
    %c97 = arith.constant 97 : index
    %150 = vector.load %arg5[%c0_181, %c97] : memref<2x512xf32, #tpu.memory_space<vmem>>, vector<1x256xf32>
    %c65 = arith.constant 65 : index
    %c0_182 = arith.constant 0 : index
    %151 = vector.load %arg6[%c65, %c0_182] : memref<112x256xf32, #tpu.memory_space<vmem>>, vector<1x256xf32>
    tpu.vector_store %arg6[%c65, %c0_182], %150 {strides = array<i32>} : memref<112x256xf32, #tpu.memory_space<vmem>>, vector<1x256xf32>,
    %c0_183 = arith.constant 0 : index
    %c113 = arith.constant 113 : index
    %152 = vector.load %arg5[%c0_183, %c113] : memref<2x512xf32, #tpu.memory_space<vmem>>, vector<1x256xf32>
    %c66 = arith.constant 66 : index
    %c0_184 = arith.constant 0 : index
    %153 = vector.load %arg6[%c66, %c0_184] : memref<112x256xf32, #tpu.memory_space<vmem>>, vector<1x256xf32>
    tpu.vector_store %arg6[%c66, %c0_184], %152 {strides = array<i32>} : memref<112x256xf32, #tpu.memory_space<vmem>>, vector<1x256xf32>,
    %c0_185 = arith.constant 0 : index
    %c129 = arith.constant 129 : index
    %154 = vector.load %arg5[%c0_185, %c129] : memref<2x512xf32, #tpu.memory_space<vmem>>, vector<1x256xf32>
    %c67 = arith.constant 67 : index
    %c0_186 = arith.constant 0 : index
    %155 = vector.load %arg6[%c67, %c0_186] : memref<112x256xf32, #tpu.memory_space<vmem>>, vector<1x256xf32>
    tpu.vector_store %arg6[%c67, %c0_186], %154 {strides = array<i32>} : memref<112x256xf32, #tpu.memory_space<vmem>>, vector<1x256xf32>,
    %c0_187 = arith.constant 0 : index
    %c145 = arith.constant 145 : index
    %156 = vector.load %arg5[%c0_187, %c145] : memref<2x512xf32, #tpu.memory_space<vmem>>, vector<1x256xf32>
    %c68 = arith.constant 68 : index
    %c0_188 = arith.constant 0 : index
    %157 = vector.load %arg6[%c68, %c0_188] : memref<112x256xf32, #tpu.memory_space<vmem>>, vector<1x256xf32>
    tpu.vector_store %arg6[%c68, %c0_188], %156 {strides = array<i32>} : memref<112x256xf32, #tpu.memory_space<vmem>>, vector<1x256xf32>,
    %c0_189 = arith.constant 0 : index
    %c161 = arith.constant 161 : index
    %158 = vector.load %arg5[%c0_189, %c161] : memref<2x512xf32, #tpu.memory_space<vmem>>, vector<1x256xf32>
    %c69 = arith.constant 69 : index
    %c0_190 = arith.constant 0 : index
    %159 = vector.load %arg6[%c69, %c0_190] : memref<112x256xf32, #tpu.memory_space<vmem>>, vector<1x256xf32>
    tpu.vector_store %arg6[%c69, %c0_190], %158 {strides = array<i32>} : memref<112x256xf32, #tpu.memory_space<vmem>>, vector<1x256xf32>,
    %c0_191 = arith.constant 0 : index
    %c177 = arith.constant 177 : index
    %160 = vector.load %arg5[%c0_191, %c177] : memref<2x512xf32, #tpu.memory_space<vmem>>, vector<1x256xf32>
    %c70 = arith.constant 70 : index
    %c0_192 = arith.constant 0 : index
    %161 = vector.load %arg6[%c70, %c0_192] : memref<112x256xf32, #tpu.memory_space<vmem>>, vector<1x256xf32>
    tpu.vector_store %arg6[%c70, %c0_192], %160 {strides = array<i32>} : memref<112x256xf32, #tpu.memory_space<vmem>>, vector<1x256xf32>,
    %c1_193 = arith.constant 1 : index
    %c81_194 = arith.constant 81 : index
    %162 = vector.load %arg5[%c1_193, %c81_194] : memref<2x512xf32, #tpu.memory_space<vmem>>, vector<1x256xf32>
    %c71 = arith.constant 71 : index
    %c0_195 = arith.constant 0 : index
    %163 = vector.load %arg6[%c71, %c0_195] : memref<112x256xf32, #tpu.memory_space<vmem>>, vector<1x256xf32>
    tpu.vector_store %arg6[%c71, %c0_195], %162 {strides = array<i32>} : memref<112x256xf32, #tpu.memory_space<vmem>>, vector<1x256xf32>,
    %c1_196 = arith.constant 1 : index
    %c97_197 = arith.constant 97 : index
    %164 = vector.load %arg5[%c1_196, %c97_197] : memref<2x512xf32, #tpu.memory_space<vmem>>, vector<1x256xf32>
    %c72 = arith.constant 72 : index
    %c0_198 = arith.constant 0 : index
    %165 = vector.load %arg6[%c72, %c0_198] : memref<112x256xf32, #tpu.memory_space<vmem>>, vector<1x256xf32>
    tpu.vector_store %arg6[%c72, %c0_198], %164 {strides = array<i32>} : memref<112x256xf32, #tpu.memory_space<vmem>>, vector<1x256xf32>,
    %c1_199 = arith.constant 1 : index
    %c113_200 = arith.constant 113 : index
    %166 = vector.load %arg5[%c1_199, %c113_200] : memref<2x512xf32, #tpu.memory_space<vmem>>, vector<1x256xf32>
    %c73 = arith.constant 73 : index
    %c0_201 = arith.constant 0 : index
    %167 = vector.load %arg6[%c73, %c0_201] : memref<112x256xf32, #tpu.memory_space<vmem>>, vector<1x256xf32>
    tpu.vector_store %arg6[%c73, %c0_201], %166 {strides = array<i32>} : memref<112x256xf32, #tpu.memory_space<vmem>>, vector<1x256xf32>,
    %c1_202 = arith.constant 1 : index
    %c129_203 = arith.constant 129 : index
    %168 = vector.load %arg5[%c1_202, %c129_203] : memref<2x512xf32, #tpu.memory_space<vmem>>, vector<1x256xf32>
    %c74 = arith.constant 74 : index
    %c0_204 = arith.constant 0 : index
    %169 = vector.load %arg6[%c74, %c0_204] : memref<112x256xf32, #tpu.memory_space<vmem>>, vector<1x256xf32>
    tpu.vector_store %arg6[%c74, %c0_204], %168 {strides = array<i32>} : memref<112x256xf32, #tpu.memory_space<vmem>>, vector<1x256xf32>,
    %c1_205 = arith.constant 1 : index
    %c145_206 = arith.constant 145 : index
    %170 = vector.load %arg5[%c1_205, %c145_206] : memref<2x512xf32, #tpu.memory_space<vmem>>, vector<1x256xf32>
    %c75 = arith.constant 75 : index
    %c0_207 = arith.constant 0 : index
    %171 = vector.load %arg6[%c75, %c0_207] : memref<112x256xf32, #tpu.memory_space<vmem>>, vector<1x256xf32>
    tpu.vector_store %arg6[%c75, %c0_207], %170 {strides = array<i32>} : memref<112x256xf32, #tpu.memory_space<vmem>>, vector<1x256xf32>,
    %c1_208 = arith.constant 1 : index
    %c161_209 = arith.constant 161 : index
    %172 = vector.load %arg5[%c1_208, %c161_209] : memref<2x512xf32, #tpu.memory_space<vmem>>, vector<1x256xf32>
    %c76 = arith.constant 76 : index
    %c0_210 = arith.constant 0 : index
    %173 = vector.load %arg6[%c76, %c0_210] : memref<112x256xf32, #tpu.memory_space<vmem>>, vector<1x256xf32>
    tpu.vector_store %arg6[%c76, %c0_210], %172 {strides = array<i32>} : memref<112x256xf32, #tpu.memory_space<vmem>>, vector<1x256xf32>,
    %c1_211 = arith.constant 1 : index
    %c177_212 = arith.constant 177 : index
    %174 = vector.load %arg5[%c1_211, %c177_212] : memref<2x512xf32, #tpu.memory_space<vmem>>, vector<1x256xf32>
    %c77_213 = arith.constant 77 : index
    %c0_214 = arith.constant 0 : index
    %175 = vector.load %arg6[%c77_213, %c0_214] : memref<112x256xf32, #tpu.memory_space<vmem>>, vector<1x256xf32>
    tpu.vector_store %arg6[%c77_213, %c0_214], %174 {strides = array<i32>} : memref<112x256xf32, #tpu.memory_space<vmem>>, vector<1x256xf32>,
    %cst_215 = arith.constant 0.000000e+00 : f32
    %176 = vector.broadcast %cst_215 : f32 to vector<2x256xf32>
    %c78_216 = arith.constant 78 : index
    %c0_217 = arith.constant 0 : index
    %177 = vector.load %arg6[%c78_216, %c0_217] : memref<112x256xf32, #tpu.memory_space<vmem>>, vector<2x256xf32>
    tpu.vector_store %arg6[%c78_216, %c0_217], %176 {strides = array<i32>} : memref<112x256xf32, #tpu.memory_space<vmem>>, vector<2x256xf32>,
    %c64_218 = arith.constant 64 : index
    %c0_219 = arith.constant 0 : index
    %178 = vector.load %arg6[%c64_218, %c0_219] : memref<112x256xf32, #tpu.memory_space<vmem>>, vector<16x256xf32>
    %c4_220 = arith.constant 4 : index
    %c0_221 = arith.constant 0 : index
    %179 = vector.load %arg3[%c4_220, %c0_221] : memref<7x256xf32, #tpu.memory_space<vmem>>, vector<1x256xf32>
    %180 = vector.broadcast %179 : vector<1x256xf32> to vector<16x256xf32>
    %181 = arith.mulf %178, %180 : vector<16x256xf32>
    %c64_222 = arith.constant 64 : index
    %c0_223 = arith.constant 0 : index
    %182 = vector.load %arg6[%c64_222, %c0_223] : memref<112x256xf32, #tpu.memory_space<vmem>>, vector<16x256xf32>
    tpu.vector_store %arg6[%c64_222, %c0_223], %181 {strides = array<i32>} : memref<112x256xf32, #tpu.memory_space<vmem>>, vector<16x256xf32>,
    %c0_224 = arith.constant 0 : index
    %c82 = arith.constant 82 : index
    %183 = vector.load %arg5[%c0_224, %c82] : memref<2x512xf32, #tpu.memory_space<vmem>>, vector<1x256xf32>
    %c80_225 = arith.constant 80 : index
    %c0_226 = arith.constant 0 : index
    %184 = vector.load %arg6[%c80_225, %c0_226] : memref<112x256xf32, #tpu.memory_space<vmem>>, vector<1x256xf32>
    tpu.vector_store %arg6[%c80_225, %c0_226], %183 {strides = array<i32>} : memref<112x256xf32, #tpu.memory_space<vmem>>, vector<1x256xf32>,
    %c0_227 = arith.constant 0 : index
    %c98 = arith.constant 98 : index
    %185 = vector.load %arg5[%c0_227, %c98] : memref<2x512xf32, #tpu.memory_space<vmem>>, vector<1x256xf32>
    %c81_228 = arith.constant 81 : index
    %c0_229 = arith.constant 0 : index
    %186 = vector.load %arg6[%c81_228, %c0_229] : memref<112x256xf32, #tpu.memory_space<vmem>>, vector<1x256xf32>
    tpu.vector_store %arg6[%c81_228, %c0_229], %185 {strides = array<i32>} : memref<112x256xf32, #tpu.memory_space<vmem>>, vector<1x256xf32>,
    %c0_230 = arith.constant 0 : index
    %c114 = arith.constant 114 : index
    %187 = vector.load %arg5[%c0_230, %c114] : memref<2x512xf32, #tpu.memory_space<vmem>>, vector<1x256xf32>
    %c82_231 = arith.constant 82 : index
    %c0_232 = arith.constant 0 : index
    %188 = vector.load %arg6[%c82_231, %c0_232] : memref<112x256xf32, #tpu.memory_space<vmem>>, vector<1x256xf32>
    tpu.vector_store %arg6[%c82_231, %c0_232], %187 {strides = array<i32>} : memref<112x256xf32, #tpu.memory_space<vmem>>, vector<1x256xf32>,
    %c0_233 = arith.constant 0 : index
    %c130 = arith.constant 130 : index
    %189 = vector.load %arg5[%c0_233, %c130] : memref<2x512xf32, #tpu.memory_space<vmem>>, vector<1x256xf32>
    %c83 = arith.constant 83 : index
    %c0_234 = arith.constant 0 : index
    %190 = vector.load %arg6[%c83, %c0_234] : memref<112x256xf32, #tpu.memory_space<vmem>>, vector<1x256xf32>
    tpu.vector_store %arg6[%c83, %c0_234], %189 {strides = array<i32>} : memref<112x256xf32, #tpu.memory_space<vmem>>, vector<1x256xf32>,
    %c0_235 = arith.constant 0 : index
    %c146 = arith.constant 146 : index
    %191 = vector.load %arg5[%c0_235, %c146] : memref<2x512xf32, #tpu.memory_space<vmem>>, vector<1x256xf32>
    %c84 = arith.constant 84 : index
    %c0_236 = arith.constant 0 : index
    %192 = vector.load %arg6[%c84, %c0_236] : memref<112x256xf32, #tpu.memory_space<vmem>>, vector<1x256xf32>
    tpu.vector_store %arg6[%c84, %c0_236], %191 {strides = array<i32>} : memref<112x256xf32, #tpu.memory_space<vmem>>, vector<1x256xf32>,
    %c0_237 = arith.constant 0 : index
    %c162 = arith.constant 162 : index
    %193 = vector.load %arg5[%c0_237, %c162] : memref<2x512xf32, #tpu.memory_space<vmem>>, vector<1x256xf32>
    %c85 = arith.constant 85 : index
    %c0_238 = arith.constant 0 : index
    %194 = vector.load %arg6[%c85, %c0_238] : memref<112x256xf32, #tpu.memory_space<vmem>>, vector<1x256xf32>
    tpu.vector_store %arg6[%c85, %c0_238], %193 {strides = array<i32>} : memref<112x256xf32, #tpu.memory_space<vmem>>, vector<1x256xf32>,
    %c0_239 = arith.constant 0 : index
    %c178 = arith.constant 178 : index
    %195 = vector.load %arg5[%c0_239, %c178] : memref<2x512xf32, #tpu.memory_space<vmem>>, vector<1x256xf32>
    %c86 = arith.constant 86 : index
    %c0_240 = arith.constant 0 : index
    %196 = vector.load %arg6[%c86, %c0_240] : memref<112x256xf32, #tpu.memory_space<vmem>>, vector<1x256xf32>
    tpu.vector_store %arg6[%c86, %c0_240], %195 {strides = array<i32>} : memref<112x256xf32, #tpu.memory_space<vmem>>, vector<1x256xf32>,
    %c1_241 = arith.constant 1 : index
    %c82_242 = arith.constant 82 : index
    %197 = vector.load %arg5[%c1_241, %c82_242] : memref<2x512xf32, #tpu.memory_space<vmem>>, vector<1x256xf32>
    %c87 = arith.constant 87 : index
    %c0_243 = arith.constant 0 : index
    %198 = vector.load %arg6[%c87, %c0_243] : memref<112x256xf32, #tpu.memory_space<vmem>>, vector<1x256xf32>
    tpu.vector_store %arg6[%c87, %c0_243], %197 {strides = array<i32>} : memref<112x256xf32, #tpu.memory_space<vmem>>, vector<1x256xf32>,
    %c1_244 = arith.constant 1 : index
    %c98_245 = arith.constant 98 : index
    %199 = vector.load %arg5[%c1_244, %c98_245] : memref<2x512xf32, #tpu.memory_space<vmem>>, vector<1x256xf32>
    %c88 = arith.constant 88 : index
    %c0_246 = arith.constant 0 : index
    %200 = vector.load %arg6[%c88, %c0_246] : memref<112x256xf32, #tpu.memory_space<vmem>>, vector<1x256xf32>
    tpu.vector_store %arg6[%c88, %c0_246], %199 {strides = array<i32>} : memref<112x256xf32, #tpu.memory_space<vmem>>, vector<1x256xf32>,
    %c1_247 = arith.constant 1 : index
    %c114_248 = arith.constant 114 : index
    %201 = vector.load %arg5[%c1_247, %c114_248] : memref<2x512xf32, #tpu.memory_space<vmem>>, vector<1x256xf32>
    %c89 = arith.constant 89 : index
    %c0_249 = arith.constant 0 : index
    %202 = vector.load %arg6[%c89, %c0_249] : memref<112x256xf32, #tpu.memory_space<vmem>>, vector<1x256xf32>
    tpu.vector_store %arg6[%c89, %c0_249], %201 {strides = array<i32>} : memref<112x256xf32, #tpu.memory_space<vmem>>, vector<1x256xf32>,
    %c1_250 = arith.constant 1 : index
    %c130_251 = arith.constant 130 : index
    %203 = vector.load %arg5[%c1_250, %c130_251] : memref<2x512xf32, #tpu.memory_space<vmem>>, vector<1x256xf32>
    %c90 = arith.constant 90 : index
    %c0_252 = arith.constant 0 : index
    %204 = vector.load %arg6[%c90, %c0_252] : memref<112x256xf32, #tpu.memory_space<vmem>>, vector<1x256xf32>
    tpu.vector_store %arg6[%c90, %c0_252], %203 {strides = array<i32>} : memref<112x256xf32, #tpu.memory_space<vmem>>, vector<1x256xf32>,
    %c1_253 = arith.constant 1 : index
    %c146_254 = arith.constant 146 : index
    %205 = vector.load %arg5[%c1_253, %c146_254] : memref<2x512xf32, #tpu.memory_space<vmem>>, vector<1x256xf32>
    %c91 = arith.constant 91 : index
    %c0_255 = arith.constant 0 : index
    %206 = vector.load %arg6[%c91, %c0_255] : memref<112x256xf32, #tpu.memory_space<vmem>>, vector<1x256xf32>
    tpu.vector_store %arg6[%c91, %c0_255], %205 {strides = array<i32>} : memref<112x256xf32, #tpu.memory_space<vmem>>, vector<1x256xf32>,
    %c1_256 = arith.constant 1 : index
    %c162_257 = arith.constant 162 : index
    %207 = vector.load %arg5[%c1_256, %c162_257] : memref<2x512xf32, #tpu.memory_space<vmem>>, vector<1x256xf32>
    %c92 = arith.constant 92 : index
    %c0_258 = arith.constant 0 : index
    %208 = vector.load %arg6[%c92, %c0_258] : memref<112x256xf32, #tpu.memory_space<vmem>>, vector<1x256xf32>
    tpu.vector_store %arg6[%c92, %c0_258], %207 {strides = array<i32>} : memref<112x256xf32, #tpu.memory_space<vmem>>, vector<1x256xf32>,
    %c1_259 = arith.constant 1 : index
    %c178_260 = arith.constant 178 : index
    %209 = vector.load %arg5[%c1_259, %c178_260] : memref<2x512xf32, #tpu.memory_space<vmem>>, vector<1x256xf32>
    %c93_261 = arith.constant 93 : index
    %c0_262 = arith.constant 0 : index
    %210 = vector.load %arg6[%c93_261, %c0_262] : memref<112x256xf32, #tpu.memory_space<vmem>>, vector<1x256xf32>
    tpu.vector_store %arg6[%c93_261, %c0_262], %209 {strides = array<i32>} : memref<112x256xf32, #tpu.memory_space<vmem>>, vector<1x256xf32>,
    %cst_263 = arith.constant 0.000000e+00 : f32
    %211 = vector.broadcast %cst_263 : f32 to vector<2x256xf32>
    %c94_264 = arith.constant 94 : index
    %c0_265 = arith.constant 0 : index
    %212 = vector.load %arg6[%c94_264, %c0_265] : memref<112x256xf32, #tpu.memory_space<vmem>>, vector<2x256xf32>
    tpu.vector_store %arg6[%c94_264, %c0_265], %211 {strides = array<i32>} : memref<112x256xf32, #tpu.memory_space<vmem>>, vector<2x256xf32>,
    %c80_266 = arith.constant 80 : index
    %c0_267 = arith.constant 0 : index
    %213 = vector.load %arg6[%c80_266, %c0_267] : memref<112x256xf32, #tpu.memory_space<vmem>>, vector<16x256xf32>
    %c5_268 = arith.constant 5 : index
    %c0_269 = arith.constant 0 : index
    %214 = vector.load %arg3[%c5_268, %c0_269] : memref<7x256xf32, #tpu.memory_space<vmem>>, vector<1x256xf32>
    %215 = vector.broadcast %214 : vector<1x256xf32> to vector<16x256xf32>
    %216 = arith.mulf %213, %215 : vector<16x256xf32>
    %c80_270 = arith.constant 80 : index
    %c0_271 = arith.constant 0 : index
    %217 = vector.load %arg6[%c80_270, %c0_271] : memref<112x256xf32, #tpu.memory_space<vmem>>, vector<16x256xf32>
    tpu.vector_store %arg6[%c80_270, %c0_271], %216 {strides = array<i32>} : memref<112x256xf32, #tpu.memory_space<vmem>>, vector<16x256xf32>,
    %c0_272 = arith.constant 0 : index
    %c83_273 = arith.constant 83 : index
    %218 = vector.load %arg5[%c0_272, %c83_273] : memref<2x512xf32, #tpu.memory_space<vmem>>, vector<1x256xf32>
    %c96_274 = arith.constant 96 : index
    %c0_275 = arith.constant 0 : index
    %219 = vector.load %arg6[%c96_274, %c0_275] : memref<112x256xf32, #tpu.memory_space<vmem>>, vector<1x256xf32>
    tpu.vector_store %arg6[%c96_274, %c0_275], %218 {strides = array<i32>} : memref<112x256xf32, #tpu.memory_space<vmem>>, vector<1x256xf32>,
    %c0_276 = arith.constant 0 : index
    %c99 = arith.constant 99 : index
    %220 = vector.load %arg5[%c0_276, %c99] : memref<2x512xf32, #tpu.memory_space<vmem>>, vector<1x256xf32>
    %c97_277 = arith.constant 97 : index
    %c0_278 = arith.constant 0 : index
    %221 = vector.load %arg6[%c97_277, %c0_278] : memref<112x256xf32, #tpu.memory_space<vmem>>, vector<1x256xf32>
    tpu.vector_store %arg6[%c97_277, %c0_278], %220 {strides = array<i32>} : memref<112x256xf32, #tpu.memory_space<vmem>>, vector<1x256xf32>,
    %c0_279 = arith.constant 0 : index
    %c115 = arith.constant 115 : index
    %222 = vector.load %arg5[%c0_279, %c115] : memref<2x512xf32, #tpu.memory_space<vmem>>, vector<1x256xf32>
    %c98_280 = arith.constant 98 : index
    %c0_281 = arith.constant 0 : index
    %223 = vector.load %arg6[%c98_280, %c0_281] : memref<112x256xf32, #tpu.memory_space<vmem>>, vector<1x256xf32>
    tpu.vector_store %arg6[%c98_280, %c0_281], %222 {strides = array<i32>} : memref<112x256xf32, #tpu.memory_space<vmem>>, vector<1x256xf32>,
    %c0_282 = arith.constant 0 : index
    %c131 = arith.constant 131 : index
    %224 = vector.load %arg5[%c0_282, %c131] : memref<2x512xf32, #tpu.memory_space<vmem>>, vector<1x256xf32>
    %c99_283 = arith.constant 99 : index
    %c0_284 = arith.constant 0 : index
    %225 = vector.load %arg6[%c99_283, %c0_284] : memref<112x256xf32, #tpu.memory_space<vmem>>, vector<1x256xf32>
    tpu.vector_store %arg6[%c99_283, %c0_284], %224 {strides = array<i32>} : memref<112x256xf32, #tpu.memory_space<vmem>>, vector<1x256xf32>,
    %c0_285 = arith.constant 0 : index
    %c147 = arith.constant 147 : index
    %226 = vector.load %arg5[%c0_285, %c147] : memref<2x512xf32, #tpu.memory_space<vmem>>, vector<1x256xf32>
    %c100 = arith.constant 100 : index
    %c0_286 = arith.constant 0 : index
    %227 = vector.load %arg6[%c100, %c0_286] : memref<112x256xf32, #tpu.memory_space<vmem>>, vector<1x256xf32>
    tpu.vector_store %arg6[%c100, %c0_286], %226 {strides = array<i32>} : memref<112x256xf32, #tpu.memory_space<vmem>>, vector<1x256xf32>,
    %c0_287 = arith.constant 0 : index
    %c163 = arith.constant 163 : index
    %228 = vector.load %arg5[%c0_287, %c163] : memref<2x512xf32, #tpu.memory_space<vmem>>, vector<1x256xf32>
    %c101 = arith.constant 101 : index
    %c0_288 = arith.constant 0 : index
    %229 = vector.load %arg6[%c101, %c0_288] : memref<112x256xf32, #tpu.memory_space<vmem>>, vector<1x256xf32>
    tpu.vector_store %arg6[%c101, %c0_288], %228 {strides = array<i32>} : memref<112x256xf32, #tpu.memory_space<vmem>>, vector<1x256xf32>,
    %c0_289 = arith.constant 0 : index
    %c179 = arith.constant 179 : index
    %230 = vector.load %arg5[%c0_289, %c179] : memref<2x512xf32, #tpu.memory_space<vmem>>, vector<1x256xf32>
    %c102 = arith.constant 102 : index
    %c0_290 = arith.constant 0 : index
    %231 = vector.load %arg6[%c102, %c0_290] : memref<112x256xf32, #tpu.memory_space<vmem>>, vector<1x256xf32>
    tpu.vector_store %arg6[%c102, %c0_290], %230 {strides = array<i32>} : memref<112x256xf32, #tpu.memory_space<vmem>>, vector<1x256xf32>,
    %c1_291 = arith.constant 1 : index
    %c83_292 = arith.constant 83 : index
    %232 = vector.load %arg5[%c1_291, %c83_292] : memref<2x512xf32, #tpu.memory_space<vmem>>, vector<1x256xf32>
    %c103 = arith.constant 103 : index
    %c0_293 = arith.constant 0 : index
    %233 = vector.load %arg6[%c103, %c0_293] : memref<112x256xf32, #tpu.memory_space<vmem>>, vector<1x256xf32>
    tpu.vector_store %arg6[%c103, %c0_293], %232 {strides = array<i32>} : memref<112x256xf32, #tpu.memory_space<vmem>>, vector<1x256xf32>,
    %c1_294 = arith.constant 1 : index
    %c99_295 = arith.constant 99 : index
    %234 = vector.load %arg5[%c1_294, %c99_295] : memref<2x512xf32, #tpu.memory_space<vmem>>, vector<1x256xf32>
    %c104 = arith.constant 104 : index
    %c0_296 = arith.constant 0 : index
    %235 = vector.load %arg6[%c104, %c0_296] : memref<112x256xf32, #tpu.memory_space<vmem>>, vector<1x256xf32>
    tpu.vector_store %arg6[%c104, %c0_296], %234 {strides = array<i32>} : memref<112x256xf32, #tpu.memory_space<vmem>>, vector<1x256xf32>,
    %c1_297 = arith.constant 1 : index
    %c115_298 = arith.constant 115 : index
    %236 = vector.load %arg5[%c1_297, %c115_298] : memref<2x512xf32, #tpu.memory_space<vmem>>, vector<1x256xf32>
    %c105 = arith.constant 105 : index
    %c0_299 = arith.constant 0 : index
    %237 = vector.load %arg6[%c105, %c0_299] : memref<112x256xf32, #tpu.memory_space<vmem>>, vector<1x256xf32>
    tpu.vector_store %arg6[%c105, %c0_299], %236 {strides = array<i32>} : memref<112x256xf32, #tpu.memory_space<vmem>>, vector<1x256xf32>,
    %c1_300 = arith.constant 1 : index
    %c131_301 = arith.constant 131 : index
    %238 = vector.load %arg5[%c1_300, %c131_301] : memref<2x512xf32, #tpu.memory_space<vmem>>, vector<1x256xf32>
    %c106 = arith.constant 106 : index
    %c0_302 = arith.constant 0 : index
    %239 = vector.load %arg6[%c106, %c0_302] : memref<112x256xf32, #tpu.memory_space<vmem>>, vector<1x256xf32>
    tpu.vector_store %arg6[%c106, %c0_302], %238 {strides = array<i32>} : memref<112x256xf32, #tpu.memory_space<vmem>>, vector<1x256xf32>,
    %c1_303 = arith.constant 1 : index
    %c147_304 = arith.constant 147 : index
    %240 = vector.load %arg5[%c1_303, %c147_304] : memref<2x512xf32, #tpu.memory_space<vmem>>, vector<1x256xf32>
    %c107 = arith.constant 107 : index
    %c0_305 = arith.constant 0 : index
    %241 = vector.load %arg6[%c107, %c0_305] : memref<112x256xf32, #tpu.memory_space<vmem>>, vector<1x256xf32>
    tpu.vector_store %arg6[%c107, %c0_305], %240 {strides = array<i32>} : memref<112x256xf32, #tpu.memory_space<vmem>>, vector<1x256xf32>,
    %c1_306 = arith.constant 1 : index
    %c163_307 = arith.constant 163 : index
    %242 = vector.load %arg5[%c1_306, %c163_307] : memref<2x512xf32, #tpu.memory_space<vmem>>, vector<1x256xf32>
    %c108 = arith.constant 108 : index
    %c0_308 = arith.constant 0 : index
    %243 = vector.load %arg6[%c108, %c0_308] : memref<112x256xf32, #tpu.memory_space<vmem>>, vector<1x256xf32>
    tpu.vector_store %arg6[%c108, %c0_308], %242 {strides = array<i32>} : memref<112x256xf32, #tpu.memory_space<vmem>>, vector<1x256xf32>,
    %c1_309 = arith.constant 1 : index
    %c179_310 = arith.constant 179 : index
    %244 = vector.load %arg5[%c1_309, %c179_310] : memref<2x512xf32, #tpu.memory_space<vmem>>, vector<1x256xf32>
    %c109_311 = arith.constant 109 : index
    %c0_312 = arith.constant 0 : index
    %245 = vector.load %arg6[%c109_311, %c0_312] : memref<112x256xf32, #tpu.memory_space<vmem>>, vector<1x256xf32>
    tpu.vector_store %arg6[%c109_311, %c0_312], %244 {strides = array<i32>} : memref<112x256xf32, #tpu.memory_space<vmem>>, vector<1x256xf32>,
    %cst_313 = arith.constant 0.000000e+00 : f32
    %246 = vector.broadcast %cst_313 : f32 to vector<2x256xf32>
    %c110_314 = arith.constant 110 : index
    %c0_315 = arith.constant 0 : index
    %247 = vector.load %arg6[%c110_314, %c0_315] : memref<112x256xf32, #tpu.memory_space<vmem>>, vector<2x256xf32>
    tpu.vector_store %arg6[%c110_314, %c0_315], %246 {strides = array<i32>} : memref<112x256xf32, #tpu.memory_space<vmem>>, vector<2x256xf32>,
    %c96_316 = arith.constant 96 : index
    %c0_317 = arith.constant 0 : index
    %248 = vector.load %arg6[%c96_316, %c0_317] : memref<112x256xf32, #tpu.memory_space<vmem>>, vector<16x256xf32>
    %c6_318 = arith.constant 6 : index
    %c0_319 = arith.constant 0 : index
    %249 = vector.load %arg3[%c6_318, %c0_319] : memref<7x256xf32, #tpu.memory_space<vmem>>, vector<1x256xf32>
    %250 = vector.broadcast %249 : vector<1x256xf32> to vector<16x256xf32>
    %251 = arith.mulf %248, %250 : vector<16x256xf32>
    %c96_320 = arith.constant 96 : index
    %c0_321 = arith.constant 0 : index
    %252 = vector.load %arg6[%c96_320, %c0_321] : memref<112x256xf32, #tpu.memory_space<vmem>>, vector<16x256xf32>
    tpu.vector_store %arg6[%c96_320, %c0_321], %251 {strides = array<i32>} : memref<112x256xf32, #tpu.memory_space<vmem>>, vector<16x256xf32>,
    %c0_322 = arith.constant 0 : index
    %c0_323 = arith.constant 0 : index
    %253 = vector.load %arg2[%c0_322, %c0_323] : memref<8x112xf32, #tpu.memory_space<vmem>>, vector<8x112xf32>
    %c0_324 = arith.constant 0 : index
    %c0_325 = arith.constant 0 : index
    %254 = vector.load %arg6[%c0_324, %c0_325] : memref<112x256xf32, #tpu.memory_space<vmem>>, vector<112x256xf32>
    %cst_326 = arith.constant dense<0.000000e+00> : vector<8x256xf32>
    %255 = tpu.matmul %253, %254, %cst_326 {dimension_numbers = #tpu.dot_dimension_numbers<[1], [0], [0], [1], [0, 0, 1, 1], [], []>, precision = #tpu.contract_precision<fp32>} : vector<8x112xf32>, vector<112x256xf32>, vector<8x256xf32> -> vector<8x256xf32>
    %256 = arith.negf %255 : vector<8x256xf32>
    %257 = math.exp %256 : vector<8x256xf32>
    %cst_327 = arith.constant 1.000000e+00 : f32
    %258 = vector.broadcast %cst_327 : f32 to vector<8x256xf32>
    %259 = arith.addf %258, %257 : vector<8x256xf32>
    %260 = arith.divf %258, %259 : vector<8x256xf32>
    %c0_328 = arith.constant 0 : index
    %c0_329 = arith.constant 0 : index
    %c0_330 = arith.constant 0 : index
    %261 = vector.load %arg4[%c0_328, %c0_329, %c0_330] : memref<1x8x256xf32, #tpu.memory_space<vmem>>, vector<1x8x256xf32>
    %262 = vector.shape_cast %261 : vector<1x8x256xf32> to vector<8x256xf32>
    %263 = vector.shape_cast %260 : vector<8x256xf32> to vector<1x8x256xf32>
    tpu.vector_store %arg4[%c0_328, %c0_329, %c0_330], %263 {strides = array<i32>} : memref<1x8x256xf32, #tpu.memory_space<vmem>>, vector<1x8x256xf32>,
    return
  }
  func.func @transform_0(%arg0: i32) -> (i32, i32, i32) {
    %c0_i32 = arith.constant 0 : i32
    %c0_i32_0 = arith.constant 0 : i32
    %c0_i32_1 = arith.constant 0 : i32
    return %arg0, %c0_i32, %c0_i32_0 : i32, i32, i32
  }
  func.func @transform_1(%arg0: i32) -> (i32, i32) {
    %c0_i32 = arith.constant 0 : i32
    %c0_i32_0 = arith.constant 0 : i32
    %c0_i32_1 = arith.constant 0 : i32
    return %c0_i32, %c0_i32_0 : i32, i32
  }
  func.func @transform_2(%arg0: i32) -> (i32, i32) {
    %c0_i32 = arith.constant 0 : i32
    %c0_i32_0 = arith.constant 0 : i32
    %c0_i32_1 = arith.constant 0 : i32
    return %c0_i32, %c0_i32_0 : i32, i32
  }
  func.func @transform_3(%arg0: i32) -> (i32, i32, i32) {
    %c0_i32 = arith.constant 0 : i32
    %c0_i32_0 = arith.constant 0 : i32
    %c0_i32_1 = arith.constant 0 : i32
    return %arg0, %c0_i32, %c0_i32_0 : i32, i32, i32
  }
}

</mosaic_0001>

<bundles_post_ra>
// kernel: tpu_custom_call.1
= control target key start
LH: loop header
LB: loop body
LE: loop exit
PB: predicated region body
PF: predicated region fallthrough
CT: control target
= control target key end

     0   :  { %8 = vsyncpa [#allocation5], 0  ;;  %s4073_s0 = inlined_call_operand.hbm [shape: f32[2,4,256], index: 0, kind: input, shape index: {}]   ;;  %s4074_s1 = inlined_call_operand.hbm [shape: f32[8,112], index: 1, kind: input, shape index: {}]   ;;  %s4075_s2 = inlined_call_operand.hbm [shape: f32[7,256], index: 2, kind: input, shape index: {}]   ;;  %s4076_s3 = inlined_call_operand.hbm [shape: f32[2,8,256], index: 3, kind: output, shape index: {}]  }
   0x1   :  { %10 = vsyncpa [#allocation5 + $0x1], 0 }
   0x2   :  { %11 = vsyncpa [#allocation8], 0 }
   0x3   :  { %12 = vsyncpa [#allocation6], 0 }
   0x4   :  { %14 = vsyncpa [#allocation6 + $0x1], 0  ;;  %s2986_s12 = smov 0   ;;  %s2988_s13 = smov 0  }
   0x5   :  { %s2990_s14 = smov 0   ;;  %s2992_s15 = smov 0  }
   0x6 LB: > { %s3007_s16 = sadd.s32 4294967295, %s2910_s15   ;;  %s2428_s17 = sadd.s32 4294967294, %s2910_s15   ;;  %s2910_s15 = sphi %s2992_s15, %s4177_s15   ;;  %s2906_s14 = sphi %s2990_s14, %s4176_s14   ;;  %s2902_s13 = sphi %s2988_s13, %s4175_s13   ;;  %s2898_s12 = sphi %s2986_s12, %s4174_s12  }
   0x7   : > { %p40_p0 = scmp.ne.s32.totalorder %s2902_s13, %s2898_s12  ;;  %p4077_p1 = scmp.eq.s32.totalorder %s3007_s16, 0 }
   0x8   : > { %p112_p3 = scmp.eq.s32.totalorder %s2428_s17, 1  ;;  %p2429_p5 = scmp.ge.s32.totalorder %s2910_s15, 1 }
   0x9   : > { %p3016_p4 = por %p4077_p1, %p40_p0  ;;  %p119_p7 = scmp.lt.s32.totalorder %s2910_s15, 3 }
   0xa   : > { %p3021_p6 = por %p112_p3, %p40_p0  ;;  %s2912_s21 = smov [#allocation7]  }
   0xb   : > { %s4108_s18 = scalar_select %p3016_p4, 1, 0 }
   0xc   : > { %s4109_s19 = scalar_select %p3021_p6, 1, 0 }
   0xd   : > { %p3026_p8 = pnand %p2429_p5, %p119_p7  ;;  %s132_s22 = sshll.u32 %s2912_s21, 4  ;;  %s133_s22 = int_to_ptr.vmem [resolvable:$true] %s132_s22 }
   0xe   : > { %s2913_s23 = smov [#allocation9]   ;;  %s3042_s26 = sadd.s32 1, %s2910_s15  }
   0xf   : > { %s4110_s20 = scalar_select %p3026_p8, 1, 0 }
  0x10   : > { %p2640_p10 = pneg %p3026_p8  ;;  %s143_s24 = sshll.u32 %s2913_s23, 4  ;;  %s3039_s24 = int_to_ptr.vmem [resolvable:$true] %s143_s24 }
  0x11   : > { %s24_s27 = ssub.s32 %s2910_s15, %s3042_s26  ;;  %s2754_s30 = scalar_lea.hbm %s4074_s1, 128 }
  0x12   : > { %p3035_p11 = pnand %p2640_p10, %p4077_p1  ;;  %p2755_p12 = scmp.ne.s32.totalorder %s4074_s1, %s2754_s30 }
  0x13   : > { %p2761_p5 = scmp.lt.u32.totalorder %s2754_s30, %s4074_s1 }
  0x14   : > { %p2756_p13 = pneg %p3035_p11 }
  0x16   : > { %p2757_p0 = pnand %p2756_p13, %p2755_p12 }
  0x18   : > { %p2758_p3 = pneg %p2757_p0 }
  0x1a   : > { %p2763_p7 = pnand %p2761_p5, %p2758_p3 }
  0x1c   : > { %2766 = shalt.err (!%p2763_p7)
}
  0x1d   : > { %s2767_s8 = scalar_lea.vmem %s133_s22, 128  ;;  %p2775_p2 = scmp.lt.s32.totalorder %s133_s22, %s133_s22 }
  0x1e   : > { %p2768_p10 = scmp.ne.s32.totalorder %s133_s22, %s2767_s8  ;;  %p2776_p6 = scmp.lt.s32.totalorder %s2767_s8, %s2767_s8 }
  0x20   : > { %p2770_p9 = pnand %p2768_p10, %p2756_p13  ;;  %p2777_p4 = por %p2776_p6, %p2775_p2 }
  0x22   : > { %p2771_p1 = pneg %p2770_p9 }
  0x24   : > { %p2778_p8 = pnand %p2777_p4, %p2771_p1 }
  0x26   : > { %2781 = shalt.err (!%p2778_p8)
}
  0x27   : > { %2643 = dma.hbm_to_vmem [thread:$0]  (!%p3035_p11), %s4074_s1, 128, %s133_s22, [#allocation8]  }
  0x28   : > { %s2782_s21 = scalar_lea.hbm %s4075_s2, 256 }
  0x29   : > { %p2783_p9 = scmp.ne.s32.totalorder %s4075_s2, %s2782_s21  ;;  %p2789_p4 = scmp.lt.u32.totalorder %s2782_s21, %s4075_s2 }
  0x2b   : > { %p2785_p2 = pnand %p2783_p9, %p2756_p13 }
  0x2d   : > { %p2786_p1 = pneg %p2785_p2 }
  0x2f   : > { %p2791_p6 = pnand %p2789_p4, %p2786_p1 }
  0x31   : > { %2794 = shalt.err (!%p2791_p6)
}
  0x32   : > { %s2795_s22 = scalar_lea.vmem %s3039_s24, 256  ;;  %p2803_p3 = scmp.lt.s32.totalorder %s3039_s24, %s3039_s24 }
  0x33   : > { %p2796_p8 = scmp.ne.s32.totalorder %s3039_s24, %s2795_s22  ;;  %p2804_p5 = scmp.lt.s32.totalorder %s2795_s22, %s2795_s22 }
  0x35   : > { %p2798_p12 = pnand %p2796_p8, %p2756_p13  ;;  %p2805_p7 = por %p2804_p5, %p2803_p3 }
  0x37   : > { %p2799_p0 = pneg %p2798_p12 }
  0x39   : > { %p2806_p10 = pnand %p2805_p7, %p2799_p0 }
  0x3b   : > { %2809 = shalt.err (!%p2806_p10)
}
  0x3c   : > { %2646 = dma.hbm_to_vmem [thread:$0]  (!%p3035_p11), %s4075_s2, 256, %s3039_s24, [#allocation8]  }
  0x3d   : > { %p25_p13 = scmp.eq.s32.totalorder %s24_s27, 0  ;;  %s27_s6 = sadd.s32 1, %s2906_s14 }
  0x3e   : > { %p34_p9 = scmp.ne.s32.totalorder %s2906_s14, %s2902_s13  ;;  %p35_p2 = scmp.eq.s32.totalorder %s2910_s15, 0 }
  0x3f   : > { %s3101_s25 = scalar_select %p25_p13, %s2906_s14, %s27_s6  }
  0x40   : > { %p36_p1 = por %p35_p2, %p34_p9  ;;  %p4112_p4 = scmp.eq.s32.totalorder %s3007_s16, 1 }
  0x41   : > { %p2657_p8 = scmp.lt.s32.totalorder %s2910_s15, 2  ;;  %s154_s8 = sand.u32 1, %s2906_s14  }
  0x42   : > { %p3105_p6 = por %p4112_p4, %p34_p9  ;;  %s2433_s9 = sshll.u32 %s154_s8, 3 }
  0x43   : > { %s2448_s10 = sshll.u32 %s2910_s15, 7  ;;  %s158_s27 = scalar_lea.vmem [#allocation4], %s2433_s9 }
  0x44   : > { %s3115_s24 = scalar_lea.hbm %s4073_s0, %s2448_s10  ;;  %s166_s21 = sshll.u32 %s158_s27, 4  ;;  %s3117_s21 = int_to_ptr.vmem [resolvable:$true] %s166_s21 }
  0x45   : > { %p3119_p11 = pnand %p2657_p8, %p36_p1  ;;  %s155_s28 = scalar_lea.sflag [#allocation5], %s154_s8 }
  0x46   : > { %s2810_s29 = scalar_lea.hbm %s3115_s24, 128  ;;  %s2815_s4 = scalar_lea.hbm %s4073_s0, 256 }
  0x47   : > { %p2811_p12 = scmp.ne.s32.totalorder %s3115_s24, %s2810_s29  ;;  %p2812_p0 = pneg %p3119_p11 }
  0x48   : > { %p2816_p7 = scmp.lt.u32.totalorder %s3115_s24, %s4073_s0  ;;  %p2817_p10 = scmp.lt.u32.totalorder %s2815_s4, %s2810_s29 }
  0x49   : > { %p2813_p3 = pnand %p2812_p0, %p2811_p12  ;;  %p2819_p9 = scmp.lt.u32.totalorder %s2810_s29, %s3115_s24 }
  0x4a   : > { %p2818_p13 = por %p2817_p10, %p2816_p7 }
  0x4b   : > { %p2814_p5 = pneg %p2813_p3 }
  0x4c   : > { %p2820_p2 = por %p2819_p9, %p2818_p13 }
  0x4e   : > { %p2821_p1 = pnand %p2820_p2, %p2814_p5 }
  0x50   : > { %2824 = shalt.err (!%p2821_p1)
}
  0x51   : > { %s2825_s8 = scalar_lea.vmem %s3117_s21, 128  ;;  %s2914_s9 = smov [#allocation4]  }
  0x52   : > { %p2826_p4 = scmp.ne.s32.totalorder %s3117_s21, %s2825_s8  ;;  %s2830_s10 = sshll.u32 %s2914_s9, 4  ;;  %s2831_s10 = int_to_ptr.vmem [resolvable:$false] %s2830_s10 }
  0x53   : > { %s2832_s11 = scalar_lea.vmem %s2831_s10, 256  ;;  %p2833_p3 = scmp.lt.s32.totalorder %s3117_s21, %s2831_s10 }
  0x54   : > { %p2828_p8 = pnand %p2826_p4, %p2812_p0  ;;  %p2834_p7 = scmp.lt.s32.totalorder %s2832_s11, %s2825_s8 }
  0x56   : > { %p2829_p12 = pneg %p2828_p8  ;;  %p2835_p10 = por %p2834_p7, %p2833_p3 }
  0x58   : > { %p2836_p13 = pnand %p2835_p10, %p2829_p12 }
  0x5a   : > { %2839 = shalt.err (!%p2836_p13)
}
  0x5b   : > { %2650 = dma.hbm_to_vmem [thread:$0]  (!%p3119_p11), %s3115_s24, 128, %s3117_s21, %s155_s28  }
  0x5c   : > { %p4115_p5 = scmp.ne.s32.totalorder %s4110_s20, 0 }
  0x5e   : > { %175 = sbr.rel (%p4115_p5) target bundleno = 774 (0x306), region = 32 }
  0x65   : > { %s3151_s17 = sand.u32 1, %s2902_s13   ;;  %p4116_p0 = scmp.ne.s32.totalorder %s4108_s18, 0 }
  0x66   : > { %s2437_s27 = sshll.u32 %s3151_s17, 3  ;;  %s178_s29 = scalar_lea.sflag [#allocation5], %s3151_s17 }
  0x67   : > { %s181_s30 = scalar_lea.vmem [#allocation4], %s2437_s27 }
  0x68   : > { %2885 = dma.done.wait (%p4116_p0), %s178_s29, 128  }
  0x69   : > { %2887 = vsyncadd (%p4116_p0), %s178_s29, 4294967168  ;;  %p4117_p9 = scmp.eq.s32.totalorder %s3007_s16, 0 }
  0x6b   : > { %2889 = dma.done.wait (%p4117_p9), [#allocation8], 384   ;;  %p4118_p11 = pmov %p4117_p9 }
  0x6c   : > { %v4080_v0 = vmov 0.0   ;;  %vm216_vm0 = vcmask 1043456   ;;  %v212_v1 = vld [vmem:[%s181_s30] sm:$0xff]  ;;  %v2916_v13 = vmov 1966171168   ;;  %v256_v15 = vlaneseq  ;;  %s2917_s18 = smov 35  }
  0x6d   : > { %2891 = vsyncadd (%p4118_p11), [#allocation8], 4294966912  ;;  %248 = vst [vmem:[#allocation2] sm:$0x3] %v4080_v0  ;;  %1599 = vmatprep.mubr.f32.mxu1 %v4080_v0  ;;  %2044 = vmatprep.mubr.f32.mxu0 %v4080_v0  ;;  %v214_v2 = vcombine.high %v212_v1, %v212_v1  ;;  %v234_v3 = vsel %vm216_vm0, %v212_v1, -inf  ;;  %v217_v4 = vsel %vm216_vm0, %v212_v1, 0.0  ;;  %v254_v14 = vunpack.c.l.s4 %v2916_v13 }
  0x6e   : > { %249 = vst [vmem:[#allocation2 + $0x6] sm:$0x3] %v4080_v0  ;;  %443 = vst [vmem:[#allocation3 + $0x10] sm:$0xc0] %v4080_v0  ;;  %v235_v5 = vrot.slane %v234_v3, 4  ;;  %v218_v6 = vrot.slane %v217_v4, 4 }
  0x6f   : > { %444 = vst [vmem:[#allocation3 + $0x18] sm:$0xc0] %v4080_v0  ;;  %616 = vst [vmem:[#allocation3 + $0x30] sm:$0xc0] %v4080_v0  ;;  %v241_v7 = vsel %vm216_vm0, %v214_v2, -inf  ;;  %v224_v8 = vsel %vm216_vm0, %v214_v2, 0.0  ;;  %v255_v24 = vunpack.c.0.s8 %v254_v14 }
  0x70   : > { %617 = vst [vmem:[#allocation3 + $0x38] sm:$0xc0] %v4080_v0  ;;  %790 = vst [vmem:[#allocation3 + $0x50] sm:$0xc0] %v4080_v0  ;;  %v236_v9 = vmax.f32 %v234_v3, %v235_v5  ;;  %v242_v10 = vrot.slane %v241_v7, 4  ;;  %v219_v11 = vadd.f32 %v218_v6, %v217_v4  ;;  %v225_v12 = vrot.slane %v224_v8, 4 }
  0x71   : > { %791 = vst [vmem:[#allocation3 + $0x58] sm:$0xc0] %v4080_v0  ;;  %951 = vst [vmem:[#allocation3 + $0x70] sm:$0xc0] %v4080_v0  ;;  %v3181_v25 = vshrl.u32 %v256_v15, 7  ;;  %vm3184_vm1 = vcmp.lt.s32.totalorder %v256_v15, 256 }
  0x72   : > { %952 = vst [vmem:[#allocation3 + $0x78] sm:$0xc0] %v4080_v0  ;;  %1100 = vst [vmem:[#allocation3 + $0x90] sm:$0xc0] %v4080_v0  ;;  %v237_v16 = vrot.slane %v236_v9, 2  ;;  %v243_v17 = vmax.f32 %v241_v7, %v242_v10  ;;  %v220_v18 = vrot.slane %v219_v11, 2  ;;  %v226_v19 = vadd.f32 %v225_v12, %v224_v8 }
  0x73   : > { %1101 = vst [vmem:[#allocation3 + $0x98] sm:$0xc0] %v4080_v0  ;;  %1274 = vst [vmem:[#allocation3 + $0xb0] sm:$0xc0] %v4080_v0  ;;  %v258_v35 = vsub.s32 %v255_v24, %v3181_v25  ;;  %s2918_s20 = smov 51   ;;  %s2919_s24 = smov 3  }
  0x74   : > { %1275 = vst [vmem:[#allocation3 + $0xb8] sm:$0xc0] %v4080_v0  ;;  %1448 = vst [vmem:[#allocation3 + $0xd0] sm:$0xc0] %v4080_v0  ;;  %v238_v20 = vmax.f32 %v236_v9, %v237_v16  ;;  %v244_v21 = vrot.slane %v243_v17, 2  ;;  %v221_v22 = vadd.f32 %v220_v18, %v219_v11  ;;  %v227_v23 = vrot.slane %v226_v19, 2 }
  0x75   : > { %1449 = vst [vmem:[#allocation3 + $0xd8] sm:$0xc0] %v4080_v0  ;;  %s2920_s21 = smov 19   ;;  %s2921_s23 = smov 99   ;;  %vm309_vm2 = vcmask 285696   ;;  %vm299_vm3 = vcmask 416768  }
  0x76   : > { %v239_v26 = vrot.slane %v238_v20, 1  ;;  %v245_v27 = vmax.f32 %v243_v17, %v244_v21  ;;  %v222_v28 = vrot.slane %v221_v22, 1  ;;  %v228_v29 = vadd.f32 %v227_v23, %v226_v19  ;;  %s2922_s28 = smov 115   ;;  %s2923_s22 = smov 83  }
  0x77   : > { %s2924_s4 = smov 34   ;;  %s2925_s5 = smov 50   ;;  %vm331_vm4 = vcmask 23552   ;;  %vm320_vm5 = vcmask 154624   ;;  %vm354_vm6 = vcmask 809984   ;;  %vm343_vm7 = vcmask 941056  }
  0x78   : > { %v240_v30 = vmax.f32 %v238_v20, %v239_v26  ;;  %v246_v31 = vrot.slane %v245_v27, 1  ;;  %v223_v32 = vadd.f32 %v222_v28, %v221_v22  ;;  %v229_v33 = vrot.slane %v228_v29, 1  ;;  %s2926_s6 = smov 2   ;;  %s2927_s8 = smov 18  }
  0x79   : > { %s2928_s9 = smov 98   ;;  %s2929_s10 = smov 114   ;;  %vm365_vm8 = vcmask 678912   ;;  %vm485_vm9 = vcmask 277504   ;;  %vm474_vm10 = vcmask 408576   ;;  %vm507_vm11 = vcmask 15360  }
  0x7a   : > { %v247_v34 = vmax.f32 %v245_v27, %v246_v31  ;;  %v230_v36 = vadd.f32 %v229_v33, %v228_v29  ;;  %v232_v37 = vmul.f32 0.25, %v223_v32  ;;  %s2930_s11 = smov 82   ;;  %s2931_s27 = smov 33   ;;  %vm496_vm12 = vcmask 146432  }
  0x7b   : > { %s2932_s29 = smov 49   ;;  %s2933_s30 = smov 1   ;;  %vm529_vm13 = vcmask 801792   ;;  %vm518_vm14 = vcmask 932864   ;;  %vm540_vm15 = vcmask 670720   ;;  %vm659_vm0 = vcmask 269312  }
  0x7c   : > { %v276_v38 = vcombine.low %v240_v30, %v247_v34  ;;  %v233_v39 = vmul.f32 0.25, %v230_v36 }
  0x7e   : > { %v283_v40 = vrot.slane %v276_v38, %v258_v35  ;;  %v252_v41 = vcombine.low %v232_v37, %v233_v39 }
  0x80   : > { %v290_v43 = vrot.slane %v283_v40, %v258_v35  ;;  %v259_v44 = vrot.slane %v252_v41, %v258_v35 }
  0x82   : > { %293 = vst.msk [vmem:[#allocation2 + $0x3] ss:$2 sm:$0x3] %vm3184_vm1, %v290_v43  ;;  %v266_v45 = vrot.slane %v259_v44, %v258_v35 }
  0x84   : > { %273 = vst.msk [vmem:[#allocation2 + $0x2] ss:$2 sm:$0x3] %vm3184_vm1, %v266_v45 }
  0x89   : > { %v382_v46 = vld [vmem:[#allocation2 + $0x1] ss:$2 sm:$0x7] }
  0x8a   : > { %v372_v47 = vld [vmem:[#allocation2 + $0x1] ss:$2 sm:$0x7]  ;;  %384 = vrot.lane.b32.xlu0 %v382_v46, %s2917_s18 }
  0x8b   : > { %374 = vrot.lane.b32.xlu1 %v372_v47, %s2918_s20  ;;  %v402_v48 = vld [vmem:[#allocation2 + $0x1] ss:$2 sm:$0x7]  ;;  %v294_v53 = vld [vmem:[#allocation2] ss:$2 sm:$0x7] }
  0x8c   : > { %v392_v49 = vld [vmem:[#allocation2 + $0x1] ss:$2 sm:$0x7]  ;;  %v315_v54 = vld [vmem:[#allocation2] ss:$2 sm:$0x7] }
  0x8d   : > { %v423_v50 = vld [vmem:[#allocation2 + $0x3] ss:$2 sm:$0x7]  ;;  %v304_v55 = vld [vmem:[#allocation2] ss:$2 sm:$0x7] }
  0x8e   : > { %404 = vrot.lane.b32.xlu0 %v402_v48, %s2919_s24  ;;  %v413_v51 = vld [vmem:[#allocation2 + $0x3] ss:$2 sm:$0x7]  ;;  %v326_v56 = vld [vmem:[#allocation2] ss:$2 sm:$0x7] }
  0x8f   : > { %394 = vrot.lane.b32.xlu1 %v392_v49, %s2920_s21  ;;  %v433_v52 = vld [vmem:[#allocation2 + $0x3] ss:$2 sm:$0x7]  ;;  %v338_v57 = vld [vmem:[#allocation2 + $0x2] ss:$2 sm:$0x7] }
  0x90   : > { %v349_v58 = vld [vmem:[#allocation2 + $0x2] ss:$2 sm:$0x7]  ;;  %v546_v3 = vld [vmem:[#allocation2 + $0x1] ss:$2 sm:$0x7] }
  0x91   : > { %v360_v59 = vld [vmem:[#allocation2 + $0x2] ss:$2 sm:$0x7]  ;;  %v566_v5 = vld [vmem:[#allocation2 + $0x1] ss:$2 sm:$0x7] }
  0x92   : > { %425 = vrot.lane.b32.xlu0 %v423_v50, %s2921_s23  ;;  %v480_v60 = vld [vmem:[#allocation2] ss:$2 sm:$0x7]  ;;  %v556_v6 = vld [vmem:[#allocation2 + $0x1] ss:$2 sm:$0x7] }
  0x93   : > { %415 = vrot.lane.b32.xlu1 %v413_v51, %s2922_s28  ;;  %v469_v61 = vld [vmem:[#allocation2] ss:$2 sm:$0x7]  ;;  %v586_v7 = vld [vmem:[#allocation2 + $0x3] ss:$2 sm:$0x7] }
  0x94   : > { %v502_v62 = vld [vmem:[#allocation2] ss:$2 sm:$0x7]  ;;  %v576_v8 = vld [vmem:[#allocation2 + $0x1] ss:$2 sm:$0x7] }
  0x95   : > { %v491_v63 = vld [vmem:[#allocation2] ss:$2 sm:$0x7]  ;;  %v606_v9 = vld [vmem:[#allocation2 + $0x3] ss:$2 sm:$0x7] }
  0x96   : > { %296 = vrot.lane.b32.xlu0 %v294_v53, %s2918_s20  ;;  %v524_v1 = vld [vmem:[#allocation2 + $0x2] ss:$2 sm:$0x7]  ;;  %v596_v10 = vld [vmem:[#allocation2 + $0x3] ss:$2 sm:$0x7] }
  0x97   : > { %435 = vrot.lane.b32.xlu1 %v433_v52, %s2923_s22  ;;  %v513_v2 = vld [vmem:[#allocation2 + $0x2] ss:$2 sm:$0x7]  ;;  %s2935_s20 = smov 97  }
  0x98   : > { %v535_v4 = vld [vmem:[#allocation2 + $0x2] ss:$2 sm:$0x7]  ;;  %v720_v17 = vld [vmem:[#allocation2 + $0x1] ss:$2 sm:$0x7] }
  0x99   : > { %v654_v11 = vld [vmem:[#allocation2] ss:$2 sm:$0x7]  ;;  %v740_v19 = vld [vmem:[#allocation2 + $0x1] ss:$2 sm:$0x7] }
  0x9a   : > { %306 = vrot.lane.b32.xlu0 %v304_v55, %s2917_s18  ;;  %v643_v12 = vld [vmem:[#allocation2] ss:$2 sm:$0x7]  ;;  %s2934_s18 = smov 17  }
  0x9b   : > { %317 = vrot.lane.b32.xlu1 %v315_v54, %s2920_s21  ;;  %v676_v13 = vld [vmem:[#allocation2] ss:$2 sm:$0x7]  ;;  %s2937_s21 = smov 81  }
  0x9c   : > { %v665_v14 = vld [vmem:[#allocation2] ss:$2 sm:$0x7]  ;;  %v730_v20 = vld [vmem:[#allocation2 + $0x1] ss:$2 sm:$0x7] }
  0x9d   : > { %v698_v15 = vld [vmem:[#allocation2 + $0x2] ss:$2 sm:$0x7]  ;;  %v760_v21 = vld [vmem:[#allocation2 + $0x3] ss:$2 sm:$0x7] }
  0x9e   : > { %340 = vrot.lane.b32.xlu0 %v338_v57, %s2922_s28  ;;  %v687_v16 = vld [vmem:[#allocation2 + $0x2] ss:$2 sm:$0x7]  ;;  %v750_v22 = vld [vmem:[#allocation2 + $0x1] ss:$2 sm:$0x7] }
  0x9f   : > { %328 = vrot.lane.b32.xlu1 %v326_v56, %s2919_s24  ;;  %s2936_s24 = smov 113   ;;  %v709_v18 = vld [vmem:[#allocation2 + $0x2] ss:$2 sm:$0x7]  ;;  %s2939_s28 = smov 47  }
  0xa0   : > { %v780_v23 = vld [vmem:[#allocation2 + $0x3] ss:$2 sm:$0x7]  ;;  %v964_v26 = vld [vmem:[#allocation2] ss:$2 sm:$0x7] }
  0xa1   : > { %v770_v24 = vld [vmem:[#allocation2 + $0x3] ss:$2 sm:$0x7]  ;;  %v953_v27 = vld [vmem:[#allocation2] ss:$2 sm:$0x7] }
  0xa2   : > { %362 = vrot.lane.b32.xlu0 %v360_v59, %s2923_s22  ;;  %v986_v28 = vld [vmem:[#allocation2 + $0x2] ss:$2 sm:$0x7]  ;;  %s2940_s22 = smov 127  }
  0xa3   : > { %351 = vrot.lane.b32.xlu1 %v349_v58, %s2921_s23  ;;  %s2938_s23 = smov 31   ;;  %v975_v29 = vld [vmem:[#allocation2] ss:$2 sm:$0x7] }
  0xa4   : > { %v1008_v30 = vld [vmem:[#allocation2 + $0x2] ss:$2 sm:$0x7]  ;;  %v1030_v32 = vld [vmem:[#allocation2 + $0x1] ss:$2 sm:$0x7] }
  0xa5   : > { %v997_v31 = vld [vmem:[#allocation2 + $0x2] ss:$2 sm:$0x7]  ;;  %v1050_v34 = vld [vmem:[#allocation2 + $0x1] ss:$2 sm:$0x7] }
  0xa6   : > { %471 = vrot.lane.b32.xlu0 %v469_v61, %s2925_s5  ;;  %v1019_v33 = vld [vmem:[#allocation2 + $0x2] ss:$2 sm:$0x7]  ;;  %v1040_v35 = vld [vmem:[#allocation2 + $0x1] ss:$2 sm:$0x7] }
  0xa7   : > { %482 = vrot.lane.b32.xlu1 %v480_v60, %s2924_s4  ;;  %v1070_v36 = vld [vmem:[#allocation2 + $0x3] ss:$2 sm:$0x7]  ;;  %v1138_v40 = vld [vmem:[#allocation2] ss:$2 sm:$0x7] }
  0xa8   : > { %v1060_v37 = vld [vmem:[#allocation2 + $0x3] ss:$2 sm:$0x7]  ;;  %v1127_v41 = vld [vmem:[#allocation2] ss:$2 sm:$0x7] }
  0xa9   : > { %v1090_v38 = vld [vmem:[#allocation2 + $0x3] ss:$2 sm:$0x7]  ;;  %v1160_v43 = vld [vmem:[#allocation2 + $0x2] ss:$2 sm:$0x7] }
  0xaa   : > { %493 = vrot.lane.b32.xlu0 %v491_v63, %s2927_s8  ;;  %v1080_v39 = vld [vmem:[#allocation2 + $0x3] ss:$2 sm:$0x7]  ;;  %v1149_v44 = vld [vmem:[#allocation2] ss:$2 sm:$0x7] }
  0xab   : > { %504 = vrot.lane.b32.xlu1 %v502_v62, %s2926_s6  ;;  %v1182_v51 = vld [vmem:[#allocation2 + $0x2] ss:$2 sm:$0x7]  ;;  %v1204_v59 = vld [vmem:[#allocation2 + $0x1] ss:$2 sm:$0x7] }
  0xac   : > { %v1171_v52 = vld [vmem:[#allocation2 + $0x2] ss:$2 sm:$0x7] }
  0xad   : > { %v1193_v60 = vld [vmem:[#allocation2 + $0x2] ss:$2 sm:$0x7] }
  0xae   : > { %515 = vrot.lane.b32.xlu0 %v513_v2, %s2929_s10 }
  0xaf   : > { %526 = vrot.lane.b32.xlu1 %v524_v1, %s2928_s9 }
  0xb2   : > { %537 = vrot.lane.b32.xlu0 %v535_v4, %s2930_s11  ;;  %v1224_v4 = vld [vmem:[#allocation2 + $0x1] ss:$2 sm:$0x7] }
  0xb3   : > { %548 = vrot.lane.b32.xlu1 %v546_v3, %s2925_s5  ;;  %s2942_s5 = smov 95  }
  0xb6   : > { %558 = vrot.lane.b32.xlu0 %v556_v6, %s2924_s4  ;;  %s2941_s4 = smov 15  }
  0xb7   : > { %568 = vrot.lane.b32.xlu1 %v566_v5, %s2927_s8  ;;  %s2944_s8 = smov 79   ;;  %v1214_v5 = vld [vmem:[#allocation2 + $0x1] ss:$2 sm:$0x7] }
  0xba   : > { %578 = vrot.lane.b32.xlu0 %v576_v8, %s2926_s6  ;;  %s2943_s6 = smov 111  }
  0xbb   : > { %588 = vrot.lane.b32.xlu1 %v586_v7, %s2929_s10  ;;  %s2946_s10 = smov 46  }
  0xbe   : > { %598 = vrot.lane.b32.xlu0 %v596_v10, %s2928_s9  ;;  %s2945_s9 = smov 30  }
  0xbf   : > { %608 = vrot.lane.b32.xlu1 %v606_v9, %s2930_s11  ;;  %s2947_s11 = smov 126  }
  0xc2   : > { %645 = vrot.lane.b32.xlu0 %v643_v12, %s2932_s29  ;;  %v1244_v12 = vld [vmem:[#allocation2 + $0x3] ss:$2 sm:$0x7] }
  0xc3   : > { %656 = vrot.lane.b32.xlu1 %v654_v11, %s2931_s27 }
  0xc6   : > { %667 = vrot.lane.b32.xlu0 %v665_v14, %s2934_s18  ;;  %v3223_v14 = vsub.s32 0, %v3181_v25 }
  0xc7   : > { %678 = vrot.lane.b32.xlu1 %v676_v13, %s2933_s30  ;;  %v1234_v13 = vld [vmem:[#allocation2 + $0x3] ss:$2 sm:$0x7] }
  0xca   : > { %689 = vrot.lane.b32.xlu0 %v687_v16, %s2936_s24 }
  0xcb   : > { %700 = vrot.lane.b32.xlu1 %v698_v15, %s2935_s20  ;;  %v3226_v15 = vsub.s32 1, %v3181_v25 }
  0xce   : > { %711 = vrot.lane.b32.xlu0 %v709_v18, %s2937_s21  ;;  %v449_v18 = vld [vmem:[#allocation9] ss:$8 sm:$0x3] }
  0xcf   : > { %722 = vrot.lane.b32.xlu1 %v720_v17, %s2932_s29  ;;  %s2949_s29 = smov 94  }
  0xd2   : > { %732 = vrot.lane.b32.xlu0 %v730_v20, %s2931_s27  ;;  %s2948_s27 = smov 14  }
  0xd3   : > { %742 = vrot.lane.b32.xlu1 %v740_v19, %s2934_s18  ;;  %s2951_s18 = smov 78  }
  0xd6   : > { %752 = vrot.lane.b32.xlu0 %v750_v22, %s2933_s30  ;;  %s2950_s30 = smov 110   ;;  %v1264_v22 = vld [vmem:[#allocation2 + $0x3] ss:$2 sm:$0x7] }
  0xd7   : > { %762 = vrot.lane.b32.xlu1 %v760_v21, %s2936_s24  ;;  %s2953_s24 = smov 48  }
  0xda   : > { %772 = vrot.lane.b32.xlu0 %v770_v24, %s2935_s20  ;;  %v3237_v24 = vrot.slane %v449_v18, %v3223_v14  ;;  %s2952_s20 = smov 32  }
  0xdb   : > { %782 = vrot.lane.b32.xlu1 %v780_v23, %s2937_s21  ;;  %v1254_v23 = vld [vmem:[#allocation2 + $0x3] ss:$2 sm:$0x7]  ;;  %s2954_s21 = smov 112  }
  0xde   : > { %955 = vrot.lane.b32.xlu0 %v953_v27, %s2939_s28 }
  0xdf   : > { %966 = vrot.lane.b32.xlu1 %v964_v26, %s2938_s23  ;;  %v3240_v26 = vrot.slane %v449_v18, %v3226_v15 }
  0xe2   : > { %977 = vrot.lane.b32.xlu0 %v975_v29, %s2941_s4 }
  0xe3   : > { %988 = vrot.lane.b32.xlu1 %v986_v28, %s2940_s22 }
  0xe6   : > { %999 = vrot.lane.b32.xlu0 %v997_v31, %s2943_s6  ;;  %v828_v31 = vld [vmem:[#allocation2] ss:$2 sm:$0x7] }
  0xe7   : > { %1010 = vrot.lane.b32.xlu1 %v1008_v30, %s2942_s5 }
  0xea   : > { %1021 = vrot.lane.b32.xlu0 %v1019_v33, %s2944_s8 }
  0xeb   : > { %1032 = vrot.lane.b32.xlu1 %v1030_v32, %s2939_s28  ;;  %s2956_s28 = smov 80  }
  0xee   : > { %1042 = vrot.lane.b32.xlu0 %v1040_v35, %s2938_s23  ;;  %s2955_s23 = smov 16  }
  0xef   : > { %1052 = vrot.lane.b32.xlu1 %v1050_v34, %s2941_s4  ;;  %s2958_s4 = smov 29  }
  0xf2   : > { %1062 = vrot.lane.b32.xlu0 %v1060_v37, %s2940_s22  ;;  %s2957_s22 = smov 96  }
  0xf3   : > { %1072 = vrot.lane.b32.xlu1 %v1070_v36, %s2943_s6  ;;  %v817_v36 = vld [vmem:[#allocation2] ss:$2 sm:$0x7]  ;;  %s2960_s6 = smov 125  }
  0xf6   : > { %1082 = vrot.lane.b32.xlu0 %v1080_v39, %s2942_s5  ;;  %s2959_s5 = smov 45  }
  0xf7   : > { %1092 = vrot.lane.b32.xlu1 %v1090_v38, %s2944_s8  ;;  %s2961_s8 = smov 13  }
  0xfa   : > { %1129 = vrot.lane.b32.xlu0 %v1127_v41, %s2946_s10 }
  0xfb   : > { %1140 = vrot.lane.b32.xlu1 %v1138_v40, %s2945_s9 }
  0xfc   : > { %v385_v45 = vpop.permute.xlu0 %384 }
  0xfd   : > { %v375_v46 = vpop.permute.xlu1 %374  ;;  %v386_v47 = vrot.slane %v385_v45, 1 }
  0xfe   : > { %v376_v48 = vrot.slane %v375_v46, 1  ;;  %1151 = vrot.lane.b32.xlu0 %v1149_v44, %s2948_s27 }
  0xff   : > { %1162 = vrot.lane.b32.xlu1 %v1160_v43, %s2947_s11  ;;  %v387_v49 = vsel %vm309_vm2, %v385_v45, %v386_v47 }
 0x100   : > { %v377_v50 = vsel %vm299_vm3, %v375_v46, %v376_v48  ;;  %390 = vst.msk [vmem:[#allocation3 + $0x10] ss:$8 sm:$0x3] %vm3184_vm1, %v387_v49  ;;  %v405_v53 = vpop.permute.xlu0 %404  ;;  %v854_v48 = vld [vmem:[#allocation2 + $0x2] ss:$2 sm:$0x7] }
 0x101   : > { %380 = vst.msk [vmem:[#allocation3 + $0x7] ss:$8 sm:$0x3] %vm3184_vm1, %v377_v50  ;;  %v395_v54 = vpop.permute.xlu1 %394  ;;  %v406_v55 = vrot.slane %v405_v53, 1 }
 0x102   : > { %v396_v56 = vrot.slane %v395_v54, 1  ;;  %1173 = vrot.lane.b32.xlu0 %v1171_v52, %s2950_s30  ;;  %v839_v49 = vld [vmem:[#allocation2] ss:$2 sm:$0x7] }
 0x103   : > { %1184 = vrot.lane.b32.xlu1 %v1182_v51, %s2949_s29  ;;  %v407_v57 = vsel %vm331_vm4, %v405_v53, %v406_v55 }
 0x104   : > { %v397_v58 = vsel %vm320_vm5, %v395_v54, %v396_v56  ;;  %410 = vst.msk [vmem:[#allocation3 + $0x12] ss:$8 sm:$0x3] %vm3184_vm1, %v407_v57  ;;  %v426_v61 = vpop.permute.xlu0 %425  ;;  %v850_v54 = vld [vmem:[#allocation2 + $0x2] ss:$2 sm:$0x3] }
 0x105   : > { %400 = vst.msk [vmem:[#allocation3 + $0x11] ss:$8 sm:$0x3] %vm3184_vm1, %v397_v58  ;;  %v416_v62 = vpop.permute.xlu1 %415  ;;  %v427_v63 = vrot.slane %v426_v61, 1 }
 0x106   : > { %v417_v1 = vrot.slane %v416_v62, 1  ;;  %1195 = vrot.lane.b32.xlu0 %v1193_v60, %s2951_s18  ;;  %852 = vst.msk [vmem:[#allocation3 + $0x63] ss:$8 sm:$0x3] %vm3184_vm1, %v850_v54 }
 0x107   : > { %1206 = vrot.lane.b32.xlu1 %v1204_v59, %s2946_s10  ;;  %v428_v2 = vsel %vm354_vm6, %v426_v61, %v427_v63  ;;  %v876_v57 = vld [vmem:[#allocation2 + $0x2] ss:$2 sm:$0x7]  ;;  %s2963_s10 = smov 109  }
 0x108   : > { %v418_v3 = vsel %vm343_vm7, %v416_v62, %v417_v1  ;;  %431 = vst.msk [vmem:[#allocation3 + $0x14] ss:$8 sm:$0x3] %vm3184_vm1, %v428_v2  ;;  %v297_v7 = vpop.permute.xlu0 %296  ;;  %v865_v60 = vld [vmem:[#allocation2 + $0x2] ss:$2 sm:$0x7] }
 0x109   : > { %421 = vst.msk [vmem:[#allocation3 + $0x13] ss:$8 sm:$0x3] %vm3184_vm1, %v418_v3  ;;  %v436_v6 = vpop.permute.xlu1 %435  ;;  %v298_v9 = vrot.slane %v297_v7, 1 }
 0x10a   : > { %v437_v8 = vrot.slane %v436_v6, 1  ;;  %1216 = vrot.lane.b32.xlu0 %v1214_v5, %s2945_s9  ;;  %v897_v2 = vld [vmem:[#allocation2 + $0x1] ss:$2 sm:$0x7]  ;;  %s2962_s9 = smov 93  }
 0x10b   : > { %1226 = vrot.lane.b32.xlu1 %v1224_v4, %s2948_s27  ;;  %v300_v11 = vsel %vm299_vm3, %v297_v7, %v298_v9  ;;  %v887_v7 = vld [vmem:[#allocation2 + $0x1] ss:$2 sm:$0x7]  ;;  %vm681_vm3 = vcmask 7168   ;;  %s2440_s27 = sshll.u32 %s3151_s17, 4 }
 0x10c   : > { %v438_v10 = vsel %vm365_vm8, %v436_v6, %v437_v8  ;;  %302 = vst.msk [vmem:[#allocation3] ss:$8 sm:$0x3] %vm3184_vm1, %v300_v11  ;;  %v307_v17 = vpop.permute.xlu0 %306 }
 0x10d   : > { %441 = vst.msk [vmem:[#allocation3 + $0x15] ss:$8 sm:$0x3] %vm3184_vm1, %v438_v10  ;;  %v318_v16 = vpop.permute.xlu1 %317  ;;  %v308_v20 = vrot.slane %v307_v17, 1 }
 0x10e   : > { %v319_v19 = vrot.slane %v318_v16, 1  ;;  %1236 = vrot.lane.b32.xlu0 %v1234_v13, %s2947_s11  ;;  %s2964_s11 = smov 77  }
 0x10f   : > { %1246 = vrot.lane.b32.xlu1 %v1244_v12, %s2950_s30  ;;  %v310_v25 = vsel %vm309_vm2, %v307_v17, %v308_v20  ;;  %v917_v12 = vld [vmem:[#allocation2 + $0x3] ss:$2 sm:$0x3]  ;;  %vm648_vm2 = vcmask 400384   ;;  %s211_s30 = scalar_lea.vmem [#allocation10], %s2440_s27 }
 0x110   : > { %v321_v21 = vsel %vm320_vm5, %v318_v16, %v319_v19  ;;  %313 = vst.msk [vmem:[#allocation3 + $0x1] ss:$8 sm:$0x3] %vm3184_vm1, %v310_v25  ;;  %v341_v28 = vpop.permute.xlu0 %340  ;;  %919 = vst.msk [vmem:[#allocation3 + $0x72] ss:$8 sm:$0x3] %vm3184_vm1, %v917_v12 }
 0x111   : > { %324 = vst.msk [vmem:[#allocation3 + $0x2] ss:$8 sm:$0x3] %vm3184_vm1, %v321_v21  ;;  %v329_v27 = vpop.permute.xlu1 %328  ;;  %v342_v30 = vrot.slane %v341_v28, 1  ;;  %vm703_vm5 = vcmask 793600  }
 0x112   : > { %v330_v29 = vrot.slane %v329_v27, 1  ;;  %1256 = vrot.lane.b32.xlu0 %v1254_v23, %s2949_s29  ;;  %v907_v23 = vld [vmem:[#allocation2 + $0x1] ss:$2 sm:$0x7]  ;;  %s2449_s29 = sshll.u32 %s3007_s16, 8  ;;  %s2965_s16 = smov [#allocation10]  }
 0x113   : > { %1266 = vrot.lane.b32.xlu1 %v1264_v22, %s2951_s18  ;;  %v344_v35 = vsel %vm343_vm7, %v341_v28, %v342_v30  ;;  %v921_v22 = vld [vmem:[#allocation2 + $0x3] ss:$2 sm:$0x7]  ;;  %vm714_vm7 = vcmask 662528   ;;  %s2339_s18 = sshll.u32 %s211_s30, 4  ;;  %s4031_s18 = int_to_ptr.vmem [resolvable:$true] %s2339_s18 }
 0x114   : > { %v447_v32 = vld [vmem:[#allocation3 + $0x10] sm:$0xff]  ;;  %v448_v33 = vld [vmem:[#allocation3 + $0x18] sm:$0xff]  ;;  %v332_v34 = vsel %vm331_vm4, %v329_v27, %v330_v29  ;;  %347 = vst.msk [vmem:[#allocation3 + $0x4] ss:$8 sm:$0x3] %vm3184_vm1, %v344_v35  ;;  %v363_v40 = vpop.permute.xlu0 %362  ;;  %vm670_vm4 = vcmask 138240  }
 0x115   : > { %v3251_v37 = vmul.f32 %v3237_v24, %v447_v32  ;;  %v3254_v38 = vmul.f32 %v3240_v26, %v448_v33  ;;  %335 = vst.msk [vmem:[#allocation3 + $0x3] ss:$8 sm:$0x3] %vm3184_vm1, %v332_v34  ;;  %v352_v39 = vpop.permute.xlu1 %351  ;;  %v364_v43 = vrot.slane %v363_v40, 1 }
 0x116   : > { %v353_v41 = vrot.slane %v352_v39, 1  ;;  %819 = vrot.lane.b32.xlu0 %v817_v36, %s2953_s24 }
 0x117   : > { %467 = vst [vmem:[#allocation3 + $0x10] sm:$0xff] %v3251_v37  ;;  %468 = vst [vmem:[#allocation3 + $0x18] sm:$0xff] %v3254_v38  ;;  %830 = vrot.lane.b32.xlu1 %v828_v31, %s2952_s20  ;;  %v1511_v44 = vand.u32 4294901760, %v3254_v38  ;;  %v1513_v45 = vand.u32 4294901760, %v3251_v37  ;;  %v366_v47 = vsel %vm365_vm8, %v363_v40, %v364_v43  ;;  %vm969_vm8 = vcmask 252928  }
 0x118   : > { %v355_v46 = vsel %vm354_vm6, %v352_v39, %v353_v41  ;;  %369 = vst.msk [vmem:[#allocation3 + $0x6] ss:$8 sm:$0x3] %vm3184_vm1, %v366_v47  ;;  %v472_v51 = vpop.permute.xlu0 %471  ;;  %v941_v41 = vld [vmem:[#allocation2 + $0x3] ss:$2 sm:$0x7] }
 0x119   : > { %358 = vst.msk [vmem:[#allocation3 + $0x5] ss:$8 sm:$0x3] %vm3184_vm1, %v355_v46  ;;  %v483_v50 = vpop.permute.xlu1 %482  ;;  %v3275_v52 = vsub.f32 %v3254_v38, %v1511_v44  ;;  %v3280_v53 = vsub.f32 %v3251_v37, %v1513_v45  ;;  %v473_v56 = vrot.slane %v472_v51, 1  ;;  %vm692_vm6 = vcmask 924672  }
 0x11a   : > { %v484_v55 = vrot.slane %v483_v50, 1  ;;  %841 = vrot.lane.b32.xlu0 %v839_v49, %s2955_s23  ;;  %v931_v43 = vld [vmem:[#allocation2 + $0x3] ss:$2 sm:$0x7] }
 0x11b   : > { %856 = vrot.lane.b32.xlu1 %v854_v48, %s2954_s21  ;;  %v475_v59 = vsel %vm474_vm10, %v472_v51, %v473_v56  ;;  %v1625_v17 = vand.u32 4294901760, %v3275_v52  ;;  %v1631_v18 = vand.u32 4294901760, %v3280_v53  ;;  %v623_v49 = vld [vmem:[#allocation9 + $0x1] ss:$8 sm:$0x3] }
 0x11c   : > { %v486_v58 = vsel %vm485_vm9, %v483_v50, %v484_v55  ;;  %478 = vst.msk [vmem:[#allocation3 + $0x20] ss:$8 sm:$0x3] %vm3184_vm1, %v475_v59  ;;  %v494_v62 = vpop.permute.xlu0 %493 }
 0x11d   : > { %489 = vst.msk [vmem:[#allocation3 + $0x21] ss:$8 sm:$0x3] %vm3184_vm1, %v486_v58  ;;  %v505_v61 = vpop.permute.xlu1 %504  ;;  %v495_v1 = vrot.slane %v494_v62, 1  ;;  %v1626_v33 = vsub.f32 %v3275_v52, %v1625_v17  ;;  %v1632_v34 = vsub.f32 %v3280_v53, %v1631_v18 }
 0x11e   : > { %v506_v63 = vrot.slane %v505_v61, 1  ;;  %867 = vrot.lane.b32.xlu0 %v865_v60, %s2957_s22 }
 0x11f   : > { %878 = vrot.lane.b32.xlu1 %v876_v57, %s2956_s28  ;;  %v497_v6 = vsel %vm496_vm12, %v494_v62, %v495_v1  ;;  %v1627_v56 = vand.u32 4294901760, %v1626_v33  ;;  %v1633_v58 = vand.u32 4294901760, %v1632_v34  ;;  %v1301_v62 = vld [vmem:[#allocation2] ss:$2 sm:$0x7]  ;;  %v3360_v1 = vrot.slane %v623_v49, %v3226_v15 }
 0x120   : > { %v445_v3 = vld [vmem:[#allocation3] sm:$0xff]  ;;  %v446_v4 = vld [vmem:[#allocation3 + $0x8] sm:$0xff]  ;;  %v508_v5 = vsel %vm507_vm11, %v505_v61, %v506_v63  ;;  %500 = vst.msk [vmem:[#allocation3 + $0x22] ss:$8 sm:$0x3] %vm3184_vm1, %v497_v6  ;;  %v516_v11 = vpop.permute.xlu0 %515  ;;  %v3357_v63 = vrot.slane %v623_v49, %v3223_v14 }
 0x121   : > { %v461_v8 = vmul.f32 %v3237_v24, %v445_v3  ;;  %v462_v9 = vmul.f32 %v3240_v26, %v446_v4  ;;  %511 = vst.msk [vmem:[#allocation3 + $0x23] ss:$8 sm:$0x3] %vm3184_vm1, %v508_v5  ;;  %v527_v10 = vpop.permute.xlu1 %526  ;;  %v517_v16 = vrot.slane %v516_v11, 1 }
 0x122   : > { %v528_v13 = vrot.slane %v527_v10, 1  ;;  %889 = vrot.lane.b32.xlu0 %v887_v7, %s2953_s24  ;;  %v1312_v61 = vld [vmem:[#allocation2] ss:$2 sm:$0x7] }
 0x123   : > { %465 = vst [vmem:[#allocation3] sm:$0xff] %v461_v8  ;;  %466 = vst [vmem:[#allocation3 + $0x8] sm:$0xff] %v462_v9  ;;  %899 = vrot.lane.b32.xlu1 %v897_v2, %s2952_s20  ;;  %v1507_v19 = vand.u32 4294901760, %v462_v9  ;;  %v1509_v20 = vand.u32 4294901760, %v461_v8  ;;  %v519_v25 = vsel %vm518_vm14, %v516_v11, %v517_v16 }
 0x124   : > { %v530_v21 = vsel %vm529_vm13, %v527_v10, %v528_v13  ;;  %522 = vst.msk [vmem:[#allocation3 + $0x24] ss:$8 sm:$0x3] %vm3184_vm1, %v519_v25  ;;  %v538_v26 = vpop.permute.xlu0 %537  ;;  %v1323_v13 = vld [vmem:[#allocation2] ss:$2 sm:$0x7] }
 0x125   : > { %533 = vst.msk [vmem:[#allocation3 + $0x25] ss:$8 sm:$0x3] %vm3184_vm1, %v530_v21  ;;  %v549_v24 = vpop.permute.xlu1 %548  ;;  %v3316_v27 = vpack.c.bf16 %v1511_v44, %v1507_v19  ;;  %v3318_v28 = vsub.f32 %v462_v9, %v1507_v19  ;;  %v3322_v29 = vpack.c.bf16 %v1513_v45, %v1509_v20  ;;  %v3324_v30 = vsub.f32 %v461_v8, %v1509_v20  ;;  %v1334_v8 = vld [vmem:[#allocation2 + $0x2] ss:$2 sm:$0x7] }
 0x126   : > { %v550_v31 = vrot.slane %v549_v24, 1  ;;  %v539_v32 = vrot.slane %v538_v26, 1  ;;  %909 = vrot.lane.b32.xlu0 %v907_v23, %s2955_s23  ;;  %v1356_v25 = vld [vmem:[#allocation2 + $0x2] ss:$2 sm:$0x7]  ;;  %s2325_s23 = scalar_lea.sflag [#allocation6], %s3151_s17 }
 0x127   : > { %923 = vrot.lane.b32.xlu1 %v921_v22, %s2954_s21  ;;  %v1613_v35 = vand.u32 4294901760, %v3318_v28  ;;  %v1619_v36 = vand.u32 4294901760, %v3324_v30  ;;  %2451 = vmatprep.subr.bf16.mxu1 %v3316_v27  ;;  %s4029_s21 = scalar_lea.hbm %s4076_s3, %s2449_s29 }
 0x128   : > { %v551_v39 = vsel %vm474_vm10, %v549_v24, %v550_v31  ;;  %v541_v40 = vsel %vm540_vm15, %v538_v26, %v539_v32  ;;  %2535 = vmatprep.subr.bf16.mxu0 %v3316_v27  ;;  %v559_v45 = vpop.permute.xlu0 %558  ;;  %2453 = vmatpush1.bf16.msra.mxu1 %v3322_v29  ;;  %v1345_v31 = vld [vmem:[#allocation2 + $0x2] ss:$2 sm:$0x7]  ;;  %vm991_vm10 = vcmask 1039360  }
 0x129   : > { %554 = vst.msk [vmem:[#allocation3 + $0x27] ss:$8 sm:$0x3] %vm3184_vm1, %v551_v39  ;;  %544 = vst.msk [vmem:[#allocation3 + $0x26] ss:$8 sm:$0x3] %vm3184_vm1, %v541_v40  ;;  %v569_v44 = vpop.permute.xlu1 %568  ;;  %2537 = vmatpush1.bf16.msra.mxu0 %v3322_v29  ;;  %v1614_v46 = vsub.f32 %v3318_v28, %v1613_v35  ;;  %v3347_v47 = vpack.c.bf16 %v1625_v17, %v1613_v35  ;;  %v1620_v48 = vsub.f32 %v3324_v30, %v1619_v36 }
 0x12a   : > { %v570_v50 = vrot.slane %v569_v44, 1  ;;  %v560_v51 = vrot.slane %v559_v45, 1  ;;  %v3350_v54 = vpack.c.bf16 %v1631_v18, %v1619_v36  ;;  %933 = vrot.lane.b32.xlu0 %v931_v43, %s2957_s22  ;;  %v1378_v40 = vld [vmem:[#allocation2 + $0x1] ss:$2 sm:$0x7]  ;;  %s2844_s22 = sshll.u32 %s2965_s16, 4  ;;  %s2845_s22 = int_to_ptr.vmem [resolvable:$false] %s2844_s22 }
 0x12b   : > { %943 = vrot.lane.b32.xlu1 %v941_v41, %s2956_s28  ;;  %v1615_v55 = vand.u32 4294901760, %v1614_v46  ;;  %v1621_v57 = vand.u32 4294901760, %v1620_v48  ;;  %s2840_s28 = scalar_lea.vmem %s4031_s18, 256  ;;  %p2847_p8 = scmp.lt.s32.totalorder %s4031_s18, %s2845_s22 }
 0x12c   : > { %v571_v59 = vsel %vm496_vm12, %v569_v44, %v570_v50  ;;  %v561_v60 = vsel %vm485_vm9, %v559_v45, %v560_v51  ;;  %v579_v3 = vpop.permute.xlu0 %578  ;;  %v1367_v44 = vld [vmem:[#allocation2 + $0x2] ss:$2 sm:$0x7]  ;;  %v1398_v50 = vld [vmem:[#allocation2 + $0x1] ss:$2 sm:$0x7]  ;;  %p2841_p2 = scmp.ne.s32.totalorder %s4031_s18, %s2840_s28 }
 0x12d   : > { %574 = vst.msk [vmem:[#allocation3 + $0x31] ss:$8 sm:$0x3] %vm3184_vm1, %v571_v59  ;;  %564 = vst.msk [vmem:[#allocation3 + $0x30] ss:$8 sm:$0x3] %vm3184_vm1, %v561_v60  ;;  %v589_v2 = vpop.permute.xlu1 %588  ;;  %v3366_v4 = vpack.c.bf16 %v1627_v56, %v1615_v55  ;;  %v3368_v5 = vpack.c.bf16 %v1633_v58, %v1621_v57 }
 0x12e   : > { %v590_v6 = vrot.slane %v589_v2, 1  ;;  %v580_v7 = vrot.slane %v579_v3, 1  ;;  %1303 = vrot.lane.b32.xlu0 %v1301_v62, %s2959_s5  ;;  %v1388_v58 = vld [vmem:[#allocation2 + $0x1] ss:$2 sm:$0x7]  ;;  %vm958_vm9 = vcmask 384000   ;;  %p2842_p1 = pnand %p2841_p2, %p3105_p6 }
 0x12f   : > { %1314 = vrot.lane.b32.xlu1 %v1312_v61, %s2958_s4  ;;  %vm1013_vm12 = vcmask 777216  }
 0x130   : > { %v618_v9 = vld [vmem:[#allocation3 + $0x20] sm:$0xff]  ;;  %v619_v10 = vld [vmem:[#allocation3 + $0x28] sm:$0xff]  ;;  %v591_v11 = vsel %vm518_vm14, %v589_v2, %v590_v6  ;;  %v581_v12 = vsel %vm507_vm11, %v579_v3, %v580_v7  ;;  %v599_v19 = vpop.permute.xlu0 %598  ;;  %vm980_vm11 = vcmask 121856   ;;  %vm1024_vm14 = vcmask 646144   ;;  %p2843_p4 = pneg %p2842_p1 }
 0x131   : > { %v3375_v16 = vmul.f32 %v3357_v63, %v618_v9  ;;  %v3378_v17 = vmul.f32 %v3360_v1, %v619_v10  ;;  %594 = vst.msk [vmem:[#allocation3 + $0x33] ss:$8 sm:$0x3] %vm3184_vm1, %v591_v11  ;;  %584 = vst.msk [vmem:[#allocation3 + $0x32] ss:$8 sm:$0x3] %vm3184_vm1, %v581_v12  ;;  %v609_v18 = vpop.permute.xlu1 %608 }
 0x132   : > { %v610_v20 = vrot.slane %v609_v18, 1  ;;  %v600_v21 = vrot.slane %v599_v19, 1  ;;  %1325 = vrot.lane.b32.xlu0 %v1323_v13, %s2961_s8  ;;  %v1408_v11 = vld [vmem:[#allocation2 + $0x3] ss:$2 sm:$0x7] }
 0x133   : > { %639 = vst [vmem:[#allocation3 + $0x20] sm:$0xff] %v3375_v16  ;;  %640 = vst [vmem:[#allocation3 + $0x28] sm:$0xff] %v3378_v17  ;;  %1336 = vrot.lane.b32.xlu1 %v1334_v8, %s2960_s6  ;;  %v1515_v22 = vand.u32 4294901760, %v3378_v17  ;;  %v1517_v23 = vand.u32 4294901760, %v3375_v16 }
 0x134   : > { %v611_v24 = vsel %vm540_vm15, %v609_v18, %v610_v20  ;;  %v601_v26 = vsel %vm529_vm13, %v599_v19, %v600_v21  ;;  %v646_v33 = vpop.permute.xlu0 %645  ;;  %vm1002_vm13 = vcmask 908288   ;;  %vm1143_vm15 = vcmask 244736  }
 0x135   : > { %614 = vst.msk [vmem:[#allocation3 + $0x35] ss:$8 sm:$0x3] %vm3184_vm1, %v611_v24  ;;  %604 = vst.msk [vmem:[#allocation3 + $0x34] ss:$8 sm:$0x3] %vm3184_vm1, %v601_v26  ;;  %v657_v32 = vpop.permute.xlu1 %656  ;;  %v3399_v34 = vsub.f32 %v3378_v17, %v1515_v22  ;;  %v3404_v35 = vsub.f32 %v3375_v16, %v1517_v23 }
 0x136   : > { %v658_v36 = vrot.slane %v657_v32, 1  ;;  %v647_v39 = vrot.slane %v646_v33, 1  ;;  %1347 = vrot.lane.b32.xlu0 %v1345_v31, %s2963_s10 }
 0x137   : > { %1358 = vrot.lane.b32.xlu1 %v1356_v25, %s2962_s9  ;;  %v1637_v6 = vand.u32 4294901760, %v3399_v34  ;;  %v1643_v7 = vand.u32 4294901760, %v3404_v35 }
 0x138   : > { %v660_v41 = vsel %vm659_vm0, %v657_v32, %v658_v36  ;;  %v649_v43 = vsel %vm648_vm2, %v646_v33, %v647_v39  ;;  %v668_v46 = vpop.permute.xlu0 %667  ;;  %v1438_v36 = vld [vmem:[#allocation2 + $0x3] ss:$2 sm:$0x7] }
 0x139   : > { %663 = vst.msk [vmem:[#allocation3 + $0x41] ss:$8 sm:$0x3] %vm3184_vm1, %v660_v41  ;;  %652 = vst.msk [vmem:[#allocation3 + $0x40] ss:$8 sm:$0x3] %vm3184_vm1, %v649_v43  ;;  %v679_v45 = vpop.permute.xlu1 %678  ;;  %v1638_v26 = vsub.f32 %v3399_v34, %v1637_v6  ;;  %v1644_v31 = vsub.f32 %v3404_v35, %v1643_v7 }
 0x13a   : > { %v680_v48 = vrot.slane %v679_v45, 1  ;;  %v669_v49 = vrot.slane %v668_v46, 1  ;;  %1369 = vrot.lane.b32.xlu0 %v1367_v44, %s2964_s11  ;;  %v1428_v39 = vld [vmem:[#allocation2 + $0x3] ss:$2 sm:$0x7] }
 0x13b   : > { %1380 = vrot.lane.b32.xlu1 %v1378_v40, %s2959_s5 }
 0x13c   : > { %v620_v51 = vld [vmem:[#allocation3 + $0x30] sm:$0xff]  ;;  %v621_v55 = vld [vmem:[#allocation3 + $0x38] sm:$0xff]  ;;  %v682_v56 = vsel %vm681_vm3, %v679_v45, %v680_v48  ;;  %v671_v57 = vsel %vm670_vm4, %v668_v46, %v669_v49  ;;  %v690_v62 = vpop.permute.xlu0 %689 }
 0x13d   : > { %v637_v59 = vmul.f32 %v3357_v63, %v620_v51  ;;  %v638_v60 = vmul.f32 %v3360_v1, %v621_v55  ;;  %685 = vst.msk [vmem:[#allocation3 + $0x43] ss:$8 sm:$0x3] %vm3184_vm1, %v682_v56  ;;  %674 = vst.msk [vmem:[#allocation3 + $0x42] ss:$8 sm:$0x3] %vm3184_vm1, %v671_v57  ;;  %v701_v61 = vpop.permute.xlu1 %700 }
 0x13e   : > { %v702_v2 = vrot.slane %v701_v61, 1  ;;  %v691_v3 = vrot.slane %v690_v62, 1  ;;  %1390 = vrot.lane.b32.xlu0 %v1388_v58, %s2958_s4  ;;  %v1418_v63 = vld [vmem:[#allocation2 + $0x3] ss:$2 sm:$0x7]  ;;  %v1639_v51 = vand.u32 4294901760, %v1638_v26 }
 0x13f   : > { %641 = vst [vmem:[#allocation3 + $0x30] sm:$0xff] %v637_v59  ;;  %642 = vst [vmem:[#allocation3 + $0x38] sm:$0xff] %v638_v60  ;;  %1400 = vrot.lane.b32.xlu1 %v1398_v50, %s2961_s8  ;;  %v1519_v1 = vand.u32 4294901760, %v638_v60  ;;  %v1521_v8 = vand.u32 4294901760, %v637_v59  ;;  %v1645_v56 = vand.u32 4294901760, %v1644_v31  ;;  %s2846_s4 = scalar_lea.vmem %s2845_s22, 512 }
 0x140   : > { %v704_v9 = vsel %vm703_vm5, %v701_v61, %v702_v2  ;;  %v693_v10 = vsel %vm692_vm6, %v690_v62, %v691_v3  ;;  %v712_v13 = vpop.permute.xlu0 %711  ;;  %v797_v46 = vld [vmem:[#allocation9 + $0x2] ss:$8 sm:$0x3]  ;;  %p2848_p12 = scmp.lt.s32.totalorder %s2846_s4, %s2840_s28 }
 0x141   : > { %707 = vst.msk [vmem:[#allocation3 + $0x45] ss:$8 sm:$0x3] %vm3184_vm1, %v704_v9  ;;  %696 = vst.msk [vmem:[#allocation3 + $0x44] ss:$8 sm:$0x3] %vm3184_vm1, %v693_v10  ;;  %v723_v12 = vpop.permute.xlu1 %722  ;;  %v3436_v18 = vpack.c.bf16 %v1519_v1, %v1515_v22  ;;  %v3438_v19 = vsub.f32 %v638_v60, %v1519_v1  ;;  %v3442_v20 = vpack.c.bf16 %v1521_v8, %v1517_v23 }
 0x142   : > { %v3444_v21 = vsub.f32 %v637_v59, %v1521_v8  ;;  %v724_v25 = vrot.slane %v723_v12, 1  ;;  %v713_v24 = vrot.slane %v712_v13, 1  ;;  %1410 = vrot.lane.b32.xlu0 %v1408_v11, %s2960_s6  ;;  %v802_v60 = vrot.slane %v797_v46, %v3223_v14  ;;  %p2849_p3 = por %p2848_p12, %p2847_p8 }
 0x143   : > { %1420 = vrot.lane.b32.xlu1 %v1418_v63, %s2963_s10  ;;  %v1649_v17 = vand.u32 4294901760, %v3438_v19  ;;  %2455 = vmatprep.subr.bf16.mxu1 %v3436_v18  ;;  %v806_v61 = vrot.slane %v797_v46, %v3226_v15 }
 0x144   : > { %v1655_v22 = vand.u32 4294901760, %v3444_v21  ;;  %v725_v32 = vsel %vm648_vm2, %v723_v12, %v724_v25  ;;  %v715_v33 = vsel %vm714_vm7, %v712_v13, %v713_v24  ;;  %2539 = vmatprep.subr.bf16.mxu0 %v3436_v18  ;;  %v733_v41 = vpop.permute.xlu0 %732  ;;  %2457 = vmatpush1.bf16.msra.mxu1 %v3442_v20  ;;  %vm1165_vm2 = vcmask 1031168   ;;  %p2850_p7 = pnand %p2849_p3, %p2843_p4 }
 0x145   : > { %728 = vst.msk [vmem:[#allocation3 + $0x47] ss:$8 sm:$0x3] %vm3184_vm1, %v725_v32  ;;  %718 = vst.msk [vmem:[#allocation3 + $0x46] ss:$8 sm:$0x3] %vm3184_vm1, %v715_v33  ;;  %v743_v40 = vpop.permute.xlu1 %742  ;;  %2541 = vmatpush1.bf16.msra.mxu0 %v3442_v20  ;;  %v1650_v43 = vsub.f32 %v3438_v19, %v1649_v17  ;;  %v3467_v44 = vpack.c.bf16 %v1649_v17, %v1637_v6 }
 0x146   : > { %v1656_v45 = vsub.f32 %v3444_v21, %v1655_v22  ;;  %v744_v48 = vrot.slane %v743_v40, 1  ;;  %v734_v49 = vrot.slane %v733_v41, 1  ;;  %v3470_v50 = vpack.c.bf16 %v1655_v22, %v1643_v7  ;;  %1430 = vrot.lane.b32.xlu0 %v1428_v39, %s2962_s9 }
 0x147   : > { %1440 = vrot.lane.b32.xlu1 %v1438_v36, %s2964_s11  ;;  %v1651_v55 = vand.u32 4294901760, %v1650_v43 }
 0x148   : > { %v1657_v57 = vand.u32 4294901760, %v1656_v45  ;;  %v745_v58 = vsel %vm670_vm4, %v743_v40, %v744_v48  ;;  %v735_v59 = vsel %vm659_vm0, %v733_v41, %v734_v49  ;;  %v753_v2 = vpop.permute.xlu0 %752  ;;  %vm1132_vm0 = vcmask 375808  }
 0x149   : > { %748 = vst.msk [vmem:[#allocation3 + $0x51] ss:$8 sm:$0x3] %vm3184_vm1, %v745_v58  ;;  %738 = vst.msk [vmem:[#allocation3 + $0x50] ss:$8 sm:$0x3] %vm3184_vm1, %v735_v59  ;;  %v763_v62 = vpop.permute.xlu1 %762  ;;  %v3482_v3 = vpack.c.bf16 %v1651_v55, %v1639_v51 }
 0x14a   : > { %v3484_v6 = vpack.c.bf16 %v1657_v57, %v1645_v56  ;;  %v764_v7 = vrot.slane %v763_v62, 1  ;;  %v754_v63 = vrot.slane %v753_v2, 1  ;;  %vm1187_vm4 = vcmask 769024  }
 0x14c   : > { %v792_v1 = vld [vmem:[#allocation3 + $0x40] sm:$0xff]  ;;  %v793_v8 = vld [vmem:[#allocation3 + $0x48] sm:$0xff]  ;;  %v765_v9 = vsel %vm692_vm6, %v763_v62, %v764_v7  ;;  %v755_v10 = vsel %vm681_vm3, %v753_v2, %v754_v63  ;;  %v773_v25 = vpop.permute.xlu0 %772  ;;  %vm1154_vm3 = vcmask 113664   ;;  %vm1198_vm6 = vcmask 637952  }
 0x14d   : > { %v3488_v11 = vmul.f32 %v802_v60, %v792_v1  ;;  %v810_v12 = vmul.f32 %v806_v61, %v793_v8  ;;  %768 = vst.msk [vmem:[#allocation3 + $0x53] ss:$8 sm:$0x3] %vm3184_vm1, %v765_v9  ;;  %758 = vst.msk [vmem:[#allocation3 + $0x52] ss:$8 sm:$0x3] %vm3184_vm1, %v755_v10  ;;  %v783_v13 = vpop.permute.xlu1 %782 }
 0x14e   : > { %v784_v24 = vrot.slane %v783_v13, 1  ;;  %v774_v26 = vrot.slane %v773_v25, 1 }
 0x14f   : > { %813 = vst [vmem:[#allocation3 + $0x40] sm:$0xff] %v3488_v11  ;;  %814 = vst [vmem:[#allocation3 + $0x48] sm:$0xff] %v810_v12  ;;  %v1523_v31 = vand.u32 4294901760, %v810_v12  ;;  %v1525_v17 = vand.u32 4294901760, %v3488_v11 }
 0x150   : > { %v785_v22 = vsel %vm714_vm7, %v783_v13, %v784_v24  ;;  %v775_v32 = vsel %vm703_vm5, %v773_v25, %v774_v26  ;;  %v956_v36 = vpop.permute.xlu0 %955  ;;  %vm1176_vm5 = vcmask 900096   ;;  %vm833_vm7 = vcmask 261120  }
 0x151   : > { %788 = vst.msk [vmem:[#allocation3 + $0x55] ss:$8 sm:$0x3] %vm3184_vm1, %v785_v22  ;;  %778 = vst.msk [vmem:[#allocation3 + $0x54] ss:$8 sm:$0x3] %vm3184_vm1, %v775_v32  ;;  %v967_v33 = vpop.permute.xlu1 %966  ;;  %v3502_v39 = vsub.f32 %v810_v12, %v1523_v31  ;;  %v3505_v40 = vsub.f32 %v3488_v11, %v1525_v17 }
 0x152   : > { %v968_v41 = vrot.slane %v967_v33, 1  ;;  %v957_v43 = vrot.slane %v956_v36, 1 }
 0x153   : > { %4121 = vst [vmem:[#allocation14_spill] sm:$0xff] %v3505_v40  ;;  %v1661_v9 = vand.u32 4294901760, %v3502_v39  ;;  %v1667_v10 = vand.u32 4294901760, %v3505_v40 }
 0x154   : > { %v970_v45 = vsel %vm969_vm8, %v967_v33, %v968_v41  ;;  %v959_v46 = vsel %vm958_vm9, %v956_v36, %v957_v43  ;;  %v978_v49 = vpop.permute.xlu0 %977 }
 0x155   : > { %973 = vst.msk [vmem:[#allocation3 + $0x81] ss:$8 sm:$0x3] %vm3184_vm1, %v970_v45  ;;  %962 = vst.msk [vmem:[#allocation3 + $0x80] ss:$8 sm:$0x3] %vm3184_vm1, %v959_v46  ;;  %v989_v48 = vpop.permute.xlu1 %988  ;;  %v1662_v41 = vsub.f32 %v3502_v39, %v1661_v9  ;;  %v1668_v43 = vsub.f32 %v3505_v40, %v1667_v10 }
 0x156   : > { %v990_v51 = vrot.slane %v989_v48, 1  ;;  %v979_v55 = vrot.slane %v978_v49, 1 }
 0x158   : > { %v794_v56 = vld [vmem:[#allocation3 + $0x50] sm:$0xff]  ;;  %v795_v57 = vld [vmem:[#allocation3 + $0x58] sm:$0xff]  ;;  %v992_v58 = vsel %vm991_vm10, %v989_v48, %v990_v51  ;;  %v981_v59 = vsel %vm980_vm11, %v978_v49, %v979_v55  ;;  %v1000_v63 = vpop.permute.xlu0 %999 }
 0x159   : > { %v811_v62 = vmul.f32 %v802_v60, %v794_v56  ;;  %v812_v2 = vmul.f32 %v806_v61, %v795_v57  ;;  %995 = vst.msk [vmem:[#allocation3 + $0x83] ss:$8 sm:$0x3] %vm3184_vm1, %v992_v58  ;;  %984 = vst.msk [vmem:[#allocation3 + $0x82] ss:$8 sm:$0x3] %vm3184_vm1, %v981_v59  ;;  %v1011_v7 = vpop.permute.xlu1 %1010 }
 0x15a   : > { %v1012_v1 = vrot.slane %v1011_v7, 1  ;;  %v1001_v8 = vrot.slane %v1000_v63, 1 }
 0x15b   : > { %815 = vst [vmem:[#allocation3 + $0x50] sm:$0xff] %v811_v62  ;;  %816 = vst [vmem:[#allocation3 + $0x58] sm:$0xff] %v812_v2  ;;  %v1527_v60 = vand.u32 4294901760, %v812_v2  ;;  %v1529_v61 = vand.u32 4294901760, %v811_v62 }
 0x15c   : > { %v1014_v11 = vsel %vm1013_vm12, %v1011_v7, %v1012_v1  ;;  %v1003_v12 = vsel %vm1002_vm13, %v1000_v63, %v1001_v8  ;;  %v1022_v25 = vpop.permute.xlu0 %1021  ;;  %v1663_v63 = vand.u32 4294901760, %v1662_v41  ;;  %v1669_v8 = vand.u32 4294901760, %v1668_v43 }
 0x15d   : > { %1017 = vst.msk [vmem:[#allocation3 + $0x85] ss:$8 sm:$0x3] %vm3184_vm1, %v1014_v11  ;;  %1006 = vst.msk [vmem:[#allocation3 + $0x84] ss:$8 sm:$0x3] %vm3184_vm1, %v1003_v12  ;;  %v1033_v13 = vpop.permute.xlu1 %1032  ;;  %v3527_v24 = vpack.c.bf16 %v1527_v60, %v1523_v31  ;;  %v3529_v26 = vsub.f32 %v812_v2, %v1527_v60  ;;  %v3531_v22 = vpack.c.bf16 %v1529_v61, %v1525_v17 }
 0x15e   : > { %v3533_v32 = vsub.f32 %v811_v62, %v1529_v61  ;;  %v1034_v33 = vrot.slane %v1033_v13, 1  ;;  %v1023_v36 = vrot.slane %v1022_v25, 1  ;;  %v1107_v62 = vld [vmem:[#allocation9 + $0x4] ss:$8 sm:$0x3] }
 0x15f   : > { %4122 = vst [vmem:[#allocation15_spill] sm:$0xff] %v3531_v22  ;;  %2459 = vmatprep.subr.bf16.mxu1 %v3527_v24  ;;  %2543 = vmatprep.subr.bf16.mxu0 %v3527_v24  ;;  %v1673_v45 = vand.u32 4294901760, %v3529_v26  ;;  %v1112_v12 = vrot.slane %v1107_v62, %v3223_v14 }
 0x160   : > { %4123 = vst [vmem:[#allocation16_spill] sm:$0xff] %v3533_v32  ;;  %v1679_v31 = vand.u32 4294901760, %v3533_v32  ;;  %v1035_v48 = vsel %vm958_vm9, %v1033_v13, %v1034_v33  ;;  %v1025_v49 = vsel %vm1024_vm14, %v1022_v25, %v1023_v36  ;;  %2461 = vmatpush1.bf16.msra.mxu1 %v3531_v22  ;;  %2545 = vmatpush1.bf16.msra.mxu0 %v3531_v22  ;;  %v1043_v55 = vpop.permute.xlu0 %1042  ;;  %vm859_vm9 = vcmask 916480  }
 0x161   : > { %1038 = vst.msk [vmem:[#allocation3 + $0x87] ss:$8 sm:$0x3] %vm3184_vm1, %v1035_v48  ;;  %1028 = vst.msk [vmem:[#allocation3 + $0x86] ss:$8 sm:$0x3] %vm3184_vm1, %v1025_v49  ;;  %v1053_v51 = vpop.permute.xlu1 %1052  ;;  %v1674_v56 = vsub.f32 %v3529_v26, %v1673_v45  ;;  %v3554_v57 = vpack.c.bf16 %v1673_v45, %v1661_v9  ;;  %v1116_v9 = vrot.slane %v1107_v62, %v3226_v15 }
 0x162   : > { %v1680_v58 = vsub.f32 %v3533_v32, %v1679_v31  ;;  %v3557_v59 = vpack.c.bf16 %v1679_v31, %v1667_v10  ;;  %v1054_v2 = vrot.slane %v1053_v51, 1  ;;  %v1044_v7 = vrot.slane %v1043_v55, 1 }
 0x163   : > { %v1675_v1 = vand.u32 4294901760, %v1674_v56 }
 0x164   : > { %v1681_v60 = vand.u32 4294901760, %v1680_v58  ;;  %v1055_v61 = vsel %vm980_vm11, %v1053_v51, %v1054_v2  ;;  %v1045_v11 = vsel %vm969_vm8, %v1043_v55, %v1044_v7  ;;  %v1063_v13 = vpop.permute.xlu0 %1062  ;;  %vm822_vm8 = vcmask 392192  }
 0x165   : > { %1058 = vst.msk [vmem:[#allocation3 + $0x91] ss:$8 sm:$0x3] %vm3184_vm1, %v1055_v61  ;;  %1048 = vst.msk [vmem:[#allocation3 + $0x90] ss:$8 sm:$0x3] %vm3184_vm1, %v1045_v11  ;;  %v1073_v10 = vpop.permute.xlu1 %1072  ;;  %v3567_v25 = vpack.c.bf16 %v1675_v1, %v1663_v63 }
 0x166   : > { %v3569_v33 = vpack.c.bf16 %v1681_v60, %v1669_v8  ;;  %v1074_v36 = vrot.slane %v1073_v10, 1  ;;  %v1064_v41 = vrot.slane %v1063_v13, 1  ;;  %vm881_vm11 = vcmask 654336  }
 0x168   : > { %v1102_v43 = vld [vmem:[#allocation3 + $0x80] sm:$0xff]  ;;  %v1103_v45 = vld [vmem:[#allocation3 + $0x88] sm:$0xff]  ;;  %v1075_v31 = vsel %vm1002_vm13, %v1073_v10, %v1074_v36  ;;  %v1065_v48 = vsel %vm991_vm10, %v1063_v13, %v1064_v41  ;;  %v1083_v56 = vpop.permute.xlu0 %1082  ;;  %vm844_vm10 = vcmask 130048   ;;  %vm1317_vm13 = vcmask 236544  }
 0x169   : > { %v3573_v49 = vmul.f32 %v1112_v12, %v1102_v43  ;;  %v3575_v51 = vmul.f32 %v1116_v9, %v1103_v45  ;;  %1078 = vst.msk [vmem:[#allocation3 + $0x93] ss:$8 sm:$0x3] %vm3184_vm1, %v1075_v31  ;;  %1068 = vst.msk [vmem:[#allocation3 + $0x92] ss:$8 sm:$0x3] %vm3184_vm1, %v1065_v48  ;;  %v1093_v55 = vpop.permute.xlu1 %1092 }
 0x16a   : > { %v1094_v58 = vrot.slane %v1093_v55, 1  ;;  %v1084_v62 = vrot.slane %v1083_v56, 1 }
 0x16b   : > { %1123 = vst [vmem:[#allocation3 + $0x80] sm:$0xff] %v3573_v49  ;;  %1124 = vst [vmem:[#allocation3 + $0x88] sm:$0xff] %v3575_v51  ;;  %v4087_v61 = vand.u32 4294901760, %v3575_v51  ;;  %v4083_v11 = vand.u32 4294901760, %v3573_v49 }
 0x16c   : > { %v1095_v2 = vsel %vm1024_vm14, %v1093_v55, %v1094_v58  ;;  %v1085_v7 = vsel %vm1013_vm12, %v1083_v56, %v1084_v62  ;;  %v1130_v1 = vpop.permute.xlu0 %1129  ;;  %vm870_vm12 = vcmask 785408   ;;  %vm1306_vm14 = vcmask 367616  }
 0x16d   : > { %1098 = vst.msk [vmem:[#allocation3 + $0x95] ss:$8 sm:$0x3] %vm3184_vm1, %v1095_v2  ;;  %1088 = vst.msk [vmem:[#allocation3 + $0x94] ss:$8 sm:$0x3] %vm3184_vm1, %v1085_v7  ;;  %v1141_v63 = vpop.permute.xlu1 %1140  ;;  %v3600_v31 = vsub.f32 %v3575_v51, %v4087_v61  ;;  %v3605_v48 = vsub.f32 %v3573_v49, %v4083_v11 }
 0x16e   : > { %v1142_v8 = vrot.slane %v1141_v63, 1  ;;  %v1131_v60 = vrot.slane %v1130_v1, 1 }
 0x16f   : > { %4124 = vst [vmem:[#allocation17_spill] sm:$0xff] %v3600_v31  ;;  %4125 = vst [vmem:[#allocation18_spill] sm:$0xff] %v3605_v48 }
 0x170   : > { %v1144_v10 = vsel %vm1143_vm15, %v1141_v63, %v1142_v8  ;;  %v1133_v13 = vsel %vm1132_vm0, %v1130_v1, %v1131_v60  ;;  %v1152_v41 = vpop.permute.xlu0 %1151 }
 0x171   : > { %1147 = vst.msk [vmem:[#allocation3 + $0xa1] ss:$8 sm:$0x3] %vm3184_vm1, %v1144_v10  ;;  %1136 = vst.msk [vmem:[#allocation3 + $0xa0] ss:$8 sm:$0x3] %vm3184_vm1, %v1133_v13  ;;  %v1163_v36 = vpop.permute.xlu1 %1162 }
 0x172   : > { %v1164_v43 = vrot.slane %v1163_v36, 1  ;;  %v1153_v45 = vrot.slane %v1152_v41, 1  ;;  %v1709_v10 = vand.u32 4294901760, %v3600_v31  ;;  %v1715_v13 = vand.u32 4294901760, %v3605_v48 }
 0x174   : > { %v1104_v55 = vld [vmem:[#allocation3 + $0x90] sm:$0xff]  ;;  %v1105_v56 = vld [vmem:[#allocation3 + $0x98] sm:$0xff]  ;;  %v1166_v58 = vsel %vm1165_vm2, %v1163_v36, %v1164_v43  ;;  %v1155_v62 = vsel %vm1154_vm3, %v1152_v41, %v1153_v45  ;;  %v1174_v1 = vpop.permute.xlu0 %1173 }
 0x175   : > { %v3609_v2 = vmul.f32 %v1112_v12, %v1104_v55  ;;  %v3611_v7 = vmul.f32 %v1116_v9, %v1105_v56  ;;  %1169 = vst.msk [vmem:[#allocation3 + $0xa3] ss:$8 sm:$0x3] %vm3184_vm1, %v1166_v58  ;;  %1158 = vst.msk [vmem:[#allocation3 + $0xa2] ss:$8 sm:$0x3] %vm3184_vm1, %v1155_v62  ;;  %v1185_v63 = vpop.permute.xlu1 %1184 }
 0x176   : > { %v1186_v8 = vrot.slane %v1185_v63, 1  ;;  %v1175_v60 = vrot.slane %v1174_v1, 1 }
 0x177   : > { %1125 = vst [vmem:[#allocation3 + $0x90] sm:$0xff] %v3609_v2  ;;  %1126 = vst [vmem:[#allocation3 + $0x98] sm:$0xff] %v3611_v7  ;;  %v4084_v12 = vand.u32 4294901760, %v3611_v7  ;;  %v4082_v9 = vand.u32 4294901760, %v3609_v2 }
 0x178   : > { %v1188_v36 = vsel %vm1187_vm4, %v1185_v63, %v1186_v8  ;;  %v1177_v41 = vsel %vm1176_vm5, %v1174_v1, %v1175_v60  ;;  %v1196_v45 = vpop.permute.xlu0 %1195  ;;  %v1710_v63 = vsub.f32 %v3600_v31, %v1709_v10  ;;  %v1716_v1 = vsub.f32 %v3605_v48, %v1715_v13 }
 0x179   : > { %1191 = vst.msk [vmem:[#allocation3 + $0xa5] ss:$8 sm:$0x3] %vm3184_vm1, %v1188_v36  ;;  %1180 = vst.msk [vmem:[#allocation3 + $0xa4] ss:$8 sm:$0x3] %vm3184_vm1, %v1177_v41  ;;  %v1207_v43 = vpop.permute.xlu1 %1206  ;;  %v3632_v55 = vsub.f32 %v3611_v7, %v4084_v12  ;;  %v3637_v56 = vsub.f32 %v3609_v2, %v4082_v9 }
 0x17a   : > { %v1208_v58 = vrot.slane %v1207_v43, 1  ;;  %v1197_v62 = vrot.slane %v1196_v45, 1  ;;  %v1281_v41 = vld [vmem:[#allocation9 + $0x5] ss:$8 sm:$0x3]  ;;  %v1717_v9 = vand.u32 4294901760, %v1716_v1 }
 0x17b   : > { %4126 = vst [vmem:[#allocation19_spill] sm:$0xff] %v3632_v55  ;;  %4127 = vst [vmem:[#allocation20_spill] sm:$0xff] %v3637_v56  ;;  %v1721_v8 = vand.u32 4294901760, %v3632_v55  ;;  %v1727_v60 = vand.u32 4294901760, %v3637_v56  ;;  %v1286_v12 = vrot.slane %v1281_v41, %v3223_v14 }
 0x17c   : > { %v1209_v46 = vsel %vm1132_vm0, %v1207_v43, %v1208_v58  ;;  %v1199_v17 = vsel %vm1198_vm6, %v1196_v45, %v1197_v62  ;;  %v1217_v16 = vpop.permute.xlu0 %1216  ;;  %v1711_v45 = vand.u32 4294901760, %v1710_v63  ;;  %vm1328_vm0 = vcmask 105472  }
 0x17d   : > { %1212 = vst.msk [vmem:[#allocation3 + $0xa7] ss:$8 sm:$0x3] %vm3184_vm1, %v1209_v46  ;;  %1202 = vst.msk [vmem:[#allocation3 + $0xa6] ss:$8 sm:$0x3] %vm3184_vm1, %v1199_v17  ;;  %v1227_v23 = vpop.permute.xlu1 %1226  ;;  %v1722_v38 = vsub.f32 %v3632_v55, %v1721_v8  ;;  %v3654_v37 = vpack.c.bf16 %v1721_v8, %v1709_v10  ;;  %v1728_v36 = vsub.f32 %v3637_v56, %v1727_v60 }
 0x17e   : > { %v3657_v0 = vpack.c.bf16 %v1727_v60, %v1715_v13  ;;  %v1228_v43 = vrot.slane %v1227_v23, 1  ;;  %v1218_v58 = vrot.slane %v1217_v16, 1  ;;  %v1290_v10 = vrot.slane %v1281_v41, %v3226_v15 }
 0x17f   : > { %v1723_v62 = vand.u32 4294901760, %v1722_v38  ;;  %v1729_v46 = vand.u32 4294901760, %v1728_v36 }
 0x180   : > { %v1229_v11 = vsel %vm1154_vm3, %v1227_v23, %v1228_v43  ;;  %v1219_v17 = vsel %vm1143_vm15, %v1217_v16, %v1218_v58  ;;  %v1237_v8 = vpop.permute.xlu0 %1236  ;;  %vm1339_vm15 = vcmask 1022976   ;;  %vm1350_vm3 = vcmask 891904  }
 0x181   : > { %1232 = vst.msk [vmem:[#allocation3 + $0xb1] ss:$8 sm:$0x3] %vm3184_vm1, %v1229_v11  ;;  %1222 = vst.msk [vmem:[#allocation3 + $0xb0] ss:$8 sm:$0x3] %vm3184_vm1, %v1219_v17  ;;  %v1247_v13 = vpop.permute.xlu1 %1246  ;;  %v3667_v63 = vpack.c.bf16 %v1723_v62, %v1711_v45  ;;  %v3669_v38 = vpack.c.bf16 %v1729_v46, %v1717_v9 }
 0x182   : > { %v1248_v1 = vrot.slane %v1247_v13, 1  ;;  %v1238_v23 = vrot.slane %v1237_v8, 1 }
 0x184   : > { %v1276_v60 = vld [vmem:[#allocation3 + $0xa0] sm:$0xff]  ;;  %v1277_v16 = vld [vmem:[#allocation3 + $0xa8] sm:$0xff]  ;;  %v1249_v36 = vsel %vm1176_vm5, %v1247_v13, %v1248_v1  ;;  %v1239_v41 = vsel %vm1165_vm2, %v1237_v8, %v1238_v23  ;;  %v1257_v58 = vpop.permute.xlu0 %1256  ;;  %vm1361_vm2 = vcmask 760832  }
 0x185   : > { %v3673_v43 = vmul.f32 %v1286_v12, %v1276_v60  ;;  %v3675_v11 = vmul.f32 %v1290_v10, %v1277_v16  ;;  %1252 = vst.msk [vmem:[#allocation3 + $0xb3] ss:$8 sm:$0x3] %vm3184_vm1, %v1249_v36  ;;  %1242 = vst.msk [vmem:[#allocation3 + $0xb2] ss:$8 sm:$0x3] %vm3184_vm1, %v1239_v41  ;;  %v1267_v9 = vpop.permute.xlu1 %1266 }
 0x186   : > { %v1268_v45 = vrot.slane %v1267_v9, 1  ;;  %v1258_v62 = vrot.slane %v1257_v58, 1 }
 0x187   : > { %1297 = vst [vmem:[#allocation3 + $0xa0] sm:$0xff] %v3673_v43  ;;  %1298 = vst [vmem:[#allocation3 + $0xa8] sm:$0xff] %v3675_v11  ;;  %v4085_v60 = vand.u32 4294901760, %v3675_v11  ;;  %v4086_v16 = vand.u32 4294901760, %v3673_v43 }
 0x188   : > { %v1269_v46 = vsel %vm1198_vm6, %v1267_v9, %v1268_v45  ;;  %v1259_v17 = vsel %vm1187_vm4, %v1257_v58, %v1258_v62  ;;  %v820_v8 = vpop.permute.xlu0 %819  ;;  %vm1372_vm4 = vcmask 629760  }
 0x189   : > { %1272 = vst.msk [vmem:[#allocation3 + $0xb5] ss:$8 sm:$0x3] %vm3184_vm1, %v1269_v46  ;;  %1262 = vst.msk [vmem:[#allocation3 + $0xb4] ss:$8 sm:$0x3] %vm3184_vm1, %v1259_v17  ;;  %v831_v13 = vpop.permute.xlu1 %830  ;;  %v3700_v46 = vsub.f32 %v3675_v11, %v4085_v60  ;;  %v3705_v17 = vsub.f32 %v3673_v43, %v4086_v16 }
 0x18a   : > { %v832_v1 = vrot.slane %v831_v13, 1  ;;  %v821_v23 = vrot.slane %v820_v8, 1 }
 0x18b   : > { %4128 = vst [vmem:[#allocation21_spill] sm:$0xff] %v3700_v46  ;;  %4129 = vst [vmem:[#allocation22_spill] sm:$0xff] %v3705_v17 }
 0x18c   : > { %v834_v36 = vsel %vm833_vm7, %v831_v13, %v832_v1  ;;  %v823_v41 = vsel %vm822_vm8, %v820_v8, %v821_v23  ;;  %v842_v58 = vpop.permute.xlu0 %841 }
 0x18d   : > { %837 = vst.msk [vmem:[#allocation3 + $0x61] ss:$8 sm:$0x3] %vm3184_vm1, %v834_v36  ;;  %826 = vst.msk [vmem:[#allocation3 + $0x60] ss:$8 sm:$0x3] %vm3184_vm1, %v823_v41  ;;  %v857_v9 = vpop.permute.xlu1 %856 }
 0x18e   : > { %v858_v45 = vrot.slane %v857_v9, 1  ;;  %v843_v62 = vrot.slane %v842_v58, 1 }
 0x190   : > { %v1278_v13 = vld [vmem:[#allocation3 + $0xb0] sm:$0xff]  ;;  %v1279_v8 = vld [vmem:[#allocation3 + $0xb8] sm:$0xff]  ;;  %v860_v1 = vsel %vm859_vm9, %v857_v9, %v858_v45  ;;  %v845_v23 = vsel %vm844_vm10, %v842_v58, %v843_v62  ;;  %v868_v16 = vpop.permute.xlu0 %867  ;;  %v1733_v9 = vand.u32 4294901760, %v3700_v46  ;;  %v1739_v58 = vand.u32 4294901760, %v3705_v17 }
 0x191   : > { %v3709_v36 = vmul.f32 %v1286_v12, %v1278_v13  ;;  %v3711_v41 = vmul.f32 %v1290_v10, %v1279_v8  ;;  %863 = vst.msk [vmem:[#allocation3 + $0x64] ss:$8 sm:$0x3] %vm3184_vm1, %v860_v1  ;;  %848 = vst.msk [vmem:[#allocation3 + $0x62] ss:$8 sm:$0x3] %vm3184_vm1, %v845_v23  ;;  %v879_v60 = vpop.permute.xlu1 %878 }
 0x192   : > { %v880_v61 = vrot.slane %v879_v60, 1  ;;  %v869_v48 = vrot.slane %v868_v16, 1 }
 0x193   : > { %1299 = vst [vmem:[#allocation3 + $0xb0] sm:$0xff] %v3709_v36  ;;  %1300 = vst [vmem:[#allocation3 + $0xb8] sm:$0xff] %v3711_v41  ;;  %v4090_v12 = vand.u32 4294901760, %v3711_v41  ;;  %v4092_v10 = vand.u32 4294901760, %v3709_v36 }
 0x194   : > { %v882_v45 = vsel %vm881_vm11, %v879_v60, %v880_v61  ;;  %v871_v62 = vsel %vm870_vm12, %v868_v16, %v869_v48  ;;  %v890_v8 = vpop.permute.xlu0 %889  ;;  %v1734_v60 = vsub.f32 %v3700_v46, %v1733_v9  ;;  %v1740_v16 = vsub.f32 %v3705_v17, %v1739_v58 }
 0x195   : > { %885 = vst.msk [vmem:[#allocation3 + $0x66] ss:$8 sm:$0x3] %vm3184_vm1, %v882_v45  ;;  %874 = vst.msk [vmem:[#allocation3 + $0x65] ss:$8 sm:$0x3] %vm3184_vm1, %v871_v62  ;;  %v900_v13 = vpop.permute.xlu1 %899  ;;  %v3732_v1 = vsub.f32 %v3711_v41, %v4090_v12  ;;  %v3737_v23 = vsub.f32 %v3709_v36, %v4092_v10 }
 0x196   : > { %v901_v61 = vrot.slane %v900_v13, 1  ;;  %v891_v48 = vrot.slane %v890_v8, 1 }
 0x197   : > { %4130 = vst [vmem:[#allocation23_spill] sm:$0xff] %v3737_v23  ;;  %v1745_v45 = vand.u32 4294901760, %v3732_v1  ;;  %v1751_v62 = vand.u32 4294901760, %v3737_v23 }
 0x198   : > { %v902_v31 = vsel %vm833_vm7, %v900_v13, %v901_v61  ;;  %v892_v10 = vsel %vm822_vm8, %v890_v8, %v891_v48  ;;  %v910_v22 = vpop.permute.xlu0 %909  ;;  %v1735_v61 = vand.u32 4294901760, %v1734_v60  ;;  %v1741_v48 = vand.u32 4294901760, %v1740_v16 }
 0x199   : > { %905 = vst.msk [vmem:[#allocation3 + $0x70] ss:$8 sm:$0x3] %vm3184_vm1, %v902_v31  ;;  %895 = vst.msk [vmem:[#allocation3 + $0x67] ss:$8 sm:$0x3] %vm3184_vm1, %v892_v10  ;;  %v924_v55 = vpop.permute.xlu1 %923  ;;  %v1746_v40 = vsub.f32 %v3732_v1, %v1745_v45  ;;  %v3754_v32 = vpack.c.bf16 %v1745_v45, %v1733_v9  ;;  %v1752_v56 = vsub.f32 %v3737_v23, %v1751_v62 }
 0x19a   : > { %v3757_v46 = vpack.c.bf16 %v1751_v62, %v1739_v58  ;;  %v925_v12 = vrot.slane %v924_v55, 1  ;;  %v911_v13 = vrot.slane %v910_v22, 1 }
 0x19b   : > { %v1747_v8 = vand.u32 4294901760, %v1746_v40  ;;  %v1753_v17 = vand.u32 4294901760, %v1752_v56 }
 0x19c   : > { %v926_v31 = vsel %vm859_vm9, %v924_v55, %v925_v12  ;;  %v912_v10 = vsel %vm844_vm10, %v910_v22, %v911_v13  ;;  %v934_v45 = vpop.permute.xlu0 %933 }
 0x19d   : > { %929 = vst.msk [vmem:[#allocation3 + $0x73] ss:$8 sm:$0x3] %vm3184_vm1, %v926_v31  ;;  %915 = vst.msk [vmem:[#allocation3 + $0x71] ss:$8 sm:$0x3] %vm3184_vm1, %v912_v10  ;;  %v944_v9 = vpop.permute.xlu1 %943  ;;  %v3765_v58 = vpack.c.bf16 %v1747_v8, %v1735_v61  ;;  %v3767_v62 = vpack.c.bf16 %v1753_v17, %v1741_v48 }
 0x19e   : > { %v945_v60 = vrot.slane %v944_v9, 1  ;;  %v935_v40 = vrot.slane %v934_v45, 1 }
 0x1a0   : > { %v946_v56 = vsel %vm881_vm11, %v944_v9, %v945_v60  ;;  %v936_v55 = vsel %vm870_vm12, %v934_v45, %v935_v40  ;;  %v1304_v12 = vpop.permute.xlu0 %1303  ;;  %v3781_v9 = vld [vmem:[#allocation3 + $0x68] sm:$0xff]  ;;  %v3783_v45 = vld [vmem:[#allocation3 + $0x60] sm:$0xff] }
 0x1a1   : > { %949 = vst.msk [vmem:[#allocation3 + $0x75] ss:$8 sm:$0x3] %vm3184_vm1, %v946_v56  ;;  %939 = vst.msk [vmem:[#allocation3 + $0x74] ss:$8 sm:$0x3] %vm3184_vm1, %v936_v55  ;;  %v1315_v22 = vpop.permute.xlu1 %1314 }
 0x1a2   : > { %v1316_v16 = vrot.slane %v1315_v22, 1  ;;  %v1305_v13 = vrot.slane %v1304_v12, 1 }
 0x1a4   : > { %v1318_v17 = vsel %vm1317_vm13, %v1315_v22, %v1316_v16  ;;  %v1307_v61 = vsel %vm1306_vm14, %v1304_v12, %v1305_v13  ;;  %v1326_v48 = vpop.permute.xlu0 %1325  ;;  %v4100_v16 = vand.u32 4294901760, %v3781_v9 }
 0x1a5   : > { %1321 = vst.msk [vmem:[#allocation3 + $0xc1] ss:$8 sm:$0x3] %vm3184_vm1, %v1318_v17  ;;  %1310 = vst.msk [vmem:[#allocation3 + $0xc0] ss:$8 sm:$0x3] %vm3184_vm1, %v1307_v61  ;;  %v1337_v8 = vpop.permute.xlu1 %1336 }
 0x1a6   : > { %v1338_v31 = vrot.slane %v1337_v8, 1  ;;  %v1327_v10 = vrot.slane %v1326_v48, 1  ;;  %v4101_v17 = vand.u32 4294901760, %v3783_v45 }
 0x1a8   : > { %v1340_v60 = vsel %vm1339_vm15, %v1337_v8, %v1338_v31  ;;  %v1329_v40 = vsel %vm1328_vm0, %v1326_v48, %v1327_v10  ;;  %v3787_v56 = vld [vmem:[#allocation3 + $0x78] sm:$0xff]  ;;  %v3789_v55 = vld [vmem:[#allocation3 + $0x70] sm:$0xff]  ;;  %v1348_v12 = vpop.permute.xlu0 %1347 }
 0x1a9   : > { %1343 = vst.msk [vmem:[#allocation3 + $0xc3] ss:$8 sm:$0x3] %vm3184_vm1, %v1340_v60  ;;  %1332 = vst.msk [vmem:[#allocation3 + $0xc2] ss:$8 sm:$0x3] %vm3184_vm1, %v1329_v40  ;;  %v1359_v22 = vpop.permute.xlu1 %1358 }
 0x1aa   : > { %v4103_v13 = vand.u32 4294901760, %v3787_v56  ;;  %v4102_v61 = vand.u32 4294901760, %v3789_v55  ;;  %v1360_v8 = vrot.slane %v1359_v22, 1  ;;  %v1349_v48 = vrot.slane %v1348_v12, 1 }
 0x1ac   : > { %v3803_v31 = vpack.c.bf16 %v4103_v13, %v4100_v16  ;;  %v3809_v10 = vpack.c.bf16 %v4102_v61, %v4101_v17  ;;  %v1362_v60 = vsel %vm1361_vm2, %v1359_v22, %v1360_v8  ;;  %v1351_v40 = vsel %vm1350_vm3, %v1348_v12, %v1349_v48  ;;  %v1370_v16 = vpop.permute.xlu0 %1369 }
 0x1ad   : > { %1365 = vst.msk [vmem:[#allocation3 + $0xc5] ss:$8 sm:$0x3] %vm3184_vm1, %v1362_v60  ;;  %1354 = vst.msk [vmem:[#allocation3 + $0xc4] ss:$8 sm:$0x3] %vm3184_vm1, %v1351_v40  ;;  %v1381_v23 = vpop.permute.xlu1 %1380 }
 0x1ae   : > { %2463 = vmatprep.subr.bf16.mxu1 %v3803_v31  ;;  %2547 = vmatprep.subr.bf16.mxu0 %v3803_v31  ;;  %v4131_v17 = vand.u32 4294901760, %v3575_v51  ;;  %v4132_v61 = vand.u32 4294901760, %v3611_v7  ;;  %v1382_v12 = vrot.slane %v1381_v23, 1  ;;  %v1371_v8 = vrot.slane %v1370_v16, 1 }
 0x1af   : > { %2465 = vmatpush1.bf16.msra.mxu1 %v3809_v10  ;;  %2549 = vmatpush1.bf16.msra.mxu0 %v3809_v10  ;;  %v4133_v51 = vand.u32 4294901760, %v3573_v49  ;;  %v4134_v7 = vand.u32 4294901760, %v3609_v2  ;;  %v4135_v13 = vand.u32 4294901760, %v3675_v11  ;;  %v1475_v2 = vld [vmem:[#allocation7] sm:$0xff] }
 0x1b0   : > { %v3823_v22 = vpack.c.bf16 %v4132_v61, %v4131_v17  ;;  %v1383_v48 = vsel %vm1306_vm14, %v1381_v23, %v1382_v12  ;;  %v1373_v60 = vsel %vm1372_vm4, %v1370_v16, %v1371_v8  ;;  %v1391_v40 = vpop.permute.xlu0 %1390  ;;  %v4136_v23 = vand.u32 4294901760, %v3711_v41  ;;  %v1455_v16 = vld [vmem:[#allocation9 + $0x6] ss:$8 sm:$0x3] }
 0x1b1   : > { %v3835_v17 = vpack.c.bf16 %v4134_v7, %v4133_v51  ;;  %1386 = vst.msk [vmem:[#allocation3 + $0xc7] ss:$8 sm:$0x3] %vm3184_vm1, %v1383_v48  ;;  %1376 = vst.msk [vmem:[#allocation3 + $0xc6] ss:$8 sm:$0x3] %vm3184_vm1, %v1373_v60  ;;  %v1401_v61 = vpop.permute.xlu1 %1400  ;;  %v1460_v51 = vrot.slane %v1455_v16, %v3223_v14  ;;  %v1464_v7 = vrot.slane %v1455_v16, %v3226_v15 }
 0x1b2   : > { %2467 = vmatprep.subr.bf16.mxu1 %v3823_v22  ;;  %2551 = vmatprep.subr.bf16.mxu0 %v3823_v22  ;;  %v3845_v12 = vpack.c.bf16 %v4136_v23, %v4135_v13  ;;  %v1402_v49 = vrot.slane %v1401_v61, 1  ;;  %v1392_v8 = vrot.slane %v1391_v40, 1  ;;  %v4138_v41 = vand.u32 4294901760, %v3673_v43 }
 0x1b3   : > { %2469 = vmatpush1.bf16.msra.mxu1 %v3835_v17  ;;  %2553 = vmatpush1.bf16.msra.mxu0 %v3835_v17  ;;  %v4139_v13 = vand.u32 4294901760, %v3709_v36  ;;  %v1505_v43 = vsel %vm859_vm9, %v1475_v2, 0 }
 0x1b4   : > { %4137 = vst [vmem:[#allocation24_spill] sm:$0xff] %v3845_v12  ;;  %2471 = vmatprep.subr.bf16.mxu1 %v3845_v12  ;;  %2555 = vmatprep.subr.bf16.mxu0 %v3845_v12  ;;  %v1403_v48 = vsel %vm1328_vm0, %v1401_v61, %v1402_v49  ;;  %v1393_v11 = vsel %vm1317_vm13, %v1391_v40, %v1392_v8  ;;  %v1411_v61 = vpop.permute.xlu0 %1410  ;;  %v4142_v12 = vand.u32 4294901760, %v3787_v56 }
 0x1b5   : > { %v3857_v60 = vpack.c.bf16 %v4139_v13, %v4138_v41  ;;  %1406 = vst.msk [vmem:[#allocation3 + $0xd1] ss:$8 sm:$0x3] %vm3184_vm1, %v1403_v48  ;;  %1396 = vst.msk [vmem:[#allocation3 + $0xd0] ss:$8 sm:$0x3] %vm3184_vm1, %v1393_v11  ;;  %v1421_v23 = vpop.permute.xlu1 %1420 }
 0x1b6   : > { %v1422_v49 = vrot.slane %v1421_v23, 1  ;;  %v1412_v40 = vrot.slane %v1411_v61, 1  ;;  %v3876_v13 = vand.u32 4294901760, %v1505_v43 }
 0x1b7   : > { %4140 = vst [vmem:[#allocation25_spill] sm:$0xff] %v3857_v60  ;;  %2473 = vmatpush1.bf16.msra.mxu1 %v3857_v60  ;;  %2557 = vmatpush1.bf16.msra.mxu0 %v3857_v60 }
 0x1b8   : > { %v1450_v36 = vld [vmem:[#allocation3 + $0xc0] sm:$0xff]  ;;  %v1451_v14 = vld [vmem:[#allocation3 + $0xc8] sm:$0xff]  ;;  %v1423_v15 = vsel %vm1350_vm3, %v1421_v23, %v1422_v49  ;;  %v1413_v16 = vsel %vm1339_vm15, %v1411_v61, %v1412_v40  ;;  %v1431_v41 = vpop.permute.xlu0 %1430  ;;  %v3886_v49 = vsub.f32 %v1505_v43, %v3876_v13 }
 0x1b9   : > { %v3870_v8 = vmul.f32 %v1460_v51, %v1450_v36  ;;  %v1468_v48 = vmul.f32 %v1464_v7, %v1451_v14  ;;  %1426 = vst.msk [vmem:[#allocation3 + $0xd3] ss:$8 sm:$0x3] %vm3184_vm1, %v1423_v15  ;;  %1416 = vst.msk [vmem:[#allocation3 + $0xd2] ss:$8 sm:$0x3] %vm3184_vm1, %v1413_v16  ;;  %v1441_v11 = vpop.permute.xlu1 %1440 }
 0x1ba   : > { %v1442_v2 = vrot.slane %v1441_v11, 1  ;;  %v1432_v60 = vrot.slane %v1431_v41, 1  ;;  %4141 = vst [vmem:[#allocation26_spill] sm:$0xff] %v3886_v49  ;;  %v1602_v40 = vand.u32 4294901760, %v3886_v49 }
 0x1bb   : > { %1471 = vst [vmem:[#allocation3 + $0xc0] sm:$0xff] %v3870_v8  ;;  %1472 = vst [vmem:[#allocation3 + $0xc8] sm:$0xff] %v1468_v48  ;;  %v1555_v42 = vand.u32 4294901760, %v1468_v48  ;;  %v1557_v43 = vand.u32 4294901760, %v3870_v8 }
 0x1bc   : > { %v1443_v23 = vsel %vm1372_vm4, %v1441_v11, %v1442_v2  ;;  %v1433_v61 = vsel %vm1361_vm2, %v1431_v41, %v1432_v60  ;;  %v3892_v11 = vsub.f32 %v3787_v56, %v4142_v12  ;;  %v1603_v60 = vsub.f32 %v3886_v49, %v1602_v40 }
 0x1bd   : > { %1446 = vst.msk [vmem:[#allocation3 + $0xd5] ss:$8 sm:$0x3] %vm3184_vm1, %v1443_v23  ;;  %1436 = vst.msk [vmem:[#allocation3 + $0xd4] ss:$8 sm:$0x3] %vm3184_vm1, %v1433_v61 }
 0x1be   : > { %v4143_v23 = vand.u32 4294901760, %v3781_v9  ;;  %v4145_v56 = vand.u32 4294901760, %v3789_v55  ;;  %v4146_v49 = vand.u32 4294901760, %v3783_v45 }
 0x1c0   : > { %v3899_v61 = vsub.f32 %v3781_v9, %v4143_v23  ;;  %v3908_v12 = vsub.f32 %v3789_v55, %v4145_v56  ;;  %v3916_v9 = vsub.f32 %v3783_v45, %v4146_v49  ;;  %v4147_v49 = vmov 0.0  }
 0x1c2   : > { %v1685_v55 = vand.u32 4294901760, %v3899_v61  ;;  %v1703_v23 = vand.u32 4294901760, %v3908_v12  ;;  %v1691_v45 = vand.u32 4294901760, %v3916_v9 }
 0x1c4   : > { %v1452_v36 = vld [vmem:[#allocation3 + $0xd0] sm:$0xff]  ;;  %v1453_v14 = vld [vmem:[#allocation3 + $0xd8] sm:$0xff] }
 0x1c5   : > { %v1469_v15 = vmul.f32 %v1460_v51, %v1452_v36  ;;  %v1470_v16 = vmul.f32 %v1464_v7, %v1453_v14  ;;  %v1604_v36 = vand.u32 4294901760, %v1603_v60  ;;  %v1697_v14 = vand.u32 4294901760, %v3892_v11 }
 0x1c7   : > { %1473 = vst [vmem:[#allocation3 + $0xd0] sm:$0xff] %v1469_v15  ;;  %1474 = vst [vmem:[#allocation3 + $0xd8] sm:$0xff] %v1470_v16  ;;  %v1559_v41 = vand.u32 4294901760, %v1470_v16  ;;  %v1561_v2 = vand.u32 4294901760, %v1469_v15  ;;  %v1698_v60 = vsub.f32 %v3892_v11, %v1697_v14 }
 0x1c9   : > { %v3901_v51 = vpack.c.bf16 %v1559_v41, %v1555_v42  ;;  %v3903_v7 = vpack.c.bf16 %v1561_v2, %v1557_v43  ;;  %v1699_v56 = vand.u32 4294901760, %v1698_v60 }
 0x1cb   : > { %4144 = vst [vmem:[#allocation27_spill] sm:$0xff] %v3903_v7  ;;  %2475 = vmatprep.subr.bf16.mxu1 %v3901_v51  ;;  %2559 = vmatprep.subr.bf16.mxu0 %v3901_v51 }
 0x1cc   : > { %2477 = vmatpush1.bf16.msra.mxu1 %v3903_v7  ;;  %2561 = vmatpush1.bf16.msra.mxu0 %v3903_v7 }
 0x1cd   : > { %2479 = vmatprep.subr.bf16.mxu1 %v3366_v4  ;;  %2563 = vmatprep.subr.bf16.mxu0 %v3347_v47  ;;  %v1686_v47 = vsub.f32 %v3899_v61, %v1685_v55  ;;  %v1704_v4 = vsub.f32 %v3908_v12, %v1703_v23 }
 0x1cf   : > { %1605 = vmatmul.mubr.f32.vlgmr.msra.gmra.mrb[0].mxu1 %v1604_v36  ;;  %2048 = vmatmul.mubr.f32.vlgmr.msra.gmra.mrb[0].mxu0 %v1602_v40  ;;  %v3934_v40 = vsub.f32 %v1470_v16, %v1559_v41  ;;  %v1705_v36 = vand.u32 4294901760, %v1704_v4  ;;  %v2574_v16 = vpack.c.bf16 %v1697_v14, %v1685_v55 }
 0x1d0   : > { %2481 = vmatpush1.bf16.msra.mxu1 %v3368_v5  ;;  %2565 = vmatpush1.bf16.msra.mxu0 %v3350_v54  ;;  %v1692_v54 = vsub.f32 %v3916_v9, %v1691_v45  ;;  %v3939_v5 = vsub.f32 %v1468_v48, %v1555_v42  ;;  %v2576_v48 = vpack.c.bf16 %v1703_v23, %v1691_v45 }
 0x1d1   : > { %2483 = vmatprep.subr.bf16.mxu1 %v3482_v3  ;;  %2567 = vmatprep.subr.bf16.mxu0 %v3467_v44  ;;  %v1687_v44 = vand.u32 4294901760, %v1686_v47  ;;  %v3943_v3 = vsub.f32 %v1469_v15, %v1561_v2  ;;  %v1769_v41 = vand.u32 4294901760, %v3934_v40 }
 0x1d2   : > { %1815 = vmatprep.mubr.f32.mxu1 %v4147_v49  ;;  %2202 = vmatprep.mubr.f32.mxu0 %v4147_v49 }
 0x1d3   : > { %v2490_v7 = vpack.c.bf16 %v1699_v56, %v1687_v44  ;;  %v1775_v15 = vand.u32 4294901760, %v3943_v3  ;;  %v1770_v42 = vsub.f32 %v3934_v40, %v1769_v41 }
 0x1d4   : > { %2485 = vmatpush1.bf16.msra.mxu1 %v3484_v6  ;;  %2569 = vmatpush1.bf16.msra.mxu0 %v3470_v50  ;;  %v3947_v6 = vsub.f32 %v3870_v8, %v1557_v43  ;;  %v1693_v50 = vand.u32 4294901760, %v1692_v54 }
 0x1d5   : > { %2487 = vmatprep.subr.bf16.mxu1 %v3567_v25  ;;  %2571 = vmatprep.subr.bf16.mxu0 %v3554_v57  ;;  %v1757_v57 = vand.u32 4294901760, %v3939_v5  ;;  %v1771_v43 = vand.u32 4294901760, %v1770_v42 }
 0x1d6   : > { %v2492_v25 = vpack.c.bf16 %v1705_v36, %v1693_v50  ;;  %v1763_v8 = vand.u32 4294901760, %v3947_v6 }
 0x1d7   : > { %v2586_v55 = vpack.c.bf16 %v1769_v41, %v1757_v57 }
 0x1d8   : > { %2489 = vmatpush1.bf16.msra.mxu1 %v3569_v33  ;;  %2573 = vmatpush1.bf16.msra.mxu0 %v3557_v59  ;;  %v1758_v59 = vsub.f32 %v3939_v5, %v1757_v57  ;;  %v1776_v33 = vsub.f32 %v3943_v3, %v1775_v15  ;;  %v1764_v2 = vsub.f32 %v3947_v6, %v1763_v8 }
 0x1d9   : > { %2491 = vmatprep.subr.bf16.mxu1 %v2490_v7  ;;  %2575 = vmatprep.subr.bf16.mxu0 %v2574_v16  ;;  %v2588_v23 = vpack.c.bf16 %v1775_v15, %v1763_v8 }
 0x1da   : > { %v1759_v7 = vand.u32 4294901760, %v1758_v59  ;;  %v1777_v14 = vand.u32 4294901760, %v1776_v33 }
 0x1dc   : > { %2493 = vmatpush1.bf16.msra.mxu1 %v2492_v25  ;;  %2577 = vmatpush1.bf16.msra.mxu0 %v2576_v48 }
 0x1dd   : > { %2495 = vmatprep.subr.bf16.mxu1 %v3667_v63  ;;  %2579 = vmatprep.subr.bf16.mxu0 %v3654_v37  ;;  %v2502_v63 = vpack.c.bf16 %v1771_v43, %v1759_v7  ;;  %v1765_v37 = vand.u32 4294901760, %v1764_v2 }
 0x1e0   : > { %2497 = vmatpush1.bf16.msra.mxu1 %v3669_v38  ;;  %2581 = vmatpush1.bf16.msra.mxu0 %v3657_v0  ;;  %v2504_v38 = vpack.c.bf16 %v1777_v14, %v1765_v37  ;;  %v4148_v0 = vpack.c.bf16 %v3275_v52, %v3318_v28  ;;  %v4151_v52 = vpack.c.bf16 %v3444_v21, %v3404_v35  ;;  %v4153_v28 = vld [vmem:[#allocation16_spill] sm:$0xff] }
 0x1e1   : > { %2499 = vmatprep.subr.bf16.mxu1 %v3765_v58  ;;  %2583 = vmatprep.subr.bf16.mxu0 %v3754_v32  ;;  %v4149_v32 = vpack.c.bf16 %v3280_v53, %v3324_v30  ;;  %v4152_v53 = vpack.c.bf16 %v3529_v26, %v3502_v39  ;;  %v2520_v35 = vpack.c.bf16 %v3908_v12, %v3916_v9  ;;  %v4160_v21 = vld [vmem:[#allocation20_spill] sm:$0xff]  ;;  %v4161_v39 = vld [vmem:[#allocation18_spill] sm:$0xff]  ;;  %v4163_v26 = vld [vmem:[#allocation21_spill] sm:$0xff] }
 0x1e2   : > { %v4164_v58 = vpack.c.bf16 %v3732_v1, %v4163_v26  ;;  %v4170_v1 = vld [vmem:[#allocation27_spill] sm:$0xff]  ;;  %v4171_v12 = vld [vmem:[#allocation26_spill] sm:$0xff] }
 0x1e4   : > { %2501 = vmatpush1.bf16.msra.mxu1 %v3767_v62  ;;  %2585 = vmatpush1.bf16.msra.mxu0 %v3757_v46  ;;  %v4150_v46 = vpack.c.bf16 %v3438_v19, %v3399_v34  ;;  %v4156_v34 = vld [vmem:[#allocation15_spill] sm:$0xff]  ;;  %v4158_v19 = vld [vmem:[#allocation17_spill] sm:$0xff]  ;;  %v4165_v62 = vld [vmem:[#allocation24_spill] sm:$0xff] }
 0x1e5   : > { %2503 = vmatprep.subr.bf16.mxu1 %v2502_v63  ;;  %2587 = vmatprep.subr.bf16.mxu0 %v2586_v55 }
 0x1e8   : > { %2505 = vmatpush1.bf16.msra.mxu1 %v2504_v38  ;;  %2589 = vmatpush1.bf16.msra.mxu0 %v2588_v23 }
 0x1e9   : > { %2507 = vmatprep.subr.bf16.mxu1 %v4148_v0  ;;  %2591 = vmatprep.subr.bf16.mxu0 %v3316_v27  ;;  %v2518_v27 = vpack.c.bf16 %v3892_v11, %v3899_v61  ;;  %v4167_v11 = vld [vmem:[#allocation22_spill] sm:$0xff] }
 0x1eb   : > { %1817 = vmatmul.mubr.f32.vlgmr.msra.gmra.mrb[0].mxu1 %v3876_v13  ;;  %2204 = vmatmul.mubr.f32.vlgmr.msra.gmra.mrb[0].mxu0 %v3876_v13 }
 0x1ec   : > { %2509 = vmatpush1.bf16.msra.mxu1 %v4149_v32  ;;  %2593 = vmatpush1.bf16.msra.mxu0 %v3322_v29  ;;  %v4154_v29 = vld [vmem:[#allocation14_spill] sm:$0xff] }
 0x1ed   : > { %2511 = vmatprep.subr.bf16.mxu1 %v4150_v46  ;;  %2595 = vmatprep.subr.bf16.mxu0 %v3436_v18  ;;  %v4155_v30 = vpack.c.bf16 %v4153_v28, %v4154_v29  ;;  %v4157_v18 = vld [vmem:[#allocation19_spill] sm:$0xff] }
 0x1ee   : > { %1943 = vmatprep.mubr.f32.mxu1 %v4147_v49  ;;  %2302 = vmatprep.mubr.f32.mxu0 %v4147_v49 }
 0x1f0   : > { %2513 = vmatpush1.bf16.msra.mxu1 %v4151_v52  ;;  %2597 = vmatpush1.bf16.msra.mxu0 %v3442_v20  ;;  %v4159_v20 = vpack.c.bf16 %v4157_v18, %v4158_v19 }
 0x1f1   : > { %2515 = vmatprep.subr.bf16.mxu1 %v4152_v53  ;;  %2599 = vmatprep.subr.bf16.mxu0 %v3527_v24  ;;  %v4162_v24 = vpack.c.bf16 %v4160_v21, %v4161_v39 }
 0x1f4   : > { %2517 = vmatpush1.bf16.msra.mxu1 %v4155_v30  ;;  %2601 = vmatpush1.bf16.msra.mxu0 %v4156_v34 }
 0x1f5   : > { %2519 = vmatprep.subr.bf16.mxu1 %v2518_v27  ;;  %2603 = vmatprep.subr.bf16.mxu0 %v3803_v31  ;;  %v2530_v31 = vpack.c.bf16 %v3934_v40, %v3939_v5 }
 0x1f8   : > { %2521 = vmatpush1.bf16.msra.mxu1 %v2520_v35  ;;  %2605 = vmatpush1.bf16.msra.mxu0 %v3809_v10  ;;  %v4166_v10 = vld [vmem:[#allocation23_spill] sm:$0xff] }
 0x1f9   : > { %2523 = vmatprep.subr.bf16.mxu1 %v4159_v20  ;;  %2607 = vmatprep.subr.bf16.mxu0 %v3823_v22  ;;  %v4168_v61 = vpack.c.bf16 %v4166_v10, %v4167_v11  ;;  %v4169_v22 = vld [vmem:[#allocation25_spill] sm:$0xff] }
 0x1fc   : > { %2525 = vmatpush1.bf16.msra.mxu1 %v4162_v24  ;;  %2609 = vmatpush1.bf16.msra.mxu0 %v3835_v17  ;;  %v2532_v17 = vpack.c.bf16 %v3943_v3, %v3947_v6 }
 0x1fd   : > { %2527 = vmatprep.subr.bf16.mxu1 %v4164_v58  ;;  %2611 = vmatprep.subr.bf16.mxu0 %v4165_v62 }
 0x200   : > { %2529 = vmatpush1.bf16.msra.mxu1 %v4168_v61  ;;  %2613 = vmatpush1.bf16.msra.mxu0 %v4169_v22 }
 0x201   : > { %2531 = vmatprep.subr.bf16.mxu1 %v2530_v31  ;;  %2615 = vmatprep.subr.bf16.mxu0 %v3901_v51 }
 0x204   : > { %2533 = vmatpush1.bf16.msra.mxu1 %v2532_v17  ;;  %2617 = vmatpush1.bf16.msra.mxu0 %v4170_v1 }
 0x207   : > { %1946 = vmatmul.mubr.f32.vlgmr.msra.gmra.mrb[0].mxu1 %v4171_v12  ;;  %2304 = vmatmul.mubr.f32.vlgmr.msra.gmra.mrb[0].mxu0 %v3876_v13 }
 0x2da   : > { %v1947_v9 = vpop.f32.mrb[0].mxu1  ;;  %v2305_v60 = vpop.f32.mrb[0].mxu0 }
 0x2db   : > { %v2618_v45 = vadd.f32 %v2305_v60, %v1947_v9  ;;  %v1949_v47 = vpop.f32.mrb[1].mxu1  ;;  %v2307_v4 = vpop.f32.mrb[1].mxu0 }
 0x2dc   : > { %v2619_v49 = vadd.f32 %v2307_v4, %v1949_v47 }
 0x2dd   : > { %v2441_v40 = vmul.f32 -1.442695, %v2618_v45 }
 0x2de   : > { %v2442_v51 = vmul.f32 -1.442695, %v2619_v49 }
 0x2df   : > { %2746 = vpow2.f32 %v2441_v40 }
 0x2e0   : > { %2748 = vpow2.f32 %v2442_v51 }
 0x2e9   : > { %v2747_v56 = vpop.eup %2746 }
 0x2ea   : > { %v2749_v54 = vpop.eup %2748  ;;  %v2316_v5 = vadd.f32 1.0, %v2747_v56 }
 0x2eb   : > { %v2317_v44 = vadd.f32 1.0, %v2749_v54 }
 0x2ec   : > { %2750 = vrcp.f32 %v2316_v5 }
 0x2ed   : > { %2752 = vrcp.f32 %v2317_v44 }
 0x2f6   : > { %v2751_v13 = vpop.eup %2750 }
 0x2f7   : > { %v2753_v3 = vpop.eup %2752  ;;  %2322 = vst [vmem:[%s211_s30] sm:$0xff] %v2751_v13 }
 0x2f8   : > { %2323 = vst [vmem:[%s211_s30 + $0x8] sm:$0xff] %v2753_v3 }
 0x2f9   : > { %2853 = shalt.err (!%p2850_p7)
}
 0x2fa   : > { %s2854_s17 = scalar_lea.hbm %s4029_s21, 256  ;;  %s2858_s8 = scalar_lea.hbm %s4076_s3, 512 }
 0x2fb   : > { %p2855_p10 = scmp.ne.s32.totalorder %s4029_s21, %s2854_s17  ;;  %p2859_p0 = scmp.lt.u32.totalorder %s4029_s21, %s4076_s3 }
 0x2fc   : > { %p2860_p9 = scmp.lt.u32.totalorder %s2858_s8, %s2854_s17  ;;  %p2862_p2 = scmp.lt.u32.totalorder %s2854_s17, %s4029_s21 }
 0x2fd   : > { %p2856_p13 = pnand %p2855_p10, %p3105_p6 }
 0x2fe   : > { %p2861_p11 = por %p2860_p9, %p2859_p0 }
 0x2ff   : > { %p2857_p5 = pneg %p2856_p13 }
 0x300   : > { %p2863_p1 = por %p2862_p2, %p2861_p11 }
 0x302   : > { %p2864_p4 = pnand %p2863_p1, %p2857_p5 }
 0x304   : > { %2867 = shalt.err (!%p2864_p4)
}
 0x305   : > { %2638 = dma.vmem_to_hbm [thread:$0]  (%p3105_p6), %s4031_s18, 256, %s4029_s21, %s2325_s23  }
 0x306 PF: > { %s2351_s11 = sand.u32 1, %s2898_s12   ;;  %p4172_p8 = scmp.ne.s32.totalorder %s4109_s19, 0 }
 0x307   : > { %p4173_p12 = scmp.ge.s32.totalorder %s2910_s15, 2  ;;  %s2352_s27 = scalar_lea.sflag [#allocation6], %s2351_s11 }
 0x309   : > { %p2652_p3 = pnand %p4173_p12, %p4172_p8 }
 0x30b   : > { %2893 = dma.done.wait (!%p2652_p3), %s2352_s27, 256  }
 0x30c   : > { %2895 = vsyncadd (!%p2652_p3), %s2352_s27, 4294967040  ;;  %p17_p7 = scmp.ge.s32.totalorder %s3042_s26, 4   ;;  %s4174_s12 = smov %s2902_s13 }
 0x30d   : > { %s4175_s13 = smov %s2906_s14  ;;  %s4176_s14 = smov %s3101_s25 }
 0x30e   : > { %s4177_s15 = smov %s3042_s26  ;;  %19 = sbr.rel (!%p17_p7) target bundleno = 6 (0x6), region = 192 }
 0x315   :  { %2357 = vsyncpa [#allocation5], 1 }
 0x316   :  { %2359 = vsyncpa [#allocation5 + $0x1], 1 }
 0x317   :  { %2360 = vsyncpa [#allocation8], 1 }
 0x318   :  { %2361 = vsyncpa [#allocation6], 1 }
 0x319   :  { %2363 = vsyncpa [#allocation6 + $0x1], 1 }

</bundles_post_ra>
